<compile_context>
chip_gen: v7x
topology: tpu7x:2x2x1
jax: 0.10.0
libtpu: 0.0.40
codegen_flags: <defaults>
</compile_context>

<pallas_src>
import jax
import jax.numpy as jnp
from jax.experimental import pallas as pl
from jax.experimental.pallas import tpu as pltpu


def _round_up(x, m):
    return (x + m - 1) // m * m


# ---------------------------------------------------------------------------
# Kernel: transposed layout, batch on lanes.
#   idx_ref  : (d_in, tb)            int32    -- category indices, batch on lanes
#   at_ref   : (Hp, d_in*num_emb)    f32/bf16 -- fused (emb@W1 + b1/d_in | wide + bo/d_in)
#   w2t_ref  : (Hp, Hp)              f32/bf16 -- second hidden layer, transposed
#   vec_ref  : (Hp, 2)               f32      -- [:,0]=b2, [:,1]=wo
#   out_ref  : (1, tb)               f32      -- sigmoid(logits), lane-dense
# ---------------------------------------------------------------------------
def deepwide_kernel(idx_ref, at_ref, w2t_ref, vec_ref, out_ref):
    d_in, tb = idx_ref.shape
    _hp, fused = at_ref.shape
    num_emb = fused // d_in
    cdt = at_ref.dtype                       # compute dtype (f32 or bf16)

    idx = idx_ref[...]                       # (d_in, tb) int32

    # Transposed one-hot over all features at once: hit[j, b] = 1 iff
    # j == f*num_emb + idx[f, b] for some f.  Pure VPU compares, no concat,
    # no relayout; lane-dense (fused, tb).
    row = jax.lax.broadcasted_iota(jnp.int32, (fused, tb), 0)
    hit = row == idx[0:1, :]
    for f in range(1, d_in):                 # d_in is small & static -> unrolled
        hit = jnp.logical_or(hit, row == idx[f:f + 1, :] + f * num_emb)
    onehot_t = hit.astype(cdt)               # (fused, tb); bf16 halves vregs

    vecs = vec_ref[...]                      # (Hp, 2) f32
    b2 = vecs[:, 0:1]                        # (Hp, 1)
    wo = vecs[:, 1:2]                        # (Hp, 1)

    # Fused gather + wide + first Linear (+ b1, bo): one lane-dense MXU matmul.
    pre = jnp.dot(at_ref[...], onehot_t,
                  preferred_element_type=jnp.float32)              # (Hp, tb) f32
    wide = pre[-1:, :]                       # (1, tb): wide sum + output bias

    h = jnp.maximum(pre, 0.0).astype(cdt)    # ReLU in f32; wide row killed below
    h2 = jnp.dot(w2t_ref[...], h,
                 preferred_element_type=jnp.float32) + b2          # (Hp, tb) f32
    h2 = jnp.maximum(h2, 0.0)

    # Output head as VPU multiply + sublane (XLU) reduce — no N=1 matmul.
    deep = jnp.sum(h2 * wo, axis=0, keepdims=True)                 # (1, tb)

    out_ref[...] = jax.nn.sigmoid(deep + wide)                     # lane-dense store


# ---------------------------------------------------------------------------
# One-time parameter preparation (pure layout / weight reparametrization).
# bf16 is the recommended compute dtype on v5e, v6e and v7x (bf16-native MXUs;
# activations stay f32 in the kernel); pass jnp.float32 for an exact path.
# ---------------------------------------------------------------------------
def prepare_params(params, dim_input, *, compute_dtype=jnp.bfloat16):
    emb_tbl, wide_tbl, w1, b1, w2, b2, wo, bo = params
    num_emb, dim_emb = emb_tbl.shape
    H = w1.shape[1]
    assert w1.shape[0] == dim_input * dim_emb
    Hp = _round_up(H + 1, 128)               # +1: reserve last row for wide/bo
    fused = dim_input * num_emb

    # A_T[h, f*num_emb + k] = sum_e emb[k, e] * W1[f*dim_emb + e, h]
    w1_3d = w1.reshape(dim_input, dim_emb, H)                      # [f, e, h]
    at = jnp.einsum("ke,feh->hfk", emb_tbl, w1_3d).reshape(H, fused)

    a_t = jnp.zeros((Hp, fused), jnp.float32)
    # Fold b1 into the deep rows: every feature hits exactly one column, so the
    # sum over d_in one-hot hits reconstructs b1[h].
    a_t = a_t.at[:H, :].set(at + b1[0, :, None] / dim_input)
    # Wide row carries the wide embedding column plus the output bias bo.
    a_t = a_t.at[Hp - 1, :].set(jnp.tile(wide_tbl[:, 0], dim_input)
                                + bo[0, 0] / dim_input)

    w2_t = jnp.zeros((Hp, Hp), jnp.float32).at[:H, :H].set(w2.T)

    # Packed per-channel vectors (kept f32; lane-padded once, single BlockSpec).
    vecs = jnp.zeros((Hp, 2), jnp.float32)
    vecs = vecs.at[:H, 0].set(b2[0, :])
    vecs = vecs.at[:H, 1].set(wo[:, 0])

    return (a_t.astype(compute_dtype), w2_t.astype(compute_dtype), vecs, num_emb)


# ---------------------------------------------------------------------------
# Wrapper
# ---------------------------------------------------------------------------
def deepwide_forward(inputs, prepared, *, batch_tile=256):
    """inputs: (B, dim_input) int.  Returns (B, 1) float32.

    batch_tile: sweep 256..1024; keep >= 2 grid steps so v7x's two TensorCores
    both get work (the 1-D batch axis is marked "parallel").
    """
    a_t, w2_t, vecs, num_emb = prepared
    B, d_in = inputs.shape
    Hp, fused = a_t.shape

    # Clamp: nn.Embedding raises on out-of-range indices; the concatenated
    # one-hot would otherwise silently alias into a neighboring feature block.
    idx = jnp.clip(inputs.astype(jnp.int32), 0, num_emb - 1)

    Bp = _round_up(B, batch_tile)
    idx_t = idx.T                                        # (d_in, B): batch on lanes
    if Bp != B:
        idx_t = jnp.pad(idx_t, ((0, 0), (0, Bp - B)))
    grid = (Bp // batch_tile,)

    # VMEM budget from actual operand sizes, capped at 56 MiB for v7x (64 MiB
    # physical per TensorCore); weights are single-buffered below.
    w_item = jnp.dtype(a_t.dtype).itemsize
    weight_bytes = (a_t.size + w2_t.size) * w_item + vecs.size * 4
    io_bytes = 2 * (d_in * batch_tile * 4 + batch_tile * 4)        # double-buffered tiles
    interm_bytes = (6 * Hp + fused) * batch_tile * 4               # onehot/pre/h/h2 slack
    vmem_limit = int(min(max(2 * (weight_bytes + io_bytes + interm_bytes),
                             8 << 20), 56 << 20))

    def build(single_buffer_weights):
        if single_buffer_weights:
            # Constant index_map => the block never changes; one buffer suffices.
            full = lambda a: pl.BlockSpec(a.shape, lambda i: (0, 0),
                                          pipeline_mode=pl.Buffered(1))
        else:
            full = lambda a: pl.BlockSpec(a.shape, lambda i: (0, 0))
        return pl.pallas_call(
            deepwide_kernel,
            out_shape=jax.ShapeDtypeStruct((1, Bp), jnp.float32),
            grid_spec=pltpu.PrefetchScalarGridSpec(
                num_scalar_prefetch=0,
                grid=grid,
                in_specs=[
                    pl.BlockSpec((d_in, batch_tile), lambda i: (0, i)),  # index tile
                    full(a_t),       # fused emb@W1 (+b1) | wide (+bo) matrix
                    full(w2_t),      # second hidden layer
                    full(vecs),      # b2 + head vector
                ],
                out_specs=pl.BlockSpec((1, batch_tile), lambda i: (0, i)),  # lane-dense
            ),
            compiler_params=pltpu.CompilerParams(
                dimension_semantics=("parallel",),
                vmem_limit_bytes=vmem_limit,
            ),
        )

    try:
        out = build(True)(idx_t, a_t, w2_t, vecs)
    except Exception:
        # Fallback for jax versions without BlockSpec(pipeline_mode=...):
        # identical semantics, default double-buffered weights.
        out = build(False)(idx_t, a_t, w2_t, vecs)

    return out[0, :B].reshape(B, 1)


# ---------------------------------------------------------------------------
# Synthetic params + pure-JAX reference (original, unfused parameterization)
# ---------------------------------------------------------------------------
def init_params(key, num_embedding, dim_embedding, dim_input, dim_hidden):
    ks = jax.random.split(key, 8)
    dim_in_flat = dim_input * dim_embedding
    emb_tbl = jax.random.normal(ks[0], (num_embedding, dim_embedding), jnp.float32) * 0.1
    wide_tbl = jax.random.normal(ks[1], (num_embedding, 1), jnp.float32) * 0.1
    w1 = jax.random.normal(ks[2], (dim_in_flat, dim_hidden), jnp.float32) * 0.1
    b1 = jax.random.normal(ks[3], (1, dim_hidden), jnp.float32) * 0.01
    w2 = jax.random.normal(ks[4], (dim_hidden, dim_hidden), jnp.float32) * 0.1
    b2 = jax.random.normal(ks[5], (1, dim_hidden), jnp.float32) * 0.01
    wo = jax.random.normal(ks[6], (dim_hidden, 1), jnp.float32) * 0.1
    bo = jax.random.normal(ks[7], (1, 1), jnp.float32) * 0.01
    return (emb_tbl, wide_tbl, w1, b1, w2, b2, wo, bo)


def reference_forward(inputs, params):
    emb_tbl, wide_tbl, w1, b1, w2, b2, wo, bo = params
    B, d_in = inputs.shape
    emb = emb_tbl[inputs].reshape(B, -1)
    h = jnp.maximum(emb @ w1 + b1, 0.0)
    h = jnp.maximum(h @ w2 + b2, 0.0)
    deep = h @ wo + bo
    wide = jnp.sum(wide_tbl[inputs], axis=1)
    return jax.nn.sigmoid(deep + wide)


if __name__ == "__main__":
    B = 512            # batch; batch_tile=256 -> grid=2 (both v7x TCs busy)
    dim_input = 4      # categorical features per example
    num_embedding = 32
    dim_embedding = 8
    dim_hidden = 32    # num_hidden = 2 hidden layers of this width

    key = jax.random.PRNGKey(0)
    k_idx, k_par = jax.random.split(key)

    inputs = jax.random.randint(k_idx, (B, dim_input), 0, num_embedding, dtype=jnp.int32)
    params = init_params(k_par, num_embedding, dim_embedding, dim_input, dim_hidden)
    ref = reference_forward(inputs, params)

    # f32 path: exact up to float reassociation in the fused first layer.
    prepared_f32 = prepare_params(params, dim_input, compute_dtype=jnp.float32)
    out = deepwide_forward(inputs, prepared_f32, batch_tile=256)
    out = jax.block_until_ready(out)
    assert out.shape == (B, 1)
    assert jnp.allclose(out, ref, atol=1e-4, rtol=1e-4), \
        float(jnp.max(jnp.abs(out - ref)))

    # bf16 weight path (recommended on v5e/v6e/v7x): looser tolerance.
    prepared_bf16 = prepare_params(params, dim_input)   # default bf16
    out_bf16 = deepwide_forward(inputs, prepared_bf16, batch_tile=256)
    out_bf16 = jax.block_until_ready(out_bf16)
    assert jnp.allclose(out_bf16, ref, atol=5e-2, rtol=0), \
        float(jnp.max(jnp.abs(out_bf16 - ref)))

    print("KERNEL_OK")
</pallas_src>

<mosaic_0001>
module attributes {stable_mosaic.version = 11 : i64} {
  func.func @deepwide_kernel(%arg0: i32, %arg1: memref<4x256xi32, #tpu.memory_space<vmem>>, %arg2: memref<128x128xf32, #tpu.memory_space<vmem>>, %arg3: memref<128x128xf32, #tpu.memory_space<vmem>>, %arg4: memref<128x2xf32, #tpu.memory_space<vmem>>, %arg5: memref<1x256xf32, #tpu.memory_space<vmem>>) attributes {dimension_semantics = [#tpu.dimension_semantics<parallel>], iteration_bounds = array<i64: 2>, scalar_prefetch = 0 : i64, scratch_operands = 0 : i64, tpu.core_type = #tpu.core_type<tc>, window_params = [{transform_indices = @transform_0, window_bounds = array<i64: 4, 256>}, {pipeline_mode = #tpu.pipeline_mode<synchronous>, transform_indices = @transform_1, window_bounds = array<i64: 128, 128>}, {pipeline_mode = #tpu.pipeline_mode<synchronous>, transform_indices = @transform_2, window_bounds = array<i64: 128, 128>}, {pipeline_mode = #tpu.pipeline_mode<synchronous>, transform_indices = @transform_3, window_bounds = array<i64: 128, 2>}, {transform_indices = @transform_4, window_bounds = array<i64: 1, 256>}]} {
    %c0 = arith.constant 0 : index
    %c0_0 = arith.constant 0 : index
    %0 = vector.load %arg1[%c0, %c0_0] : memref<4x256xi32, #tpu.memory_space<vmem>>, vector<4x256xi32>
    %1 = tpu.iota {dimensions = array<i32: 0>} : vector<128x256xi32>
    %2 = vector.extract_strided_slice %0 {offsets = [0, 0], sizes = [1, 256], strides = [1, 1]} : vector<4x256xi32> to vector<1x256xi32>
    %3 = vector.broadcast %2 : vector<1x256xi32> to vector<128x256xi32>
    %4 = arith.cmpi eq, %1, %3 : vector<128x256xi32>
    %5 = vector.extract_strided_slice %0 {offsets = [1, 0], sizes = [1, 256], strides = [1, 1]} : vector<4x256xi32> to vector<1x256xi32>
    %c32_i32 = arith.constant 32 : i32
    %6 = vector.broadcast %c32_i32 : i32 to vector<1x256xi32>
    %7 = arith.addi %5, %6 : vector<1x256xi32>
    %8 = vector.broadcast %7 : vector<1x256xi32> to vector<128x256xi32>
    %9 = arith.cmpi eq, %1, %8 : vector<128x256xi32>
    %10 = arith.ori %4, %9 : vector<128x256xi1>
    %11 = vector.extract_strided_slice %0 {offsets = [2, 0], sizes = [1, 256], strides = [1, 1]} : vector<4x256xi32> to vector<1x256xi32>
    %c64_i32 = arith.constant 64 : i32
    %12 = vector.broadcast %c64_i32 : i32 to vector<1x256xi32>
    %13 = arith.addi %11, %12 : vector<1x256xi32>
    %14 = vector.broadcast %13 : vector<1x256xi32> to vector<128x256xi32>
    %15 = arith.cmpi eq, %1, %14 : vector<128x256xi32>
    %16 = arith.ori %10, %15 : vector<128x256xi1>
    %17 = vector.extract_strided_slice %0 {offsets = [3, 0], sizes = [1, 256], strides = [1, 1]} : vector<4x256xi32> to vector<1x256xi32>
    %c96_i32 = arith.constant 96 : i32
    %18 = vector.broadcast %c96_i32 : i32 to vector<1x256xi32>
    %19 = arith.addi %17, %18 : vector<1x256xi32>
    %20 = vector.broadcast %19 : vector<1x256xi32> to vector<128x256xi32>
    %21 = arith.cmpi eq, %1, %20 : vector<128x256xi32>
    %22 = arith.ori %16, %21 : vector<128x256xi1>
    %23 = arith.extui %22 : vector<128x256xi1> to vector<128x256xi32>
    %24 = arith.sitofp %23 : vector<128x256xi32> to vector<128x256xf32>
    %c0_1 = arith.constant 0 : index
    %c0_2 = arith.constant 0 : index
    %25 = vector.load %arg4[%c0_1, %c0_2] : memref<128x2xf32, #tpu.memory_space<vmem>>, vector<128x2xf32>
    %26 = vector.extract_strided_slice %25 {offsets = [0, 0], sizes = [128, 1], strides = [1, 1]} : vector<128x2xf32> to vector<128x1xf32>
    %27 = vector.extract_strided_slice %25 {offsets = [0, 1], sizes = [128, 1], strides = [1, 1]} : vector<128x2xf32> to vector<128x1xf32>
    %c0_3 = arith.constant 0 : index
    %c0_4 = arith.constant 0 : index
    %28 = vector.load %arg2[%c0_3, %c0_4] : memref<128x128xf32, #tpu.memory_space<vmem>>, vector<128x128xf32>
    %cst = arith.constant dense<0.000000e+00> : vector<128x256xf32>
    %29 = tpu.matmul %28, %24, %cst {dimension_numbers = #tpu.dot_dimension_numbers<[1], [0], [0], [1], [0, 0, 1, 1], [], []>} : vector<128x128xf32>, vector<128x256xf32>, vector<128x256xf32> -> vector<128x256xf32>
    %30 = vector.extract_strided_slice %29 {offsets = [127, 0], sizes = [1, 256], strides = [1, 1]} : vector<128x256xf32> to vector<1x256xf32>
    %cst_5 = arith.constant 0.000000e+00 : f32
    %31 = vector.broadcast %cst_5 : f32 to vector<128x256xf32>
    %32 = arith.maximumf %29, %31 : vector<128x256xf32>
    %c0_6 = arith.constant 0 : index
    %c0_7 = arith.constant 0 : index
    %33 = vector.load %arg3[%c0_6, %c0_7] : memref<128x128xf32, #tpu.memory_space<vmem>>, vector<128x128xf32>
    %cst_8 = arith.constant dense<0.000000e+00> : vector<128x256xf32>
    %34 = tpu.matmul %33, %32, %cst_8 {dimension_numbers = #tpu.dot_dimension_numbers<[1], [0], [0], [1], [0, 0, 1, 1], [], []>} : vector<128x128xf32>, vector<128x256xf32>, vector<128x256xf32> -> vector<128x256xf32>
    %35 = vector.broadcast %26 : vector<128x1xf32> to vector<128x256xf32>
    %36 = arith.addf %34, %35 : vector<128x256xf32>
    %cst_9 = arith.constant 0.000000e+00 : f32
    %37 = vector.broadcast %cst_9 : f32 to vector<128x256xf32>
    %38 = arith.maximumf %36, %37 : vector<128x256xf32>
    %39 = vector.broadcast %27 : vector<128x1xf32> to vector<128x256xf32>
    %40 = arith.mulf %38, %39 : vector<128x256xf32>
    %cst_10 = arith.constant dense<0.000000e+00> : vector<256xf32>
    %41 = vector.multi_reduction <add>, %40, %cst_10 [0] : vector<128x256xf32> to vector<256xf32>
    %42 = vector.shape_cast %41 : vector<256xf32> to vector<1x256xf32>
    %43 = arith.addf %42, %30 : vector<1x256xf32>
    %44 = arith.negf %43 : vector<1x256xf32>
    %45 = math.exp %44 : vector<1x256xf32>
    %cst_11 = arith.constant 1.000000e+00 : f32
    %46 = vector.broadcast %cst_11 : f32 to vector<1x256xf32>
    %47 = arith.addf %46, %45 : vector<1x256xf32>
    %48 = arith.divf %46, %47 : vector<1x256xf32>
    %c0_12 = arith.constant 0 : index
    %c0_13 = arith.constant 0 : index
    %49 = vector.load %arg5[%c0_12, %c0_13] : memref<1x256xf32, #tpu.memory_space<vmem>>, vector<1x256xf32>
    tpu.vector_store %arg5[%c0_12, %c0_13], %48 {strides = array<i32>} : memref<1x256xf32, #tpu.memory_space<vmem>>, vector<1x256xf32>,
    return
  }
  func.func @transform_0(%arg0: i32) -> (i32, i32) {
    %c0_i32 = arith.constant 0 : i32
    %c0_i32_0 = arith.constant 0 : i32
    return %c0_i32, %arg0 : i32, i32
  }
  func.func @transform_1(%arg0: i32) -> (i32, i32) {
    %c0_i32 = arith.constant 0 : i32
    %c0_i32_0 = arith.constant 0 : i32
    %c0_i32_1 = arith.constant 0 : i32
    return %c0_i32, %c0_i32_0 : i32, i32
  }
  func.func @transform_2(%arg0: i32) -> (i32, i32) {
    %c0_i32 = arith.constant 0 : i32
    %c0_i32_0 = arith.constant 0 : i32
    %c0_i32_1 = arith.constant 0 : i32
    return %c0_i32, %c0_i32_0 : i32, i32
  }
  func.func @transform_3(%arg0: i32) -> (i32, i32) {
    %c0_i32 = arith.constant 0 : i32
    %c0_i32_0 = arith.constant 0 : i32
    %c0_i32_1 = arith.constant 0 : i32
    return %c0_i32, %c0_i32_0 : i32, i32
  }
  func.func @transform_4(%arg0: i32) -> (i32, i32) {
    %c0_i32 = arith.constant 0 : i32
    %c0_i32_0 = arith.constant 0 : i32
    return %c0_i32, %arg0 : i32, i32
  }
}

module attributes {stable_mosaic.version = 11 : i64} {
  func.func @deepwide_kernel(%arg0: i32, %arg1: memref<4x256xi32, #tpu.memory_space<vmem>>, %arg2: memref<128x128xf32, #tpu.memory_space<vmem>>, %arg3: memref<128x128xf32, #tpu.memory_space<vmem>>, %arg4: memref<128x2xf32, #tpu.memory_space<vmem>>, %arg5: memref<1x256xf32, #tpu.memory_space<vmem>>) attributes {dimension_semantics = [#tpu.dimension_semantics<parallel>], iteration_bounds = array<i64: 2>, scalar_prefetch = 0 : i64, scratch_operands = 0 : i64, tpu.core_type = #tpu.core_type<tc>, window_params = [{transform_indices = @transform_0, window_bounds = array<i64: 4, 256>}, {pipeline_mode = #tpu.pipeline_mode<synchronous>, transform_indices = @transform_1, window_bounds = array<i64: 128, 128>}, {pipeline_mode = #tpu.pipeline_mode<synchronous>, transform_indices = @transform_2, window_bounds = array<i64: 128, 128>}, {pipeline_mode = #tpu.pipeline_mode<synchronous>, transform_indices = @transform_3, window_bounds = array<i64: 128, 2>}, {transform_indices = @transform_4, window_bounds = array<i64: 1, 256>}]} {
    %c0 = arith.constant 0 : index
    %c0_0 = arith.constant 0 : index
    %0 = vector.load %arg1[%c0, %c0_0] : memref<4x256xi32, #tpu.memory_space<vmem>>, vector<4x256xi32>
    %1 = tpu.iota {dimensions = array<i32: 0>} : vector<128x256xi32>
    %2 = vector.extract_strided_slice %0 {offsets = [0, 0], sizes = [1, 256], strides = [1, 1]} : vector<4x256xi32> to vector<1x256xi32>
    %3 = vector.broadcast %2 : vector<1x256xi32> to vector<128x256xi32>
    %4 = arith.cmpi eq, %1, %3 : vector<128x256xi32>
    %5 = vector.extract_strided_slice %0 {offsets = [1, 0], sizes = [1, 256], strides = [1, 1]} : vector<4x256xi32> to vector<1x256xi32>
    %c32_i32 = arith.constant 32 : i32
    %6 = vector.broadcast %c32_i32 : i32 to vector<1x256xi32>
    %7 = arith.addi %5, %6 : vector<1x256xi32>
    %8 = vector.broadcast %7 : vector<1x256xi32> to vector<128x256xi32>
    %9 = arith.cmpi eq, %1, %8 : vector<128x256xi32>
    %10 = arith.ori %4, %9 : vector<128x256xi1>
    %11 = vector.extract_strided_slice %0 {offsets = [2, 0], sizes = [1, 256], strides = [1, 1]} : vector<4x256xi32> to vector<1x256xi32>
    %c64_i32 = arith.constant 64 : i32
    %12 = vector.broadcast %c64_i32 : i32 to vector<1x256xi32>
    %13 = arith.addi %11, %12 : vector<1x256xi32>
    %14 = vector.broadcast %13 : vector<1x256xi32> to vector<128x256xi32>
    %15 = arith.cmpi eq, %1, %14 : vector<128x256xi32>
    %16 = arith.ori %10, %15 : vector<128x256xi1>
    %17 = vector.extract_strided_slice %0 {offsets = [3, 0], sizes = [1, 256], strides = [1, 1]} : vector<4x256xi32> to vector<1x256xi32>
    %c96_i32 = arith.constant 96 : i32
    %18 = vector.broadcast %c96_i32 : i32 to vector<1x256xi32>
    %19 = arith.addi %17, %18 : vector<1x256xi32>
    %20 = vector.broadcast %19 : vector<1x256xi32> to vector<128x256xi32>
    %21 = arith.cmpi eq, %1, %20 : vector<128x256xi32>
    %22 = arith.ori %16, %21 : vector<128x256xi1>
    %23 = arith.extui %22 : vector<128x256xi1> to vector<128x256xi32>
    %24 = arith.sitofp %23 : vector<128x256xi32> to vector<128x256xf32>
    %c0_1 = arith.constant 0 : index
    %c0_2 = arith.constant 0 : index
    %25 = vector.load %arg4[%c0_1, %c0_2] : memref<128x2xf32, #tpu.memory_space<vmem>>, vector<128x2xf32>
    %26 = vector.extract_strided_slice %25 {offsets = [0, 0], sizes = [128, 1], strides = [1, 1]} : vector<128x2xf32> to vector<128x1xf32>
    %27 = vector.extract_strided_slice %25 {offsets = [0, 1], sizes = [128, 1], strides = [1, 1]} : vector<128x2xf32> to vector<128x1xf32>
    %c0_3 = arith.constant 0 : index
    %c0_4 = arith.constant 0 : index
    %28 = vector.load %arg2[%c0_3, %c0_4] : memref<128x128xf32, #tpu.memory_space<vmem>>, vector<128x128xf32>
    %cst = arith.constant dense<0.000000e+00> : vector<128x256xf32>
    %29 = tpu.matmul %28, %24, %cst {dimension_numbers = #tpu.dot_dimension_numbers<[1], [0], [0], [1], [0, 0, 1, 1], [], []>} : vector<128x128xf32>, vector<128x256xf32>, vector<128x256xf32> -> vector<128x256xf32>
    %30 = vector.extract_strided_slice %29 {offsets = [127, 0], sizes = [1, 256], strides = [1, 1]} : vector<128x256xf32> to vector<1x256xf32>
    %cst_5 = arith.constant 0.000000e+00 : f32
    %31 = vector.broadcast %cst_5 : f32 to vector<128x256xf32>
    %32 = arith.maximumf %29, %31 : vector<128x256xf32>
    %c0_6 = arith.constant 0 : index
    %c0_7 = arith.constant 0 : index
    %33 = vector.load %arg3[%c0_6, %c0_7] : memref<128x128xf32, #tpu.memory_space<vmem>>, vector<128x128xf32>
    %cst_8 = arith.constant dense<0.000000e+00> : vector<128x256xf32>
    %34 = tpu.matmul %33, %32, %cst_8 {dimension_numbers = #tpu.dot_dimension_numbers<[1], [0], [0], [1], [0, 0, 1, 1], [], []>} : vector<128x128xf32>, vector<128x256xf32>, vector<128x256xf32> -> vector<128x256xf32>
    %35 = vector.broadcast %26 : vector<128x1xf32> to vector<128x256xf32>
    %36 = arith.addf %34, %35 : vector<128x256xf32>
    %cst_9 = arith.constant 0.000000e+00 : f32
    %37 = vector.broadcast %cst_9 : f32 to vector<128x256xf32>
    %38 = arith.maximumf %36, %37 : vector<128x256xf32>
    %39 = vector.broadcast %27 : vector<128x1xf32> to vector<128x256xf32>
    %40 = arith.mulf %38, %39 : vector<128x256xf32>
    %cst_10 = arith.constant dense<0.000000e+00> : vector<256xf32>
    %41 = vector.multi_reduction <add>, %40, %cst_10 [0] : vector<128x256xf32> to vector<256xf32>
    %42 = vector.shape_cast %41 : vector<256xf32> to vector<1x256xf32>
    %43 = arith.addf %42, %30 : vector<1x256xf32>
    %44 = arith.negf %43 : vector<1x256xf32>
    %45 = math.exp %44 : vector<1x256xf32>
    %cst_11 = arith.constant 1.000000e+00 : f32
    %46 = vector.broadcast %cst_11 : f32 to vector<1x256xf32>
    %47 = arith.addf %46, %45 : vector<1x256xf32>
    %48 = arith.divf %46, %47 : vector<1x256xf32>
    %c0_12 = arith.constant 0 : index
    %c0_13 = arith.constant 0 : index
    %49 = vector.load %arg5[%c0_12, %c0_13] : memref<1x256xf32, #tpu.memory_space<vmem>>, vector<1x256xf32>
    tpu.vector_store %arg5[%c0_12, %c0_13], %48 {strides = array<i32>} : memref<1x256xf32, #tpu.memory_space<vmem>>, vector<1x256xf32>,
    return
  }
  func.func @transform_0(%arg0: i32) -> (i32, i32) {
    %c0_i32 = arith.constant 0 : i32
    %c0_i32_0 = arith.constant 0 : i32
    return %c0_i32, %arg0 : i32, i32
  }
  func.func @transform_1(%arg0: i32) -> (i32, i32) {
    %c0_i32 = arith.constant 0 : i32
    %c0_i32_0 = arith.constant 0 : i32
    %c0_i32_1 = arith.constant 0 : i32
    return %c0_i32, %c0_i32_0 : i32, i32
  }
  func.func @transform_2(%arg0: i32) -> (i32, i32) {
    %c0_i32 = arith.constant 0 : i32
    %c0_i32_0 = arith.constant 0 : i32
    %c0_i32_1 = arith.constant 0 : i32
    return %c0_i32, %c0_i32_0 : i32, i32
  }
  func.func @transform_3(%arg0: i32) -> (i32, i32) {
    %c0_i32 = arith.constant 0 : i32
    %c0_i32_0 = arith.constant 0 : i32
    %c0_i32_1 = arith.constant 0 : i32
    return %c0_i32, %c0_i32_0 : i32, i32
  }
  func.func @transform_4(%arg0: i32) -> (i32, i32) {
    %c0_i32 = arith.constant 0 : i32
    %c0_i32_0 = arith.constant 0 : i32
    return %c0_i32, %arg0 : i32, i32
  }
}

</mosaic_0001>

<bundles_post_ra>
// kernel: tpu_custom_call.1
= control target key start
LH: loop header
LB: loop body
LE: loop exit
PB: predicated region body
PF: predicated region fallthrough
CT: control target
= control target key end

     0   :  { %9 = vsyncpa [#allocation3], 0  ;;  %s2325_s0 = inlined_call_operand.hbm [shape: s32[4,512], index: 0, kind: input, shape index: {}]   ;;  %s2326_s1 = inlined_call_operand.vmem [shape: f32[128,128], index: 1, kind: input, shape index: {}]   ;;  %s2327_s2 = inlined_call_operand.hbm [shape: f32[128,128], index: 2, kind: input, shape index: {}]   ;;  %s2328_s3 = inlined_call_operand.vmem [shape: f32[128,2], index: 3, kind: input, shape index: {}]   ;;  %s2329_s4 = inlined_call_operand.hbm [shape: f32[1,512], index: 4, kind: output, shape index: {}]  }
   0x1   :  { %11 = vsyncpa [#allocation3 + $0x1], 0 }
   0x2   :  { %12 = vsyncpa [#allocation6], 0 }
   0x3   :  { %13 = vsyncpa [#allocation4], 0 }
   0x4   :  { %15 = vsyncpa [#allocation4 + $0x1], 0  ;;  %s1781_s15 = smov 0   ;;  %s1783_s16 = smov 0  }
   0x5   :  { %s1785_s17 = smov 0   ;;  %s1787_s18 = smov 0  }
   0x6 LB: > { %s1802_s19 = sadd.s32 4294967295, %s1744_s18   ;;  %s1390_s20 = sadd.s32 4294967294, %s1744_s18   ;;  %s1744_s18 = sphi %s1787_s18, %s2349_s18   ;;  %s1740_s17 = sphi %s1785_s17, %s2348_s17   ;;  %s1736_s16 = sphi %s1783_s16, %s2347_s16   ;;  %s1732_s15 = sphi %s1781_s15, %s2346_s15  }
   0x7   : > { %p41_p0 = scmp.ne.s32.totalorder %s1736_s16, %s1732_s15  ;;  %p2330_p1 = scmp.eq.s32.totalorder %s1802_s19, 0 }
   0x8   : > { %p134_p3 = scmp.eq.s32.totalorder %s1390_s20, 1  ;;  %p1391_p5 = scmp.ge.s32.totalorder %s1744_s18, 1 }
   0x9   : > { %p1811_p4 = por %p2330_p1, %p41_p0  ;;  %p141_p7 = scmp.lt.s32.totalorder %s1744_s18, 3 }
   0xa   : > { %p1816_p6 = por %p134_p3, %p41_p0  ;;  %s1746_s24 = smov [#allocation5]  }
   0xb   : > { %s2333_s21 = scalar_select %p1811_p4, 1, 0 }
   0xc   : > { %s2334_s22 = scalar_select %p1816_p6, 1, 0 }
   0xd   : > { %p1821_p8 = pnand %p1391_p5, %p141_p7  ;;  %s156_s25 = sshll.u32 %s1746_s24, 4  ;;  %s1825_s25 = int_to_ptr.vmem [resolvable:$true] %s156_s25 }
   0xe   : > { %s1837_s27 = sadd.s32 1, %s1744_s18   ;;  %s28_s28 = sadd.s32 1, %s1740_s17 }
   0xf   : > { %s2335_s23 = scalar_select %p1821_p8, 1, 0 }
  0x10   : > { %p1546_p9 = pneg %p1821_p8  ;;  %s25_s29 = ssub.s32 %s1744_s18, %s1837_s27 }
  0x11   : > { %s1616_s6 = scalar_lea.hbm %s2327_s2, 2048 }
  0x12   : > { %p1832_p11 = pnand %p1546_p9, %p2330_p1  ;;  %p1617_p12 = scmp.ne.s32.totalorder %s2327_s2, %s1616_s6 }
  0x13   : > { %p1623_p5 = scmp.lt.u32.totalorder %s1616_s6, %s2327_s2 }
  0x14   : > { %p1618_p13 = pneg %p1832_p11 }
  0x16   : > { %p1619_p0 = pnand %p1618_p13, %p1617_p12 }
  0x18   : > { %p1620_p3 = pneg %p1619_p0 }
  0x1a   : > { %p1625_p7 = pnand %p1623_p5, %p1620_p3 }
  0x1c   : > { %1628 = shalt.err (!%p1625_p7)
}
  0x1d   : > { %s1629_s11 = scalar_lea.vmem %s1825_s25, 2048  ;;  %p1637_p2 = scmp.lt.s32.totalorder %s1825_s25, %s1825_s25 }
  0x1e   : > { %p1630_p9 = scmp.ne.s32.totalorder %s1825_s25, %s1629_s11  ;;  %p1638_p6 = scmp.lt.s32.totalorder %s1629_s11, %s1629_s11 }
  0x20   : > { %p1632_p10 = pnand %p1630_p9, %p1618_p13  ;;  %p1639_p4 = por %p1638_p6, %p1637_p2 }
  0x22   : > { %p1633_p1 = pneg %p1632_p10 }
  0x24   : > { %p1640_p8 = pnand %p1639_p4, %p1633_p1 }
  0x26   : > { %1643 = shalt.err (!%p1640_p8)
}
  0x27   : > { %s1747_s12 = smov 128   ;;  %s1748_s13 = smov 8  }
  0x28   : > { %1549 = dma.hbm_to_vmem [thread:$0]  (!%p1832_p11), %s2327_s2, 2048, %s1825_s25, [#allocation6], %s1747_s12, %s1747_s12, %s1748_s13  }
  0x29   : > { %p26_p2 = scmp.eq.s32.totalorder %s25_s29, 0  ;;  %p35_p1 = scmp.ne.s32.totalorder %s1740_s17, %s1736_s16 }
  0x2a   : > { %p36_p4 = scmp.eq.s32.totalorder %s1744_s18, 0  ;;  %p1559_p6 = scmp.lt.s32.totalorder %s1744_s18, 2 }
  0x2b   : > { %s1868_s24 = scalar_select %p26_p2, %s1740_s17, %s28_s28  }
  0x2c   : > { %p37_p8 = por %p36_p4, %p35_p1  ;;  %p2337_p10 = scmp.eq.s32.totalorder %s1802_s19, 1 }
  0x2d   : > { %s173_s5 = sand.u32 1, %s1740_s17   ;;  %s1472_s6 = sshll.u32 %s1744_s18, 7 }
  0x2e   : > { %p1872_p12 = por %p2337_p10, %p35_p1  ;;  %s1394_s7 = sshll.u32 %s173_s5, 3 }
  0x2f   : > { %s1881_s9 = scalar_lea.hbm %s2325_s0, %s1472_s6  ;;  %s177_s25 = scalar_lea.vmem [#allocation2], %s1394_s7 }
  0x30   : > { %s185_s28 = sshll.u32 %s177_s25, 4  ;;  %p1883_p11 = pnand %p1559_p6, %p37_p8  ;;  %s1887_s28 = int_to_ptr.vmem [resolvable:$true] %s185_s28 }
  0x31   : > { %s174_s10 = scalar_lea.sflag [#allocation3], %s173_s5  ;;  %s1644_s11 = scalar_lea.hbm %s1881_s9, 128 }
  0x32   : > { %p1645_p13 = scmp.ne.s32.totalorder %s1881_s9, %s1644_s11  ;;  %p1646_p0 = pneg %p1883_p11 }
  0x33   : > { %s1649_s14 = scalar_lea.hbm %s2325_s0, 256  ;;  %p1650_p7 = scmp.lt.u32.totalorder %s1881_s9, %s2325_s0 }
  0x34   : > { %p1647_p3 = pnand %p1646_p0, %p1645_p13  ;;  %p1651_p9 = scmp.lt.u32.totalorder %s1649_s14, %s1644_s11 }
  0x35   : > { %p1653_p1 = scmp.lt.u32.totalorder %s1644_s11, %s1881_s9 }
  0x36   : > { %p1648_p5 = pneg %p1647_p3  ;;  %p1652_p2 = por %p1651_p9, %p1650_p7 }
  0x38   : > { %p1654_p4 = por %p1653_p1, %p1652_p2 }
  0x3a   : > { %p1655_p6 = pnand %p1654_p4, %p1648_p5 }
  0x3c   : > { %1658 = shalt.err (!%p1655_p6)
}
  0x3d   : > { %s1659_s5 = scalar_lea.vmem %s1887_s28, 128  ;;  %s1749_s7 = smov [#allocation2]  }
  0x3e   : > { %p1660_p8 = scmp.ne.s32.totalorder %s1887_s28, %s1659_s5  ;;  %s1664_s26 = sshll.u32 %s1749_s7, 4  ;;  %s1665_s26 = int_to_ptr.vmem [resolvable:$false] %s1664_s26 }
  0x3f   : > { %s1666_s8 = scalar_lea.vmem %s1665_s26, 256  ;;  %p1667_p3 = scmp.lt.s32.totalorder %s1887_s28, %s1665_s26 }
  0x40   : > { %p1662_p10 = pnand %p1660_p8, %p1646_p0  ;;  %p1668_p7 = scmp.lt.s32.totalorder %s1666_s8, %s1659_s5 }
  0x42   : > { %p1663_p13 = pneg %p1662_p10  ;;  %p1669_p9 = por %p1668_p7, %p1667_p3 }
  0x44   : > { %p1670_p2 = pnand %p1669_p9, %p1663_p13 }
  0x46   : > { %1673 = shalt.err (!%p1670_p2)
}
  0x47   : > { %1553 = dma.hbm_to_vmem [thread:$0]  (!%p1883_p11), %s1881_s9, 128, %s1887_s28, %s174_s10  }
  0x48   : > { %p2340_p5 = scmp.ne.s32.totalorder %s2335_s23, 0 }
  0x49   : > { %s1917_s25 = sand.u32 (!%p2340_p5), 1, %s1736_s16   ;;  %p2341_p0 = scmp.ne.s32.totalorder (!%p2340_p5), %s2333_s21, 0 }
  0x4a   : > { %194 = sbr.rel (%p2340_p5) target bundleno = 837 (0x345), region = 36  ;;  %s1398_s11 = sshll.u32 (!%p2340_p5), %s1917_s25, 3 }
  0x4b   : > { %s197_s12 = scalar_lea.sflag (!%p2340_p5), [#allocation3], %s1917_s25  ;;  %s200_s13 = scalar_lea.vmem (!%p2340_p5), [#allocation2], %s1398_s11 }
  0x51   : > { %1719 = dma.done.wait (%p2341_p0), %s197_s12, 128  }
  0x52   : > { %1721 = vsyncadd (%p2341_p0), %s197_s12, 4294967168  ;;  %p2342_p1 = scmp.eq.s32.totalorder %s1802_s19, 0 }
  0x54   : > { %1723 = dma.done.wait (%p2342_p1), [#allocation6], 2048   ;;  %p2343_p11 = pmov %p2342_p1 }
  0x55   : > { %v232_v0 = vlaneseq  ;;  %v1750_v1 = vmov 0.0   ;;  %v231_v8 = vld [vmem:[%s200_s13] sm:$0xff]  ;;  %v1751_v32 = vmov 1.0|1.0   ;;  %v622_v49 = vld [vmem:[%s2326_s1 + $0x10] sm:$0xff]  ;;  %v623_v50 = vld [vmem:[%s2326_s1 + $0x18] sm:$0xff] }
  0x56   : > { %1725 = vsyncadd (%p2343_p11), [#allocation6], 4294965248  ;;  %700 = vmatprep.mubr.f32.mxu0 %v1750_v1  ;;  %989 = vmatprep.mubr.f32.mxu1 %v1750_v1  ;;  %v297_v12 = vadd.s32 32, %v231_v8  ;;  %v378_v13 = vadd.s32 64, %v231_v8  ;;  %v459_v14 = vadd.s32 96, %v231_v8  ;;  %v620_v47 = vld [vmem:[%s2326_s1] sm:$0xff] }
  0x57   : > { %v1932_v2 = vshrl.u32 %v232_v0, 7  ;;  %v621_v48 = vld [vmem:[%s2326_s1 + $0x8] sm:$0xff]  ;;  %v624_v51 = vld [vmem:[%s2326_s1 + $0x20] sm:$0xff]  ;;  %v626_v53 = vld [vmem:[%s2326_s1 + $0x30] sm:$0xff]  ;;  %v1752_v63 = vmov 0   ;;  %s1400_s21 = sshll.u32 %s1917_s25, 1 }
  0x58   : > { %v625_v52 = vld [vmem:[%s2326_s1 + $0x28] sm:$0xff]  ;;  %v627_v54 = vld [vmem:[%s2326_s1 + $0x38] sm:$0xff]  ;;  %v628_v55 = vld [vmem:[%s2326_s1 + $0x40] sm:$0xff]  ;;  %1602 = vset.pattern.permute.xlu0 %v1752_v63  ;;  %1603 = vset.pattern.permute.xlu1 %v1752_v63  ;;  %s1473_s23 = sshll.u32 %s1802_s19, 5  ;;  %s228_s9 = scalar_lea.vmem [#allocation7], %s1400_s21 }
  0x59   : > { %v255_v3 = vsub.s32 4, %v1932_v2  ;;  %v251_v4 = vsub.s32 0, %v1932_v2  ;;  %v304_v5 = vsub.s32 5, %v1932_v2  ;;  %v385_v6 = vsub.s32 6, %v1932_v2  ;;  %v629_v56 = vld [vmem:[%s2326_s1 + $0x48] sm:$0xff]  ;;  %v630_v57 = vld [vmem:[%s2326_s1 + $0x50] sm:$0xff]  ;;  %s2281_s14 = scalar_lea.hbm %s2329_s4, %s1473_s23 }
  0x5a   : > { %v466_v7 = vsub.s32 7, %v1932_v2  ;;  %v300_v9 = vsub.s32 1, %v1932_v2  ;;  %v381_v10 = vsub.s32 2, %v1932_v2  ;;  %v234_v15 = vadd.s32 8, %v1932_v2  ;;  %v631_v58 = vld [vmem:[%s2326_s1 + $0x58] sm:$0xff]  ;;  %v632_v59 = vld [vmem:[%s2326_s1 + $0x60] sm:$0xff] }
  0x5b   : > { %v256_v11 = vrot.slane %v231_v8, %v255_v3  ;;  %v462_v16 = vsub.s32 3, %v1932_v2  ;;  %v305_v18 = vrot.slane %v297_v12, %v304_v5  ;;  %v386_v19 = vrot.slane %v378_v13, %v385_v6  ;;  %v633_v60 = vld [vmem:[%s2326_s1 + $0x68] sm:$0xff]  ;;  %v634_v61 = vld [vmem:[%s2326_s1 + $0x70] sm:$0xff]  ;;  %v635_v62 = vld [vmem:[%s2326_s1 + $0x78] sm:$0xff]  ;;  %s1310_s28 = sshll.u32 %s228_s9, 4  ;;  %s1296_s20 = scalar_lea.sflag [#allocation4], %s1917_s25  ;;  %s2283_s28 = int_to_ptr.vmem [resolvable:$true] %s1310_s28 }
  0x5c   : > { %v467_v20 = vrot.slane %v459_v14, %v466_v7  ;;  %v252_v21 = vrot.slane %v231_v8, %v251_v4  ;;  %v301_v22 = vrot.slane %v297_v12, %v300_v9  ;;  %v382_v26 = vrot.slane %v378_v13, %v381_v10  ;;  %v604_v3 = vld [vmem:[%s2328_s3] sm:$0xff]  ;;  %v605_v5 = vld [vmem:[%s2328_s3 + $0x8] sm:$0xff]  ;;  %v607_v6 = vld [vmem:[%s2328_s3 + $0x18] sm:$0xff]  ;;  %s1674_s6 = scalar_lea.vmem %s2283_s28, 32  ;;  %s1755_s19 = smov [#allocation7]  }
  0x5d   : > { %v1943_v17 = vrot.slane %v256_v11, %v251_v4  ;;  %v1947_v23 = vrot.slane %v305_v18, %v300_v9  ;;  %v1949_v24 = vrot.slane %v386_v19, %v381_v10  ;;  %v463_v29 = vrot.slane %v459_v14, %v462_v16  ;;  %847 = vperm.xlu0 %1602, %v604_v3   ;;  %v608_v8 = vld [vmem:[%s2328_s3 + $0x20] sm:$0xff]  ;;  %v610_v12 = vld [vmem:[%s2328_s3 + $0x30] sm:$0xff]  ;;  %v611_v14 = vld [vmem:[%s2328_s3 + $0x38] sm:$0xff]  ;;  %p1675_p4 = scmp.ne.s32.totalorder %s2283_s28, %s1674_s6  ;;  %s1678_s5 = sshll.u32 %s1755_s19, 4  ;;  %s1679_s5 = int_to_ptr.vmem [resolvable:$false] %s1678_s5 }
  0x5e   : > { %v1952_v25 = vrot.slane %v467_v20, %v462_v16  ;;  %v1960_v27 = vrot.slane %v252_v21, %v251_v4  ;;  %v1962_v28 = vrot.slane %v301_v22, %v300_v9  ;;  %v1967_v30 = vrot.slane %v382_v26, %v381_v10  ;;  %v606_v4 = vld [vmem:[%s2328_s3 + $0x10] sm:$0xff]  ;;  %v609_v9 = vld [vmem:[%s2328_s3 + $0x28] sm:$0xff]  ;;  %s1680_s7 = scalar_lea.vmem %s1679_s5, 64  ;;  %p1681_p10 = scmp.lt.s32.totalorder %s2283_s28, %s1679_s5 }
  0x5f   : > { %vm266_vm0 = vcmp.eq.s32.totalorder %v1932_v2, %v1943_v17  ;;  %vm268_vm1 = vcmp.eq.s32.totalorder %v234_v15, %v1943_v17  ;;  %vm315_vm2 = vcmp.eq.s32.totalorder %v1932_v2, %v1947_v23  ;;  %vm317_vm3 = vcmp.eq.s32.totalorder %v234_v15, %v1947_v23  ;;  %857 = vperm.xlu1 %1603, %v606_v4   ;;  %v613_v26 = vld [vmem:[%s2328_s3 + $0x48] sm:$0xff]  ;;  %p1676_p6 = pnand %p1675_p4, %p1872_p12  ;;  %p1682_p13 = scmp.lt.s32.totalorder %s1680_s7, %s1674_s6 }
  0x60   : > { %vm396_vm4 = vcmp.eq.s32.totalorder %v1932_v2, %v1949_v24  ;;  %vm347_vm5 = vmor %vm266_vm0, %vm315_vm2  ;;  %vm398_vm6 = vcmp.eq.s32.totalorder %v234_v15, %v1949_v24  ;;  %vm477_vm8 = vcmp.eq.s32.totalorder %v1932_v2, %v1952_v25  ;;  %vm479_vm10 = vcmp.eq.s32.totalorder %v234_v15, %v1952_v25 }
  0x61   : > { %vm349_vm7 = vmor %vm268_vm1, %vm317_vm3  ;;  %vm265_vm13 = vcmp.eq.s32.totalorder %v1932_v2, %v1960_v27  ;;  %vm314_vm14 = vcmp.eq.s32.totalorder %v1932_v2, %v1962_v28  ;;  %v1973_v31 = vrot.slane %v463_v29, %v462_v16  ;;  %vm267_vm0 = vcmp.eq.s32.totalorder %v234_v15, %v1960_v27  ;;  %852 = vperm.xlu0 %1602, %v605_v5   ;;  %p1677_p8 = pneg %p1676_p6  ;;  %p1683_p3 = por %p1682_p13, %p1681_p10 }
  0x62   : > { %vm428_vm9 = vmor %vm347_vm5, %vm396_vm4  ;;  %vm316_vm1 = vcmp.eq.s32.totalorder %v234_v15, %v1962_v28  ;;  %vm395_vm3 = vcmp.eq.s32.totalorder %v1932_v2, %v1967_v30  ;;  %vm397_vm5 = vcmp.eq.s32.totalorder %v234_v15, %v1967_v30  ;;  %v235_v33 = vadd.s32 16, %v1932_v2 }
  0x63   : > { %vm430_vm11 = vmor %vm349_vm7, %vm398_vm6  ;;  %vm476_vm7 = vcmp.eq.s32.totalorder %v1932_v2, %v1973_v31  ;;  %v236_v34 = vadd.s32 24, %v1932_v2  ;;  %v237_v35 = vadd.s32 32, %v1932_v2  ;;  %v238_v36 = vadd.s32 40, %v1932_v2  ;;  %862 = vperm.xlu1 %1603, %v607_v6   ;;  %p1684_p7 = pnand %p1683_p3, %p1677_p8 }
  0x64   : > { %vm509_vm12 = vmor %vm428_vm9, %vm477_vm8  ;;  %vm478_vm9 = vcmp.eq.s32.totalorder %v234_v15, %v1973_v31  ;;  %v239_v37 = vadd.s32 48, %v1932_v2  ;;  %v240_v38 = vadd.s32 56, %v1932_v2  ;;  %v241_v39 = vadd.s32 64, %v1932_v2 }
  0x65   : > { %vm511_vm15 = vmor %vm430_vm11, %vm479_vm10  ;;  %v242_v40 = vadd.s32 72, %v1932_v2  ;;  %v243_v41 = vadd.s32 80, %v1932_v2  ;;  %v244_v42 = vadd.s32 88, %v1932_v2  ;;  %v245_v43 = vadd.s32 96, %v1932_v2 }
  0x66   : > { %vm1474_vm2 = vmpackc.low %vm511_vm15, %vm509_vm12  ;;  %vm270_vm12 = vcmp.eq.s32.totalorder %v235_v33, %v1943_v17  ;;  %vm319_vm15 = vcmp.eq.s32.totalorder %v235_v33, %v1947_v23  ;;  %v246_v44 = vadd.s32 104, %v1932_v2  ;;  %v247_v45 = vadd.s32 112, %v1932_v2 }
  0x67   : > { %1475 = vmatprep.subr.msk.bf16.mxu0 %vm1474_vm2, %v1751_v32  ;;  %vm346_vm4 = vmor %vm265_vm13, %vm314_vm14  ;;  %vm272_vm14 = vcmp.eq.s32.totalorder %v236_v34, %v1943_v17  ;;  %vm321_vm2 = vcmp.eq.s32.totalorder %v236_v34, %v1947_v23  ;;  %v248_v46 = vadd.s32 120, %v1932_v2  ;;  %v1753_v7 = vmov 1  }
  0x68   : > { %vm348_vm6 = vmor %vm267_vm0, %vm316_vm1  ;;  %vm400_vm1 = vcmp.eq.s32.totalorder %v235_v33, %v1949_v24  ;;  %1604 = vset.pattern.permute.xlu0 %v1753_v7  ;;  %1605 = vset.pattern.permute.xlu1 %v1753_v7 }
  0x69   : > { %vm427_vm8 = vmor %vm346_vm4, %vm395_vm3  ;;  %vm402_vm4 = vcmp.eq.s32.totalorder %v236_v34, %v1949_v24  ;;  %1119 = vperm.xlu0 %1604, %v604_v3   ;;  %1123 = vperm.xlu1 %1605, %v605_v5  }
  0x6a   : > { %vm429_vm10 = vmor %vm348_vm6, %vm397_vm5  ;;  %vm481_vm6 = vcmp.eq.s32.totalorder %v235_v33, %v1952_v25 }
  0x6b   : > { %vm508_vm11 = vmor %vm427_vm8, %vm476_vm7  ;;  %vm483_vm8 = vcmp.eq.s32.totalorder %v236_v34, %v1952_v25 }
  0x6c   : > { %vm510_vm13 = vmor %vm429_vm10, %vm478_vm9 }
  0x6d   : > { %vm1476_vm0 = vmpackc.low %vm510_vm13, %vm508_vm11  ;;  %vm269_vm11 = vcmp.eq.s32.totalorder %v235_v33, %v1960_v27  ;;  %vm318_vm13 = vcmp.eq.s32.totalorder %v235_v33, %v1962_v28  ;;  %1127 = vperm.xlu0 %1604, %v606_v4   ;;  %1606 = vset.pattern.permute.xlu1 %v1752_v63 }
  0x6e   : > { %1477 = vmatpush1.bf16.msk.msra.mxu0 %vm1476_vm0, %v1751_v32  ;;  %vm351_vm3 = vmor %vm270_vm12, %vm319_vm15  ;;  %vm271_vm12 = vcmp.eq.s32.totalorder %v236_v34, %v1960_v27  ;;  %vm320_vm15 = vcmp.eq.s32.totalorder %v236_v34, %v1962_v28  ;;  %867 = vperm.xlu1 %1606, %v608_v8  }
  0x6f   : > { %vm353_vm5 = vmor %vm272_vm14, %vm321_vm2  ;;  %vm399_vm14 = vcmp.eq.s32.totalorder %v235_v33, %v1967_v30 }
  0x70   : > { %vm432_vm7 = vmor %vm351_vm3, %vm400_vm1  ;;  %vm401_vm3 = vcmp.eq.s32.totalorder %v236_v34, %v1967_v30 }
  0x71   : > { %vm434_vm9 = vmor %vm353_vm5, %vm402_vm4  ;;  %vm480_vm5 = vcmp.eq.s32.totalorder %v235_v33, %v1973_v31  ;;  %1131 = vperm.xlu0 %1604, %v607_v6  }
  0x72   : > { %vm513_vm10 = vmor %vm432_vm7, %vm481_vm6  ;;  %vm482_vm7 = vcmp.eq.s32.totalorder %v236_v34, %v1973_v31  ;;  %872 = vperm.xlu1 %1606, %v609_v9  }
  0x73   : > { %vm515_vm0 = vmor %vm434_vm9, %vm483_vm8 }
  0x74   : > { %vm1478_vm2 = vmpackc.low %vm515_vm0, %vm513_vm10  ;;  %vm274_vm10 = vcmp.eq.s32.totalorder %v237_v35, %v1943_v17  ;;  %vm323_vm0 = vcmp.eq.s32.totalorder %v237_v35, %v1947_v23 }
  0x75   : > { %1479 = vmatprep.subr.msk.bf16.mxu0 %vm1478_vm2, %v1751_v32  ;;  %vm350_vm1 = vmor %vm269_vm11, %vm318_vm13  ;;  %vm276_vm11 = vcmp.eq.s32.totalorder %v238_v36, %v1943_v17  ;;  %vm325_vm13 = vcmp.eq.s32.totalorder %v238_v36, %v1947_v23  ;;  %1135 = vperm.xlu0 %1604, %v608_v8  }
  0x76   : > { %vm352_vm4 = vmor %vm271_vm12, %vm320_vm15  ;;  %vm404_vm15 = vcmp.eq.s32.totalorder %v237_v35, %v1949_v24  ;;  %877 = vperm.xlu1 %1606, %v610_v12  }
  0x77   : > { %vm431_vm6 = vmor %vm350_vm1, %vm399_vm14  ;;  %vm406_vm14 = vcmp.eq.s32.totalorder %v238_v36, %v1949_v24 }
  0x78   : > { %vm433_vm8 = vmor %vm352_vm4, %vm401_vm3  ;;  %vm485_vm4 = vcmp.eq.s32.totalorder %v237_v35, %v1952_v25 }
  0x79   : > { %vm512_vm9 = vmor %vm431_vm6, %vm480_vm5  ;;  %vm487_vm6 = vcmp.eq.s32.totalorder %v238_v36, %v1952_v25  ;;  %1139 = vperm.xlu0 %1604, %v609_v9  }
  0x7a   : > { %vm514_vm2 = vmor %vm433_vm8, %vm482_vm7  ;;  %882 = vperm.xlu1 %1606, %v611_v14  }
  0x7b   : > { %vm1480_vm12 = vmpackc.low %vm514_vm2, %vm512_vm9  ;;  %vm273_vm2 = vcmp.eq.s32.totalorder %v237_v35, %v1960_v27  ;;  %vm322_vm9 = vcmp.eq.s32.totalorder %v237_v35, %v1962_v28 }
  0x7c   : > { %1481 = vmatpush1.bf16.msk.msra.mxu0 %vm1480_vm12, %v1751_v32  ;;  %vm355_vm1 = vmor %vm274_vm10, %vm323_vm0  ;;  %vm275_vm0 = vcmp.eq.s32.totalorder %v238_v36, %v1960_v27  ;;  %vm324_vm10 = vcmp.eq.s32.totalorder %v238_v36, %v1962_v28 }
  0x7d   : > { %vm357_vm3 = vmor %vm276_vm11, %vm325_vm13  ;;  %vm403_vm13 = vcmp.eq.s32.totalorder %v237_v35, %v1967_v30  ;;  %1143 = vperm.xlu0 %1604, %v610_v12  }
  0x7e   : > { %vm436_vm5 = vmor %vm355_vm1, %vm404_vm15  ;;  %vm405_vm15 = vcmp.eq.s32.totalorder %v238_v36, %v1967_v30 }
  0x7f   : > { %vm438_vm7 = vmor %vm357_vm3, %vm406_vm14  ;;  %vm484_vm3 = vcmp.eq.s32.totalorder %v237_v35, %v1973_v31  ;;  %v614_v35 = vld [vmem:[%s2328_s3 + $0x50] sm:$0xff] }
  0x80   : > { %vm517_vm8 = vmor %vm436_vm5, %vm485_vm4  ;;  %vm486_vm5 = vcmp.eq.s32.totalorder %v238_v36, %v1973_v31 }
  0x81   : > { %vm519_vm12 = vmor %vm438_vm7, %vm487_vm6  ;;  %1147 = vperm.xlu0 %1604, %v611_v14  }
  0x82   : > { %vm1482_vm11 = vmpackc.low %vm519_vm12, %vm517_vm8  ;;  %vm278_vm8 = vcmp.eq.s32.totalorder %v239_v37, %v1943_v17  ;;  %vm327_vm12 = vcmp.eq.s32.totalorder %v239_v37, %v1947_v23 }
  0x83   : > { %1483 = vmatprep.subr.msk.bf16.mxu0 %vm1482_vm11, %v1751_v32  ;;  %vm354_vm1 = vmor %vm273_vm2, %vm322_vm9  ;;  %vm280_vm2 = vcmp.eq.s32.totalorder %v240_v38, %v1943_v17  ;;  %vm329_vm9 = vcmp.eq.s32.totalorder %v240_v38, %v1947_v23 }
  0x84   : > { %vm356_vm14 = vmor %vm275_vm0, %vm324_vm10  ;;  %vm408_vm10 = vcmp.eq.s32.totalorder %v239_v37, %v1949_v24 }
  0x85   : > { %vm435_vm4 = vmor %vm354_vm1, %vm403_vm13  ;;  %vm410_vm13 = vcmp.eq.s32.totalorder %v240_v38, %v1949_v24 }
  0x86   : > { %vm437_vm6 = vmor %vm356_vm14, %vm405_vm15  ;;  %vm489_vm15 = vcmp.eq.s32.totalorder %v239_v37, %v1952_v25 }
  0x87   : > { %vm516_vm7 = vmor %vm435_vm4, %vm484_vm3  ;;  %vm491_vm4 = vcmp.eq.s32.totalorder %v240_v38, %v1952_v25 }
  0x88   : > { %vm518_vm11 = vmor %vm437_vm6, %vm486_vm5 }
  0x89   : > { %vm1484_vm0 = vmpackc.low %vm518_vm11, %vm516_vm7  ;;  %vm277_vm7 = vcmp.eq.s32.totalorder %v239_v37, %v1960_v27  ;;  %vm326_vm11 = vcmp.eq.s32.totalorder %v239_v37, %v1962_v28 }
  0x8a   : > { %1485 = vmatpush1.bf16.msk.msra.mxu0 %vm1484_vm0, %v1751_v32  ;;  %vm359_vm1 = vmor %vm278_vm8, %vm327_vm12  ;;  %vm279_vm8 = vcmp.eq.s32.totalorder %v240_v38, %v1960_v27  ;;  %vm328_vm12 = vcmp.eq.s32.totalorder %v240_v38, %v1962_v28 }
  0x8b   : > { %vm361_vm14 = vmor %vm280_vm2, %vm329_vm9  ;;  %vm407_vm9 = vcmp.eq.s32.totalorder %v239_v37, %v1967_v30 }
  0x8c   : > { %vm440_vm3 = vmor %vm359_vm1, %vm408_vm10  ;;  %vm409_vm10 = vcmp.eq.s32.totalorder %v240_v38, %v1967_v30 }
  0x8d   : > { %vm442_vm5 = vmor %vm361_vm14, %vm410_vm13  ;;  %vm488_vm14 = vcmp.eq.s32.totalorder %v239_v37, %v1973_v31 }
  0x8e   : > { %vm521_vm6 = vmor %vm440_vm3, %vm489_vm15  ;;  %vm490_vm3 = vcmp.eq.s32.totalorder %v240_v38, %v1973_v31  ;;  %v615_v38 = vld [vmem:[%s2328_s3 + $0x58] sm:$0xff] }
  0x8f   : > { %vm523_vm0 = vmor %vm442_vm5, %vm491_vm4 }
  0x90   : > { %vm1486_vm2 = vmpackc.low %vm523_vm0, %vm521_vm6  ;;  %vm282_vm6 = vcmp.eq.s32.totalorder %v241_v39, %v1943_v17  ;;  %vm331_vm0 = vcmp.eq.s32.totalorder %v241_v39, %v1947_v23 }
  0x91   : > { %1487 = vmatprep.subr.msk.bf16.mxu0 %vm1486_vm2, %v1751_v32  ;;  %vm358_vm1 = vmor %vm277_vm7, %vm326_vm11  ;;  %vm284_vm7 = vcmp.eq.s32.totalorder %v242_v40, %v1943_v17  ;;  %vm333_vm11 = vcmp.eq.s32.totalorder %v242_v40, %v1947_v23 }
  0x92   : > { %vm360_vm13 = vmor %vm279_vm8, %vm328_vm12  ;;  %vm412_vm12 = vcmp.eq.s32.totalorder %v241_v39, %v1949_v24 }
  0x93   : > { %vm439_vm15 = vmor %vm358_vm1, %vm407_vm9  ;;  %vm414_vm9 = vcmp.eq.s32.totalorder %v242_v40, %v1949_v24 }
  0x94   : > { %vm441_vm4 = vmor %vm360_vm13, %vm409_vm10  ;;  %vm493_vm13 = vcmp.eq.s32.totalorder %v241_v39, %v1952_v25 }
  0x95   : > { %vm520_vm5 = vmor %vm439_vm15, %vm488_vm14  ;;  %vm495_vm15 = vcmp.eq.s32.totalorder %v242_v40, %v1952_v25 }
  0x96   : > { %vm522_vm2 = vmor %vm441_vm4, %vm490_vm3 }
  0x97   : > { %vm1488_vm8 = vmpackc.low %vm522_vm2, %vm520_vm5  ;;  %vm281_vm2 = vcmp.eq.s32.totalorder %v241_v39, %v1960_v27  ;;  %vm330_vm5 = vcmp.eq.s32.totalorder %v241_v39, %v1962_v28 }
  0x98   : > { %1489 = vmatpush1.bf16.msk.msra.mxu0 %vm1488_vm8, %v1751_v32  ;;  %vm363_vm1 = vmor %vm282_vm6, %vm331_vm0  ;;  %vm283_vm0 = vcmp.eq.s32.totalorder %v242_v40, %v1960_v27  ;;  %vm332_vm6 = vcmp.eq.s32.totalorder %v242_v40, %v1962_v28 }
  0x99   : > { %vm365_vm10 = vmor %vm284_vm7, %vm333_vm11  ;;  %vm411_vm11 = vcmp.eq.s32.totalorder %v241_v39, %v1967_v30 }
  0x9a   : > { %vm444_vm14 = vmor %vm363_vm1, %vm412_vm12  ;;  %vm413_vm12 = vcmp.eq.s32.totalorder %v242_v40, %v1967_v30 }
  0x9b   : > { %vm446_vm3 = vmor %vm365_vm10, %vm414_vm9  ;;  %vm492_vm10 = vcmp.eq.s32.totalorder %v241_v39, %v1973_v31 }
  0x9c   : > { %vm525_vm4 = vmor %vm444_vm14, %vm493_vm13  ;;  %vm494_vm14 = vcmp.eq.s32.totalorder %v242_v40, %v1973_v31 }
  0x9d   : > { %vm527_vm8 = vmor %vm446_vm3, %vm495_vm15 }
  0x9e   : > { %vm1490_vm7 = vmpackc.low %vm527_vm8, %vm525_vm4  ;;  %vm286_vm4 = vcmp.eq.s32.totalorder %v243_v41, %v1943_v17  ;;  %vm335_vm8 = vcmp.eq.s32.totalorder %v243_v41, %v1947_v23 }
  0x9f   : > { %1491 = vmatprep.subr.msk.bf16.mxu0 %vm1490_vm7, %v1751_v32  ;;  %vm362_vm1 = vmor %vm281_vm2, %vm330_vm5  ;;  %vm288_vm2 = vcmp.eq.s32.totalorder %v244_v42, %v1943_v17  ;;  %vm337_vm5 = vcmp.eq.s32.totalorder %v244_v42, %v1947_v23 }
  0xa0   : > { %vm364_vm9 = vmor %vm283_vm0, %vm332_vm6  ;;  %vm416_vm6 = vcmp.eq.s32.totalorder %v243_v41, %v1949_v24 }
  0xa1   : > { %vm443_vm13 = vmor %vm362_vm1, %vm411_vm11  ;;  %vm418_vm11 = vcmp.eq.s32.totalorder %v244_v42, %v1949_v24 }
  0xa2   : > { %vm445_vm15 = vmor %vm364_vm9, %vm413_vm12  ;;  %vm497_vm12 = vcmp.eq.s32.totalorder %v243_v41, %v1952_v25 }
  0xa3   : > { %vm524_vm3 = vmor %vm443_vm13, %vm492_vm10  ;;  %vm499_vm13 = vcmp.eq.s32.totalorder %v244_v42, %v1952_v25 }
  0xa4   : > { %vm526_vm7 = vmor %vm445_vm15, %vm494_vm14 }
  0xa5   : > { %vm1492_vm0 = vmpackc.low %vm526_vm7, %vm524_vm3  ;;  %vm285_vm3 = vcmp.eq.s32.totalorder %v243_v41, %v1960_v27  ;;  %vm334_vm7 = vcmp.eq.s32.totalorder %v243_v41, %v1962_v28 }
  0xa6   : > { %1493 = vmatpush1.bf16.msk.msra.mxu0 %vm1492_vm0, %v1751_v32  ;;  %vm367_vm1 = vmor %vm286_vm4, %vm335_vm8  ;;  %vm287_vm4 = vcmp.eq.s32.totalorder %v244_v42, %v1960_v27  ;;  %vm336_vm8 = vcmp.eq.s32.totalorder %v244_v42, %v1962_v28 }
  0xa7   : > { %vm369_vm9 = vmor %vm288_vm2, %vm337_vm5  ;;  %vm415_vm5 = vcmp.eq.s32.totalorder %v243_v41, %v1967_v30 }
  0xa8   : > { %vm448_vm10 = vmor %vm367_vm1, %vm416_vm6  ;;  %vm417_vm6 = vcmp.eq.s32.totalorder %v244_v42, %v1967_v30 }
  0xa9   : > { %vm450_vm14 = vmor %vm369_vm9, %vm418_vm11  ;;  %vm496_vm9 = vcmp.eq.s32.totalorder %v243_v41, %v1973_v31 }
  0xaa   : > { %vm529_vm15 = vmor %vm448_vm10, %vm497_vm12  ;;  %vm498_vm10 = vcmp.eq.s32.totalorder %v244_v42, %v1973_v31 }
  0xab   : > { %vm531_vm0 = vmor %vm450_vm14, %vm499_vm13 }
  0xac   : > { %vm1494_vm2 = vmpackc.low %vm531_vm0, %vm529_vm15  ;;  %vm290_vm15 = vcmp.eq.s32.totalorder %v245_v43, %v1943_v17  ;;  %vm339_vm0 = vcmp.eq.s32.totalorder %v245_v43, %v1947_v23 }
  0xad   : > { %1495 = vmatprep.subr.msk.bf16.mxu0 %vm1494_vm2, %v1751_v32  ;;  %vm366_vm1 = vmor %vm285_vm3, %vm334_vm7  ;;  %vm292_vm3 = vcmp.eq.s32.totalorder %v246_v44, %v1943_v17  ;;  %vm341_vm7 = vcmp.eq.s32.totalorder %v246_v44, %v1947_v23 }
  0xae   : > { %vm368_vm11 = vmor %vm287_vm4, %vm336_vm8  ;;  %vm420_vm8 = vcmp.eq.s32.totalorder %v245_v43, %v1949_v24 }
  0xaf   : > { %vm447_vm12 = vmor %vm366_vm1, %vm415_vm5  ;;  %vm422_vm5 = vcmp.eq.s32.totalorder %v246_v44, %v1949_v24 }
  0xb0   : > { %vm449_vm13 = vmor %vm368_vm11, %vm417_vm6  ;;  %vm501_vm11 = vcmp.eq.s32.totalorder %v245_v43, %v1952_v25 }
  0xb1   : > { %vm528_vm14 = vmor %vm447_vm12, %vm496_vm9  ;;  %vm503_vm12 = vcmp.eq.s32.totalorder %v246_v44, %v1952_v25 }
  0xb2   : > { %vm530_vm2 = vmor %vm449_vm13, %vm498_vm10 }
  0xb3   : > { %vm1496_vm4 = vmpackc.low %vm530_vm2, %vm528_vm14  ;;  %vm289_vm2 = vcmp.eq.s32.totalorder %v245_v43, %v1960_v27  ;;  %vm338_vm14 = vcmp.eq.s32.totalorder %v245_v43, %v1962_v28 }
  0xb4   : > { %1497 = vmatpush1.bf16.msk.msra.mxu0 %vm1496_vm4, %v1751_v32  ;;  %vm371_vm1 = vmor %vm290_vm15, %vm339_vm0  ;;  %vm291_vm0 = vcmp.eq.s32.totalorder %v246_v44, %v1960_v27  ;;  %vm340_vm15 = vcmp.eq.s32.totalorder %v246_v44, %v1962_v28 }
  0xb5   : > { %vm373_vm6 = vmor %vm292_vm3, %vm341_vm7  ;;  %vm419_vm7 = vcmp.eq.s32.totalorder %v245_v43, %v1967_v30 }
  0xb6   : > { %vm452_vm9 = vmor %vm371_vm1, %vm420_vm8  ;;  %vm421_vm8 = vcmp.eq.s32.totalorder %v246_v44, %v1967_v30 }
  0xb7   : > { %vm454_vm10 = vmor %vm373_vm6, %vm422_vm5  ;;  %vm500_vm6 = vcmp.eq.s32.totalorder %v245_v43, %v1973_v31 }
  0xb8   : > { %vm533_vm13 = vmor %vm452_vm9, %vm501_vm11  ;;  %vm502_vm9 = vcmp.eq.s32.totalorder %v246_v44, %v1973_v31 }
  0xb9   : > { %vm535_vm4 = vmor %vm454_vm10, %vm503_vm12 }
  0xba   : > { %vm1498_vm3 = vmpackc.low %vm535_vm4, %vm533_vm13  ;;  %vm294_vm13 = vcmp.eq.s32.totalorder %v247_v45, %v1943_v17  ;;  %vm343_vm4 = vcmp.eq.s32.totalorder %v247_v45, %v1947_v23 }
  0xbb   : > { %1499 = vmatprep.subr.msk.bf16.mxu0 %vm1498_vm3, %v1751_v32  ;;  %vm370_vm1 = vmor %vm289_vm2, %vm338_vm14  ;;  %vm296_vm2 = vcmp.eq.s32.totalorder %v248_v46, %v1943_v17  ;;  %vm345_vm14 = vcmp.eq.s32.totalorder %v248_v46, %v1947_v23  ;;  %v612_v23 = vld [vmem:[%s2328_s3 + $0x40] sm:$0xff] }
  0xbc   : > { %vm372_vm5 = vmor %vm291_vm0, %vm340_vm15  ;;  %vm424_vm15 = vcmp.eq.s32.totalorder %v247_v45, %v1949_v24  ;;  %887 = vperm.xlu1 %1606, %v612_v23   ;;  %1151 = vperm.xlu0 %1604, %v612_v23  }
  0xbd   : > { %vm451_vm11 = vmor %vm370_vm1, %vm419_vm7  ;;  %vm426_vm7 = vcmp.eq.s32.totalorder %v248_v46, %v1949_v24 }
  0xbe   : > { %vm453_vm12 = vmor %vm372_vm5, %vm421_vm8  ;;  %vm505_vm8 = vcmp.eq.s32.totalorder %v247_v45, %v1952_v25 }
  0xbf   : > { %vm532_vm10 = vmor %vm451_vm11, %vm500_vm6  ;;  %vm507_vm11 = vcmp.eq.s32.totalorder %v248_v46, %v1952_v25 }
  0xc0   : > { %vm534_vm3 = vmor %vm453_vm12, %vm502_vm9  ;;  %892 = vperm.xlu1 %1606, %v613_v26   ;;  %1155 = vperm.xlu0 %1604, %v613_v26  }
  0xc1   : > { %vm1500_vm0 = vmpackc.low %vm534_vm3, %vm532_vm10  ;;  %vm293_vm3 = vcmp.eq.s32.totalorder %v247_v45, %v1960_v27  ;;  %vm342_vm10 = vcmp.eq.s32.totalorder %v247_v45, %v1962_v28 }
  0xc2   : > { %1501 = vmatpush1.bf16.msk.msra.mxu0 %vm1500_vm0, %v1751_v32  ;;  %vm375_vm1 = vmor %vm294_vm13, %vm343_vm4  ;;  %vm295_vm4 = vcmp.eq.s32.totalorder %v248_v46, %v1960_v27  ;;  %vm344_vm13 = vcmp.eq.s32.totalorder %v248_v46, %v1962_v28 }
  0xc3   : > { %vm377_vm5 = vmor %vm296_vm2, %vm345_vm14  ;;  %vm423_vm14 = vcmp.eq.s32.totalorder %v247_v45, %v1967_v30 }
  0xc4   : > { %vm456_vm6 = vmor %vm375_vm1, %vm424_vm15  ;;  %vm425_vm15 = vcmp.eq.s32.totalorder %v248_v46, %v1967_v30  ;;  %897 = vperm.xlu1 %1606, %v614_v35   ;;  %1159 = vperm.xlu0 %1604, %v614_v35  }
  0xc5   : > { %vm458_vm9 = vmor %vm377_vm5, %vm426_vm7  ;;  %vm504_vm7 = vcmp.eq.s32.totalorder %v247_v45, %v1973_v31 }
  0xc6   : > { %vm537_vm12 = vmor %vm456_vm6, %vm505_vm8  ;;  %vm506_vm6 = vcmp.eq.s32.totalorder %v248_v46, %v1973_v31 }
  0xc7   : > { %vm539_vm0 = vmor %vm458_vm9, %vm507_vm11 }
  0xc8   : > { %vm1502_vm2 = vmpackc.low %vm539_vm0, %vm537_vm12  ;;  %902 = vperm.xlu1 %1606, %v615_v38   ;;  %1163 = vperm.xlu0 %1604, %v615_v38  }
  0xc9   : > { %1503 = vmatprep.subr.msk.bf16.mxu0 %vm1502_vm2, %v1751_v32  ;;  %vm374_vm1 = vmor %vm293_vm3, %vm342_vm10  ;;  %vm1292_vm3 = vcmp.lt.s32.totalorder %v232_v0, 256 }
  0xca   : > { %vm376_vm5 = vmor %vm295_vm4, %vm344_vm13 }
  0xcb   : > { %vm455_vm8 = vmor %vm374_vm1, %vm423_vm14 }
  0xcc   : > { %vm457_vm9 = vmor %vm376_vm5, %vm425_vm15 }
  0xcd   : > { %vm536_vm11 = vmor %vm455_vm8, %vm504_vm7 }
  0xce   : > { %vm538_vm0 = vmor %vm457_vm9, %vm506_vm6 }
  0xcf   : > { %vm1504_vm12 = vmpackc.low %vm538_vm0, %vm536_vm11 }
  0xd0   : > { %1505 = vmatpush1.bf16.msk.msra.mxu0 %vm1504_vm12, %v1751_v32 }
  0xd3   : > { %701 = vmatmul.mubr.f32.vlgmr.msra.gmra.mrb[0].mxu0 %v620_v47  ;;  %v616_v47 = vld [vmem:[%s2328_s3 + $0x60] sm:$0xff] }
  0xd4   : > { %706 = vmatprep.mubr.f32.mxu0 %v1750_v1  ;;  %907 = vperm.xlu1 %1606, %v616_v47  }
  0xd5   : > { %1167 = vperm.xlu0 %1604, %v616_v47   ;;  %v837_v47 = vld [vmem:[#allocation5 + $0x40] sm:$0xff] }
  0xd7   : > { %707 = vmatmul.mubr.f32.gmra.mrb[2].mxu0 %v621_v48 }
  0xd8   : > { %712 = vmatprep.mubr.f32.mxu0 %v1750_v1 }
  0xdb   : > { %713 = vmatmul.mubr.f32.gmra.mrb[4].mxu0 %v622_v49 }
  0xdc   : > { %718 = vmatprep.mubr.f32.mxu0 %v1750_v1 }
  0xdf   : > { %719 = vmatmul.mubr.f32.gmra.mrb[6].mxu0 %v623_v50  ;;  %v617_v50 = vld [vmem:[%s2328_s3 + $0x68] sm:$0xff] }
  0xe0   : > { %724 = vmatprep.mubr.f32.mxu0 %v1750_v1  ;;  %912 = vperm.xlu1 %1606, %v617_v50  }
  0xe1   : > { %1171 = vperm.xlu0 %1604, %v617_v50   ;;  %v840_v50 = vld [vmem:[#allocation5 + $0x58] sm:$0xff] }
  0xe3   : > { %725 = vmatmul.mubr.f32.gmra.mrb[8].mxu0 %v624_v51 }
  0xe4   : > { %730 = vmatprep.mubr.f32.mxu0 %v1750_v1 }
  0xe7   : > { %731 = vmatmul.mubr.f32.gmra.mrb[10].mxu0 %v625_v52 }
  0xe8   : > { %736 = vmatprep.mubr.f32.mxu0 %v1750_v1 }
  0xeb   : > { %737 = vmatmul.mubr.f32.gmra.mrb[12].mxu0 %v626_v53 }
  0xec   : > { %742 = vmatprep.mubr.f32.mxu0 %v1750_v1 }
  0xef   : > { %743 = vmatmul.mubr.f32.gmra.mrb[14].mxu0 %v627_v54 }
  0xf0   : > { %748 = vmatprep.mubr.f32.mxu0 %v1750_v1 }
  0xf3   : > { %749 = vmatmul.mubr.f32.gmra.mrb[16].mxu0 %v628_v55 }
  0xf4   : > { %754 = vmatprep.mubr.f32.mxu0 %v1750_v1 }
  0xf7   : > { %755 = vmatmul.mubr.f32.gmra.mrb[18].mxu0 %v629_v56 }
  0xf8   : > { %760 = vmatprep.mubr.f32.mxu0 %v1750_v1 }
  0xfb   : > { %761 = vmatmul.mubr.f32.gmra.mrb[20].mxu0 %v630_v57 }
  0xfc   : > { %766 = vmatprep.mubr.f32.mxu0 %v1750_v1 }
  0xff   : > { %767 = vmatmul.mubr.f32.gmra.mrb[22].mxu0 %v631_v58 }
 0x100   : > { %772 = vmatprep.mubr.f32.mxu0 %v1750_v1 }
 0x103   : > { %773 = vmatmul.mubr.f32.gmra.mrb[24].mxu0 %v632_v59  ;;  %v618_v59 = vld [vmem:[%s2328_s3 + $0x70] sm:$0xff] }
 0x104   : > { %778 = vmatprep.mubr.f32.mxu0 %v1750_v1  ;;  %917 = vperm.xlu1 %1606, %v618_v59  }
 0x107   : > { %779 = vmatmul.mubr.f32.gmra.mrb[26].mxu0 %v633_v60 }
 0x108   : > { %784 = vmatprep.mubr.f32.mxu0 %v1750_v1 }
 0x10b   : > { %785 = vmatmul.mubr.f32.gmra.mrb[28].mxu0 %v634_v61  ;;  %v619_v61 = vld [vmem:[%s2328_s3 + $0x78] sm:$0xff] }
 0x10c   : > { %790 = vmatprep.mubr.f32.mxu0 %v1750_v1  ;;  %1179 = vperm.xlu0 %1604, %v619_v61  }
 0x10d   : > { %922 = vperm.xlu1 %1606, %v619_v61  }
 0x10f   : > { %791 = vmatmul.mubr.f32.gmra.mrb[30].mxu0 %v635_v62 }
 0x111   : > { %1607 = vset.pattern.permute.xlu1 %v1753_v7 }
 0x112   : > { %1175 = vperm.xlu1 %1607, %v618_v59  }
 0x1a6   : > { %v702_v10 = vpop.f32.mrb[0].mxu0 }
 0x1a7   : > { %v704_v11 = vpop.f32.mrb[1].mxu0  ;;  %v797_v15 = vmax.f32 %v702_v10, 0.0 }
 0x1a8   : > { %v798_v18 = vmax.f32 %v704_v11, 0.0 }
 0x1aa   : > { %v708_v13 = vpop.f32.mrb[2].mxu0 }
 0x1ab   : > { %v799_v16 = vmax.f32 %v708_v13, 0.0  ;;  %v710_v17 = vpop.f32.mrb[3].mxu0 }
 0x1ac   : > { %v800_v19 = vmax.f32 %v710_v17, 0.0 }
 0x1ad   : > { %v1508_v20 = vpack.c.bf16 %v799_v16, %v797_v15 }
 0x1ae   : > { %v714_v21 = vpop.f32.mrb[4].mxu0  ;;  %v1506_v22 = vpack.c.bf16 %v800_v19, %v798_v18 }
 0x1af   : > { %v716_v24 = vpop.f32.mrb[5].mxu0  ;;  %v801_v27 = vmax.f32 %v714_v21, 0.0 }
 0x1b0   : > { %1507 = vmatprep.subr.bf16.mxu1 %v1506_v22  ;;  %v802_v30 = vmax.f32 %v716_v24, 0.0 }
 0x1b1   : > { %1509 = vmatpush1.bf16.msra.mxu1 %v1508_v20 }
 0x1b2   : > { %v720_v25 = vpop.f32.mrb[6].mxu0 }
 0x1b3   : > { %v803_v28 = vmax.f32 %v720_v25, 0.0  ;;  %v722_v29 = vpop.f32.mrb[7].mxu0 }
 0x1b4   : > { %v804_v31 = vmax.f32 %v722_v29, 0.0 }
 0x1b5   : > { %v1512_v32 = vpack.c.bf16 %v803_v28, %v801_v27 }
 0x1b6   : > { %v1510_v33 = vpack.c.bf16 %v804_v31, %v802_v30  ;;  %v726_v34 = vpop.f32.mrb[8].mxu0 }
 0x1b7   : > { %v728_v36 = vpop.f32.mrb[9].mxu0  ;;  %v805_v39 = vmax.f32 %v726_v34, 0.0 }
 0x1b8   : > { %1511 = vmatprep.subr.bf16.mxu1 %v1510_v33  ;;  %v806_v42 = vmax.f32 %v728_v36, 0.0 }
 0x1b9   : > { %1513 = vmatpush1.bf16.msra.mxu1 %v1512_v32 }
 0x1ba   : > { %v732_v37 = vpop.f32.mrb[10].mxu0 }
 0x1bb   : > { %v807_v40 = vmax.f32 %v732_v37, 0.0  ;;  %v734_v41 = vpop.f32.mrb[11].mxu0 }
 0x1bc   : > { %v808_v43 = vmax.f32 %v734_v41, 0.0  ;;  %v831_v41 = vld [vmem:[#allocation5 + $0x10] sm:$0xff] }
 0x1bd   : > { %v1516_v44 = vpack.c.bf16 %v807_v40, %v805_v39  ;;  %v829_v39 = vld [vmem:[#allocation5] sm:$0xff]  ;;  %v830_v40 = vld [vmem:[#allocation5 + $0x8] sm:$0xff] }
 0x1be   : > { %v1514_v45 = vpack.c.bf16 %v808_v43, %v806_v42  ;;  %v738_v46 = vpop.f32.mrb[12].mxu0  ;;  %v832_v42 = vld [vmem:[#allocation5 + $0x18] sm:$0xff]  ;;  %v833_v43 = vld [vmem:[#allocation5 + $0x20] sm:$0xff] }
 0x1bf   : > { %v740_v48 = vpop.f32.mrb[13].mxu0  ;;  %v809_v51 = vmax.f32 %v738_v46, 0.0  ;;  %v836_v46 = vld [vmem:[#allocation5 + $0x38] sm:$0xff] }
 0x1c0   : > { %1515 = vmatprep.subr.bf16.mxu1 %v1514_v45  ;;  %v810_v54 = vmax.f32 %v740_v48, 0.0  ;;  %v835_v45 = vld [vmem:[#allocation5 + $0x30] sm:$0xff]  ;;  %v838_v48 = vld [vmem:[#allocation5 + $0x48] sm:$0xff] }
 0x1c1   : > { %1517 = vmatpush1.bf16.msra.mxu1 %v1516_v44  ;;  %v834_v44 = vld [vmem:[#allocation5 + $0x28] sm:$0xff] }
 0x1c2   : > { %v744_v49 = vpop.f32.mrb[14].mxu0 }
 0x1c3   : > { %v811_v52 = vmax.f32 %v744_v49, 0.0  ;;  %v746_v53 = vpop.f32.mrb[15].mxu0  ;;  %v839_v49 = vld [vmem:[#allocation5 + $0x50] sm:$0xff] }
 0x1c4   : > { %v812_v55 = vmax.f32 %v746_v53, 0.0  ;;  %v843_v53 = vld [vmem:[#allocation5 + $0x70] sm:$0xff] }
 0x1c5   : > { %v1520_v56 = vpack.c.bf16 %v811_v52, %v809_v51  ;;  %v841_v51 = vld [vmem:[#allocation5 + $0x60] sm:$0xff]  ;;  %v842_v52 = vld [vmem:[#allocation5 + $0x68] sm:$0xff] }
 0x1c6   : > { %v1518_v57 = vpack.c.bf16 %v812_v55, %v810_v54  ;;  %v750_v58 = vpop.f32.mrb[16].mxu0  ;;  %v844_v54 = vld [vmem:[#allocation5 + $0x78] sm:$0xff]  ;;  %v858_v55 = vpop.permute.xlu1 %857 }
 0x1c7   : > { %v752_v60 = vpop.f32.mrb[17].mxu0  ;;  %v813_v63 = vmax.f32 %v750_v58, 0.0 }
 0x1c8   : > { %1519 = vmatprep.subr.bf16.mxu1 %v1518_v57  ;;  %v814_v5 = vmax.f32 %v752_v60, 0.0 }
 0x1c9   : > { %1521 = vmatpush1.bf16.msra.mxu1 %v1520_v56  ;;  %v848_v56 = vpop.permute.xlu0 %847 }
 0x1ca   : > { %v756_v62 = vpop.f32.mrb[18].mxu0  ;;  %v863_v57 = vpop.permute.xlu1 %862 }
 0x1cb   : > { %v815_v3 = vmax.f32 %v756_v62, 0.0  ;;  %v758_v4 = vpop.f32.mrb[19].mxu0 }
 0x1cc   : > { %v816_v6 = vmax.f32 %v758_v4, 0.0 }
 0x1cd   : > { %v1524_v8 = vpack.c.bf16 %v815_v3, %v813_v63  ;;  %v853_v58 = vpop.permute.xlu0 %852 }
 0x1ce   : > { %v1522_v9 = vpack.c.bf16 %v816_v6, %v814_v5  ;;  %v762_v10 = vpop.f32.mrb[20].mxu0  ;;  %v1124_v59 = vpop.permute.xlu1 %1123 }
 0x1cf   : > { %v764_v11 = vpop.f32.mrb[21].mxu0  ;;  %v817_v13 = vmax.f32 %v762_v10, 0.0 }
 0x1d0   : > { %1523 = vmatprep.subr.bf16.mxu1 %v1522_v9  ;;  %v818_v16 = vmax.f32 %v764_v11, 0.0 }
 0x1d1   : > { %1525 = vmatpush1.bf16.msra.mxu1 %v1524_v8  ;;  %v1120_v60 = vpop.permute.xlu0 %1119 }
 0x1d2   : > { %v768_v12 = vpop.f32.mrb[22].mxu0  ;;  %v868_v61 = vpop.permute.xlu1 %867 }
 0x1d3   : > { %v819_v14 = vmax.f32 %v768_v12, 0.0  ;;  %v770_v15 = vpop.f32.mrb[23].mxu0 }
 0x1d4   : > { %v820_v17 = vmax.f32 %v770_v15, 0.0 }
 0x1d5   : > { %v1528_v18 = vpack.c.bf16 %v819_v14, %v817_v13  ;;  %v1128_v62 = vpop.permute.xlu0 %1127 }
 0x1d6   : > { %v1526_v19 = vpack.c.bf16 %v820_v17, %v818_v16  ;;  %v774_v20 = vpop.f32.mrb[24].mxu0  ;;  %v873_v63 = vpop.permute.xlu1 %872 }
 0x1d7   : > { %v776_v21 = vpop.f32.mrb[25].mxu0  ;;  %v821_v23 = vmax.f32 %v774_v20, 0.0 }
 0x1d8   : > { %1527 = vmatprep.subr.bf16.mxu1 %v1526_v19  ;;  %v822_v26 = vmax.f32 %v776_v21, 0.0 }
 0x1d9   : > { %1529 = vmatpush1.bf16.msra.mxu1 %v1528_v18  ;;  %v1132_v3 = vpop.permute.xlu0 %1131 }
 0x1da   : > { %v780_v22 = vpop.f32.mrb[26].mxu0  ;;  %v2260_v4 = vpop.permute.xlu1 %877 }
 0x1db   : > { %v823_v24 = vmax.f32 %v780_v22, 0.0  ;;  %v782_v25 = vpop.f32.mrb[27].mxu0 }
 0x1dc   : > { %v824_v27 = vmax.f32 %v782_v25, 0.0 }
 0x1dd   : > { %v1532_v7 = vpack.c.bf16 %v823_v24, %v821_v23  ;;  %v1136_v9 = vpop.permute.xlu0 %1135 }
 0x1de   : > { %v1530_v28 = vpack.c.bf16 %v824_v27, %v822_v26  ;;  %v786_v29 = vpop.f32.mrb[28].mxu0  ;;  %v2262_v14 = vpop.permute.xlu1 %882 }
 0x1df   : > { %v788_v30 = vpop.f32.mrb[29].mxu0  ;;  %v825_v32 = vmax.f32 %v786_v29, 0.0 }
 0x1e0   : > { %1531 = vmatprep.subr.bf16.mxu1 %v1530_v28  ;;  %v826_v35 = vmax.f32 %v788_v30, 0.0 }
 0x1e1   : > { %1533 = vmatpush1.bf16.msra.mxu1 %v1532_v7  ;;  %v1140_v18 = vpop.permute.xlu0 %1139 }
 0x1e2   : > { %v2239_v31 = vpop.f32.mrb[30].mxu0  ;;  %v2264_v29 = vpop.permute.xlu1 %887 }
 0x1e3   : > { %v827_v33 = vmax.f32 %v2239_v31, 0.0  ;;  %v2242_v34 = vpop.f32.mrb[31].mxu0 }
 0x1e4   : > { %v828_v36 = vmax.f32 %v2242_v34, 0.0 }
 0x1e5   : > { %v1536_v37 = vpack.c.bf16 %v827_v33, %v825_v32 }
 0x1e6   : > { %v1534_v38 = vpack.c.bf16 %v828_v36, %v826_v35 }
 0x1e8   : > { %1535 = vmatprep.subr.bf16.mxu1 %v1534_v38  ;;  %v1144_v38 = vpop.permute.xlu0 %1143 }
 0x1e9   : > { %1537 = vmatpush1.bf16.msra.mxu1 %v1536_v37 }
 0x1ec   : > { %990 = vmatmul.mubr.f32.vlgmr.msra.gmra.mrb[0].mxu1 %v829_v39 }
 0x1ed   : > { %995 = vmatprep.mubr.f32.mxu1 %v1750_v1 }
 0x1f0   : > { %996 = vmatmul.mubr.f32.gmra.mrb[2].mxu1 %v830_v40 }
 0x1f1   : > { %1001 = vmatprep.mubr.f32.mxu1 %v1750_v1 }
 0x1f4   : > { %1002 = vmatmul.mubr.f32.gmra.mrb[4].mxu1 %v831_v41 }
 0x1f5   : > { %1007 = vmatprep.mubr.f32.mxu1 %v1750_v1 }
 0x1f8   : > { %1008 = vmatmul.mubr.f32.gmra.mrb[6].mxu1 %v832_v42 }
 0x1f9   : > { %1013 = vmatprep.mubr.f32.mxu1 %v1750_v1 }
 0x1fc   : > { %1014 = vmatmul.mubr.f32.gmra.mrb[8].mxu1 %v833_v43 }
 0x1fd   : > { %1019 = vmatprep.mubr.f32.mxu1 %v1750_v1 }
 0x200   : > { %1020 = vmatmul.mubr.f32.gmra.mrb[10].mxu1 %v834_v44 }
 0x201   : > { %1025 = vmatprep.mubr.f32.mxu1 %v1750_v1 }
 0x204   : > { %1026 = vmatmul.mubr.f32.gmra.mrb[12].mxu1 %v835_v45 }
 0x205   : > { %1031 = vmatprep.mubr.f32.mxu1 %v1750_v1 }
 0x208   : > { %1032 = vmatmul.mubr.f32.gmra.mrb[14].mxu1 %v836_v46 }
 0x209   : > { %1037 = vmatprep.mubr.f32.mxu1 %v1750_v1 }
 0x20c   : > { %1038 = vmatmul.mubr.f32.gmra.mrb[16].mxu1 %v837_v47 }
 0x20d   : > { %1043 = vmatprep.mubr.f32.mxu1 %v1750_v1 }
 0x210   : > { %1044 = vmatmul.mubr.f32.gmra.mrb[18].mxu1 %v838_v48 }
 0x211   : > { %1049 = vmatprep.mubr.f32.mxu1 %v1750_v1 }
 0x214   : > { %1050 = vmatmul.mubr.f32.gmra.mrb[20].mxu1 %v839_v49  ;;  %v893_v49 = vpop.permute.xlu1 %892 }
 0x215   : > { %1055 = vmatprep.mubr.f32.mxu1 %v1750_v1 }
 0x218   : > { %1056 = vmatmul.mubr.f32.gmra.mrb[22].mxu1 %v840_v50 }
 0x219   : > { %1061 = vmatprep.mubr.f32.mxu1 %v1750_v1 }
 0x21c   : > { %1062 = vmatmul.mubr.f32.gmra.mrb[24].mxu1 %v841_v51 }
 0x21d   : > { %1067 = vmatprep.mubr.f32.mxu1 %v1750_v1 }
 0x220   : > { %1068 = vmatmul.mubr.f32.gmra.mrb[26].mxu1 %v842_v52 }
 0x221   : > { %1073 = vmatprep.mubr.f32.mxu1 %v1750_v1 }
 0x224   : > { %1074 = vmatmul.mubr.f32.gmra.mrb[28].mxu1 %v843_v53 }
 0x225   : > { %1079 = vmatprep.mubr.f32.mxu1 %v1750_v1 }
 0x228   : > { %1080 = vmatmul.mubr.f32.gmra.mrb[30].mxu1 %v844_v54  ;;  %v1148_v54 = vpop.permute.xlu0 %1147 }
 0x2bf   : > { %v991_v5 = vpop.f32.mrb[0].mxu1 }
 0x2c0   : > { %v992_v6 = vadd.f32 %v991_v5, %v848_v56  ;;  %v993_v8 = vpop.f32.mrb[1].mxu1 }
 0x2c1   : > { %v994_v10 = vadd.f32 %v993_v8, %v848_v56 }
 0x2c2   : > { %v1086_v11 = vmax.f32 %v992_v6, 0.0 }
 0x2c3   : > { %v997_v1 = vpop.f32.mrb[2].mxu1  ;;  %v1087_v15 = vmax.f32 %v994_v10, 0.0  ;;  %v898_v10 = vpop.permute.xlu1 %897 }
 0x2c4   : > { %v998_v12 = vadd.f32 %v997_v1, %v853_v58  ;;  %v999_v13 = vpop.f32.mrb[3].mxu1  ;;  %v1182_v21 = vmul.f32 %v1120_v60, %v1086_v11 }
 0x2c5   : > { %v1000_v16 = vadd.f32 %v999_v13, %v853_v58  ;;  %v1183_v25 = vmul.f32 %v1120_v60, %v1087_v15  ;;  %v1152_v15 = vpop.permute.xlu0 %1151 }
 0x2c6   : > { %v1088_v17 = vmax.f32 %v998_v12, 0.0 }
 0x2c7   : > { %v1089_v19 = vmax.f32 %v1000_v16, 0.0  ;;  %v1003_v20 = vpop.f32.mrb[4].mxu1 }
 0x2c8   : > { %v1184_v22 = vmul.f32 %v1124_v59, %v1088_v17  ;;  %v1004_v23 = vadd.f32 %v1003_v20, %v858_v55  ;;  %v1005_v24 = vpop.f32.mrb[5].mxu1 }
 0x2c9   : > { %v1185_v26 = vmul.f32 %v1124_v59, %v1089_v19  ;;  %v1006_v27 = vadd.f32 %v1005_v24, %v858_v55 }
 0x2ca   : > { %v1214_v7 = vadd.f32 %v1184_v22, %v1182_v21  ;;  %v1090_v28 = vmax.f32 %v1004_v23, 0.0 }
 0x2cb   : > { %v1235_v30 = vadd.f32 %v1185_v26, %v1183_v25  ;;  %v1091_v32 = vmax.f32 %v1006_v27, 0.0  ;;  %v1009_v33 = vpop.f32.mrb[6].mxu1  ;;  %v903_v25 = vpop.permute.xlu1 %902 }
 0x2cc   : > { %v1186_v35 = vmul.f32 %v1128_v62, %v1090_v28  ;;  %v1010_v36 = vadd.f32 %v1009_v33, %v863_v57  ;;  %v1011_v37 = vpop.f32.mrb[7].mxu1 }
 0x2cd   : > { %v1187_v39 = vmul.f32 %v1128_v62, %v1091_v32  ;;  %v1012_v40 = vadd.f32 %v1011_v37, %v863_v57 }
 0x2ce   : > { %v1215_v41 = vadd.f32 %v1214_v7, %v1186_v35  ;;  %v1092_v42 = vmax.f32 %v1010_v36, 0.0 }
 0x2cf   : > { %v1236_v43 = vadd.f32 %v1235_v30, %v1187_v39  ;;  %v1093_v44 = vmax.f32 %v1012_v40, 0.0  ;;  %v1015_v45 = vpop.f32.mrb[8].mxu1  ;;  %v1156_v30 = vpop.permute.xlu0 %1155 }
 0x2d0   : > { %v1188_v46 = vmul.f32 %v1132_v3, %v1092_v42  ;;  %v1016_v47 = vadd.f32 %v1015_v45, %v868_v61  ;;  %v1017_v48 = vpop.f32.mrb[9].mxu1  ;;  %v908_v42 = vpop.permute.xlu1 %907 }
 0x2d1   : > { %v1189_v50 = vmul.f32 %v1132_v3, %v1093_v44  ;;  %v1018_v51 = vadd.f32 %v1017_v48, %v868_v61 }
 0x2d2   : > { %v1216_v52 = vadd.f32 %v1215_v41, %v1188_v46  ;;  %v1094_v53 = vmax.f32 %v1016_v47, 0.0 }
 0x2d3   : > { %v1237_v55 = vadd.f32 %v1236_v43, %v1189_v50  ;;  %v1095_v56 = vmax.f32 %v1018_v51, 0.0  ;;  %v1021_v58 = vpop.f32.mrb[10].mxu1  ;;  %v1160_v47 = vpop.permute.xlu0 %1159 }
 0x2d4   : > { %v1190_v59 = vmul.f32 %v1136_v9, %v1094_v53  ;;  %v1022_v60 = vadd.f32 %v1021_v58, %v873_v63  ;;  %v1023_v57 = vpop.f32.mrb[11].mxu1 }
 0x2d5   : > { %v1191_v62 = vmul.f32 %v1136_v9, %v1095_v56  ;;  %v1024_v5 = vadd.f32 %v1023_v57, %v873_v63 }
 0x2d6   : > { %v1217_v6 = vadd.f32 %v1216_v52, %v1190_v59  ;;  %v1096_v8 = vmax.f32 %v1022_v60, 0.0  ;;  %v913_v59 = vpop.permute.xlu1 %912 }
 0x2d7   : > { %v1238_v1 = vadd.f32 %v1237_v55, %v1191_v62  ;;  %v1097_v11 = vmax.f32 %v1024_v5, 0.0  ;;  %v1027_v12 = vpop.f32.mrb[12].mxu1 }
 0x2d8   : > { %v1192_v13 = vmul.f32 %v1140_v18, %v1096_v8  ;;  %v1028_v61 = vadd.f32 %v1027_v12, %v2260_v4  ;;  %v1029_v3 = vpop.f32.mrb[13].mxu1 }
 0x2d9   : > { %v1193_v16 = vmul.f32 %v1140_v18, %v1097_v11  ;;  %v1030_v17 = vadd.f32 %v1029_v3, %v2260_v4 }
 0x2da   : > { %v1218_v19 = vadd.f32 %v1217_v6, %v1192_v13  ;;  %v1098_v20 = vmax.f32 %v1028_v61, 0.0  ;;  %v1164_v6 = vpop.permute.xlu0 %1163 }
 0x2db   : > { %v1239_v21 = vadd.f32 %v1238_v1, %v1193_v16  ;;  %v1099_v22 = vmax.f32 %v1030_v17, 0.0  ;;  %v1033_v9 = vpop.f32.mrb[14].mxu1  ;;  %v918_v17 = vpop.permute.xlu1 %917 }
 0x2dc   : > { %v1194_v63 = vmul.f32 %v1144_v38, %v1098_v20  ;;  %v1034_v23 = vadd.f32 %v1033_v9, %v2262_v14  ;;  %v1035_v24 = vpop.f32.mrb[15].mxu1 }
 0x2dd   : > { %v1195_v26 = vmul.f32 %v1144_v38, %v1099_v22  ;;  %v1036_v27 = vadd.f32 %v1035_v24, %v2262_v14 }
 0x2de   : > { %v1219_v7 = vadd.f32 %v1218_v19, %v1194_v63  ;;  %v1100_v28 = vmax.f32 %v1034_v23, 0.0  ;;  %v1168_v63 = vpop.permute.xlu0 %1167 }
 0x2df   : > { %v1240_v32 = vadd.f32 %v1239_v21, %v1195_v26  ;;  %v1101_v18 = vmax.f32 %v1036_v27, 0.0  ;;  %v1039_v33 = vpop.f32.mrb[16].mxu1 }
 0x2e0   : > { %v1196_v4 = vmul.f32 %v1148_v54, %v1100_v28  ;;  %v1040_v35 = vadd.f32 %v1039_v33, %v2264_v29  ;;  %v1041_v36 = vpop.f32.mrb[17].mxu1  ;;  %v923_v33 = vpop.permute.xlu1 %922 }
 0x2e1   : > { %v1197_v37 = vmul.f32 %v1148_v54, %v1101_v18  ;;  %v1042_v39 = vadd.f32 %v1041_v36, %v2264_v29 }
 0x2e2   : > { %v1220_v40 = vadd.f32 %v1219_v7, %v1196_v4  ;;  %v1102_v41 = vmax.f32 %v1040_v35, 0.0 }
 0x2e3   : > { %v1241_v43 = vadd.f32 %v1240_v32, %v1197_v37  ;;  %v1103_v38 = vmax.f32 %v1042_v39, 0.0  ;;  %v1045_v44 = vpop.f32.mrb[18].mxu1  ;;  %v1172_v39 = vpop.permute.xlu0 %1171 }
 0x2e4   : > { %v1198_v14 = vmul.f32 %v1152_v15, %v1102_v41  ;;  %v1046_v45 = vadd.f32 %v1045_v44, %v893_v49  ;;  %v1047_v46 = vpop.f32.mrb[19].mxu1 }
 0x2e5   : > { %v1199_v48 = vmul.f32 %v1152_v15, %v1103_v38  ;;  %v1048_v50 = vadd.f32 %v1047_v46, %v893_v49  ;;  %v1176_v46 = vpop.permute.xlu1 %1175 }
 0x2e6   : > { %v1221_v51 = vadd.f32 %v1220_v40, %v1198_v14  ;;  %v1104_v52 = vmax.f32 %v1046_v45, 0.0 }
 0x2e7   : > { %v1242_v53 = vadd.f32 %v1241_v43, %v1199_v48  ;;  %v1105_v55 = vmax.f32 %v1048_v50, 0.0  ;;  %v1051_v56 = vpop.f32.mrb[20].mxu1 }
 0x2e8   : > { %v1200_v54 = vmul.f32 %v1156_v30, %v1104_v52  ;;  %v1052_v58 = vadd.f32 %v1051_v56, %v898_v10  ;;  %v1053_v29 = vpop.f32.mrb[21].mxu1 }
 0x2e9   : > { %v1201_v60 = vmul.f32 %v1156_v30, %v1105_v55  ;;  %v1054_v57 = vadd.f32 %v1053_v29, %v898_v10 }
 0x2ea   : > { %v1222_v62 = vadd.f32 %v1221_v51, %v1200_v54  ;;  %v1106_v5 = vmax.f32 %v1052_v58, 0.0 }
 0x2eb   : > { %v1243_v8 = vadd.f32 %v1242_v53, %v1201_v60  ;;  %v1107_v1 = vmax.f32 %v1054_v57, 0.0  ;;  %v1057_v11 = vpop.f32.mrb[22].mxu1  ;;  %v1180_v60 = vpop.permute.xlu0 %1179 }
 0x2ec   : > { %v1202_v12 = vmul.f32 %v1160_v47, %v1106_v5  ;;  %v1058_v13 = vadd.f32 %v1057_v11, %v903_v25  ;;  %v1059_v49 = vpop.f32.mrb[23].mxu1 }
 0x2ed   : > { %v1203_v61 = vmul.f32 %v1160_v47, %v1107_v1  ;;  %v1060_v3 = vadd.f32 %v1059_v49, %v903_v25 }
 0x2ee   : > { %v1223_v15 = vadd.f32 %v1222_v62, %v1202_v12  ;;  %v1108_v16 = vmax.f32 %v1058_v13, 0.0 }
 0x2ef   : > { %v1244_v19 = vadd.f32 %v1243_v8, %v1203_v61  ;;  %v1109_v20 = vmax.f32 %v1060_v3, 0.0  ;;  %v1063_v21 = vpop.f32.mrb[24].mxu1 }
 0x2f0   : > { %v1204_v22 = vmul.f32 %v1164_v6, %v1108_v16  ;;  %v1064_v9 = vadd.f32 %v1063_v21, %v908_v42  ;;  %v1065_v10 = vpop.f32.mrb[25].mxu1 }
 0x2f1   : > { %v1205_v23 = vmul.f32 %v1164_v6, %v1109_v20  ;;  %v1066_v24 = vadd.f32 %v1065_v10, %v908_v42 }
 0x2f2   : > { %v1224_v26 = vadd.f32 %v1223_v15, %v1204_v22  ;;  %v1110_v27 = vmax.f32 %v1064_v9, 0.0 }
 0x2f3   : > { %v1245_v7 = vadd.f32 %v1244_v19, %v1205_v23  ;;  %v1111_v28 = vmax.f32 %v1066_v24, 0.0  ;;  %v1069_v30 = vpop.f32.mrb[26].mxu1 }
 0x2f4   : > { %v1206_v32 = vmul.f32 %v1168_v63, %v1110_v27  ;;  %v1070_v18 = vadd.f32 %v1069_v30, %v913_v59  ;;  %v1071_v25 = vpop.f32.mrb[27].mxu1 }
 0x2f5   : > { %v1207_v4 = vmul.f32 %v1168_v63, %v1111_v28  ;;  %v1072_v35 = vadd.f32 %v1071_v25, %v913_v59 }
 0x2f6   : > { %v1225_v36 = vadd.f32 %v1224_v26, %v1206_v32  ;;  %v1112_v37 = vmax.f32 %v1070_v18, 0.0 }
 0x2f7   : > { %v1246_v40 = vadd.f32 %v1245_v7, %v1207_v4  ;;  %v1113_v41 = vmax.f32 %v1072_v35, 0.0  ;;  %v1075_v43 = vpop.f32.mrb[28].mxu1  ;;  %v1754_v7 = vmov 1966171168  }
 0x2f8   : > { %v1208_v38 = vmul.f32 %v1172_v39, %v1112_v37  ;;  %v1076_v44 = vadd.f32 %v1075_v43, %v918_v17  ;;  %v1077_v42 = vpop.f32.mrb[29].mxu1  ;;  %v1274_v28 = vunpack.c.l.s4 %v1754_v7 }
 0x2f9   : > { %v1209_v14 = vmul.f32 %v1172_v39, %v1113_v41  ;;  %v1078_v45 = vadd.f32 %v1077_v42, %v918_v17 }
 0x2fa   : > { %v1114_v47 = vmax.f32 %v1076_v44, 0.0  ;;  %v1226_v48 = vadd.f32 %v1225_v36, %v1208_v38  ;;  %v1275_v30 = vunpack.c.0.s8 %v1274_v28 }
 0x2fb   : > { %v1115_v50 = vmax.f32 %v1078_v45, 0.0  ;;  %v1247_v51 = vadd.f32 %v1246_v40, %v1209_v14  ;;  %v1081_v52 = vpop.f32.mrb[30].mxu1 }
 0x2fc   : > { %v1210_v53 = vmul.f32 %v1176_v46, %v1114_v47  ;;  %v1082_v55 = vadd.f32 %v1081_v52, %v923_v33  ;;  %v1083_v56 = vpop.f32.mrb[31].mxu1 }
 0x2fd   : > { %v1211_v54 = vmul.f32 %v1176_v46, %v1115_v50  ;;  %v1084_v58 = vadd.f32 %v1083_v56, %v923_v33 }
 0x2fe   : > { %v1227_v29 = vadd.f32 %v1226_v48, %v1210_v53  ;;  %v1116_v59 = vmax.f32 %v1082_v55, 0.0 }
 0x2ff   : > { %v1248_v57 = vadd.f32 %v1247_v51, %v1211_v54  ;;  %v1117_v62 = vmax.f32 %v1084_v58, 0.0 }
 0x300   : > { %v1212_v5 = vmul.f32 %v1180_v60, %v1116_v59 }
 0x301   : > { %v1213_v6 = vmul.f32 %v1180_v60, %v1117_v62 }
 0x302   : > { %v1228_v8 = vadd.f32 %v1227_v29, %v1212_v5 }
 0x303   : > { %v1249_v1 = vadd.f32 %v1248_v57, %v1213_v6 }
 0x304   : > { %v1229_v11 = vrot.slane %v1228_v8, 4 }
 0x305   : > { %v1250_v12 = vrot.slane %v1249_v1, 4 }
 0x306   : > { %v1230_v13 = vadd.f32 %v1229_v11, %v1228_v8 }
 0x307   : > { %v1251_v49 = vadd.f32 %v1250_v12, %v1249_v1 }
 0x308   : > { %v1231_v61 = vrot.slane %v1230_v13, 2 }
 0x309   : > { %v1252_v3 = vrot.slane %v1251_v49, 2 }
 0x30a   : > { %v1232_v15 = vadd.f32 %v1231_v61, %v1230_v13 }
 0x30b   : > { %v1253_v16 = vadd.f32 %v1252_v3, %v1251_v49 }
 0x30c   : > { %v1233_v17 = vrot.slane %v1232_v15, 1 }
 0x30d   : > { %v1254_v19 = vrot.slane %v1253_v16, 1 }
 0x30e   : > { %v1234_v20 = vadd.f32 %v1233_v17, %v1232_v15 }
 0x30f   : > { %v1255_v21 = vadd.f32 %v1254_v19, %v1253_v16 }
 0x310   : > { %v1256_v22 = vadd.f32 %v1234_v20, %v2239_v31  ;;  %v1278_v31 = vsub.s32 %v1275_v30, %v1932_v2 }
 0x311   : > { %v1257_v9 = vadd.f32 %v1255_v21, %v2242_v34 }
 0x312   : > { %v1465_v10 = vmul.f32 -1.442695, %v1256_v22 }
 0x313   : > { %v1466_v63 = vmul.f32 -1.442695, %v1257_v9 }
 0x314   : > { %1608 = vpow2.f32 %v1465_v10 }
 0x315   : > { %1610 = vpow2.f32 %v1466_v63 }
 0x31e   : > { %v1609_v23 = vpop.eup %1608 }
 0x31f   : > { %v1611_v24 = vpop.eup %1610  ;;  %v1264_v26 = vadd.f32 1.0, %v1609_v23 }
 0x320   : > { %v1265_v27 = vadd.f32 1.0, %v1611_v24 }
 0x321   : > { %1612 = vrcp.f32 %v1264_v26 }
 0x322   : > { %1614 = vrcp.f32 %v1265_v27 }
 0x32b   : > { %v1613_v32 = vpop.eup %1612 }
 0x32c   : > { %v1615_v34 = vpop.eup %1614 }
 0x32d   : > { %v1272_v18 = vcombine.high %v1613_v32, %v1615_v34 }
 0x32f   : > { %v1279_v25 = vrot.slane %v1272_v18, %v1278_v31 }
 0x331   : > { %v1280_v33 = vcombine.high %v1279_v25, %v1279_v25 }
 0x333   : > { %v1287_v4 = vrot.slane %v1280_v33, %v1278_v31 }
 0x335   : > { %v1288_v35 = vcombine.high %v1287_v4, %v1287_v4 }
 0x337   : > { %1294 = vst.msk [vmem:[%s228_s9] sm:$0x3] %vm1292_vm3, %v1288_v35 }
 0x338   : > { %1687 = shalt.err (!%p1684_p7)
}
 0x339   : > { %s1688_s25 = scalar_lea.hbm %s2281_s14, 32  ;;  %s1692_s11 = scalar_lea.hbm %s2329_s4, 64 }
 0x33a   : > { %p1689_p9 = scmp.ne.s32.totalorder %s2281_s14, %s1688_s25  ;;  %p1693_p0 = scmp.lt.u32.totalorder %s2281_s14, %s2329_s4 }
 0x33b   : > { %p1694_p1 = scmp.lt.u32.totalorder %s1692_s11, %s1688_s25  ;;  %p1696_p4 = scmp.lt.u32.totalorder %s1688_s25, %s2281_s14 }
 0x33c   : > { %p1690_p2 = pnand %p1689_p9, %p1872_p12 }
 0x33d   : > { %p1695_p11 = por %p1694_p1, %p1693_p0 }
 0x33e   : > { %p1691_p5 = pneg %p1690_p2 }
 0x33f   : > { %p1697_p6 = por %p1696_p4, %p1695_p11 }
 0x341   : > { %p1698_p8 = pnand %p1697_p6, %p1691_p5 }
 0x343   : > { %1701 = shalt.err (!%p1698_p8)
}
 0x344   : > { %1544 = dma.vmem_to_hbm [thread:$0]  (%p1872_p12), %s2283_s28, 32, %s2281_s14, %s1296_s20  }
 0x345 PF: > { %s1322_s21 = sand.u32 1, %s1732_s15   ;;  %p2344_p10 = scmp.ne.s32.totalorder %s2334_s22, 0 }
 0x346   : > { %p2345_p13 = scmp.ge.s32.totalorder %s1744_s18, 2  ;;  %s1323_s23 = scalar_lea.sflag [#allocation4], %s1322_s21 }
 0x348   : > { %p1555_p3 = pnand %p2345_p13, %p2344_p10 }
 0x34a   : > { %1727 = dma.done.wait (!%p1555_p3), %s1323_s23, 32  }
 0x34b   : > { %1729 = vsyncadd (!%p1555_p3), %s1323_s23, 4294967264  ;;  %p18_p7 = scmp.ge.s32.totalorder %s1837_s27, 4   ;;  %s2346_s15 = smov %s1736_s16 }
 0x34c   : > { %s2347_s16 = smov %s1740_s17  ;;  %s2348_s17 = smov %s1868_s24 }
 0x34d   : > { %s2349_s18 = smov %s1837_s27  ;;  %20 = sbr.rel (!%p18_p7) target bundleno = 6 (0x6), region = 85 }
 0x354   :  { %1328 = vsyncpa [#allocation3], 1 }
 0x355   :  { %1330 = vsyncpa [#allocation3 + $0x1], 1 }
 0x356   :  { %1331 = vsyncpa [#allocation6], 1 }
 0x357   :  { %1332 = vsyncpa [#allocation4], 1 }
 0x358   :  { %1334 = vsyncpa [#allocation4 + $0x1], 1 }

// kernel: tpu_custom_call.1
= control target key start
LH: loop header
LB: loop body
LE: loop exit
PB: predicated region body
PF: predicated region fallthrough
CT: control target
= control target key end

     0   :  { %9 = vsyncpa [#allocation3], 0  ;;  %s2325_s0 = inlined_call_operand.hbm [shape: s32[4,512], index: 0, kind: input, shape index: {}]   ;;  %s2326_s1 = inlined_call_operand.vmem [shape: f32[128,128], index: 1, kind: input, shape index: {}]   ;;  %s2327_s2 = inlined_call_operand.hbm [shape: f32[128,128], index: 2, kind: input, shape index: {}]   ;;  %s2328_s3 = inlined_call_operand.vmem [shape: f32[128,2], index: 3, kind: input, shape index: {}]   ;;  %s2329_s4 = inlined_call_operand.hbm [shape: f32[1,512], index: 4, kind: output, shape index: {}]  }
   0x1   :  { %11 = vsyncpa [#allocation3 + $0x1], 0 }
   0x2   :  { %12 = vsyncpa [#allocation6], 0 }
   0x3   :  { %13 = vsyncpa [#allocation4], 0 }
   0x4   :  { %15 = vsyncpa [#allocation4 + $0x1], 0  ;;  %s1781_s15 = smov 0   ;;  %s1783_s16 = smov 0  }
   0x5   :  { %s1785_s17 = smov 0   ;;  %s1787_s18 = smov 0  }
   0x6 LB: > { %s1802_s19 = sadd.s32 4294967295, %s1744_s18   ;;  %s1390_s20 = sadd.s32 4294967294, %s1744_s18   ;;  %s1744_s18 = sphi %s1787_s18, %s2349_s18   ;;  %s1740_s17 = sphi %s1785_s17, %s2348_s17   ;;  %s1736_s16 = sphi %s1783_s16, %s2347_s16   ;;  %s1732_s15 = sphi %s1781_s15, %s2346_s15  }
   0x7   : > { %p41_p0 = scmp.ne.s32.totalorder %s1736_s16, %s1732_s15  ;;  %p2330_p1 = scmp.eq.s32.totalorder %s1802_s19, 0 }
   0x8   : > { %p134_p3 = scmp.eq.s32.totalorder %s1390_s20, 1  ;;  %p1391_p5 = scmp.ge.s32.totalorder %s1744_s18, 1 }
   0x9   : > { %p1811_p4 = por %p2330_p1, %p41_p0  ;;  %p141_p7 = scmp.lt.s32.totalorder %s1744_s18, 3 }
   0xa   : > { %p1816_p6 = por %p134_p3, %p41_p0  ;;  %s1746_s24 = smov [#allocation5]  }
   0xb   : > { %s2333_s21 = scalar_select %p1811_p4, 1, 0 }
   0xc   : > { %s2334_s22 = scalar_select %p1816_p6, 1, 0 }
   0xd   : > { %p1821_p8 = pnand %p1391_p5, %p141_p7  ;;  %s156_s25 = sshll.u32 %s1746_s24, 4  ;;  %s1825_s25 = int_to_ptr.vmem [resolvable:$true] %s156_s25 }
   0xe   : > { %s1837_s27 = sadd.s32 1, %s1744_s18   ;;  %s28_s28 = sadd.s32 1, %s1740_s17 }
   0xf   : > { %s2335_s23 = scalar_select %p1821_p8, 1, 0 }
  0x10   : > { %p1546_p9 = pneg %p1821_p8  ;;  %s25_s29 = ssub.s32 %s1744_s18, %s1837_s27 }
  0x11   : > { %s1616_s6 = scalar_lea.hbm %s2327_s2, 2048 }
  0x12   : > { %p1832_p11 = pnand %p1546_p9, %p2330_p1  ;;  %p1617_p12 = scmp.ne.s32.totalorder %s2327_s2, %s1616_s6 }
  0x13   : > { %p1623_p5 = scmp.lt.u32.totalorder %s1616_s6, %s2327_s2 }
  0x14   : > { %p1618_p13 = pneg %p1832_p11 }
  0x16   : > { %p1619_p0 = pnand %p1618_p13, %p1617_p12 }
  0x18   : > { %p1620_p3 = pneg %p1619_p0 }
  0x1a   : > { %p1625_p7 = pnand %p1623_p5, %p1620_p3 }
  0x1c   : > { %1628 = shalt.err (!%p1625_p7)
}
  0x1d   : > { %s1629_s11 = scalar_lea.vmem %s1825_s25, 2048  ;;  %p1637_p2 = scmp.lt.s32.totalorder %s1825_s25, %s1825_s25 }
  0x1e   : > { %p1630_p9 = scmp.ne.s32.totalorder %s1825_s25, %s1629_s11  ;;  %p1638_p6 = scmp.lt.s32.totalorder %s1629_s11, %s1629_s11 }
  0x20   : > { %p1632_p10 = pnand %p1630_p9, %p1618_p13  ;;  %p1639_p4 = por %p1638_p6, %p1637_p2 }
  0x22   : > { %p1633_p1 = pneg %p1632_p10 }
  0x24   : > { %p1640_p8 = pnand %p1639_p4, %p1633_p1 }
  0x26   : > { %1643 = shalt.err (!%p1640_p8)
}
  0x27   : > { %s1747_s12 = smov 128   ;;  %s1748_s13 = smov 8  }
  0x28   : > { %1549 = dma.hbm_to_vmem [thread:$0]  (!%p1832_p11), %s2327_s2, 2048, %s1825_s25, [#allocation6], %s1747_s12, %s1747_s12, %s1748_s13  }
  0x29   : > { %p26_p2 = scmp.eq.s32.totalorder %s25_s29, 0  ;;  %p35_p1 = scmp.ne.s32.totalorder %s1740_s17, %s1736_s16 }
  0x2a   : > { %p36_p4 = scmp.eq.s32.totalorder %s1744_s18, 0  ;;  %p1559_p6 = scmp.lt.s32.totalorder %s1744_s18, 2 }
  0x2b   : > { %s1868_s24 = scalar_select %p26_p2, %s1740_s17, %s28_s28  }
  0x2c   : > { %p37_p8 = por %p36_p4, %p35_p1  ;;  %p2337_p10 = scmp.eq.s32.totalorder %s1802_s19, 1 }
  0x2d   : > { %s173_s5 = sand.u32 1, %s1740_s17   ;;  %s1472_s6 = sshll.u32 %s1744_s18, 7 }
  0x2e   : > { %p1872_p12 = por %p2337_p10, %p35_p1  ;;  %s1394_s7 = sshll.u32 %s173_s5, 3 }
  0x2f   : > { %s1881_s9 = scalar_lea.hbm %s2325_s0, %s1472_s6  ;;  %s177_s25 = scalar_lea.vmem [#allocation2], %s1394_s7 }
  0x30   : > { %s185_s28 = sshll.u32 %s177_s25, 4  ;;  %p1883_p11 = pnand %p1559_p6, %p37_p8  ;;  %s1887_s28 = int_to_ptr.vmem [resolvable:$true] %s185_s28 }
  0x31   : > { %s174_s10 = scalar_lea.sflag [#allocation3], %s173_s5  ;;  %s1644_s11 = scalar_lea.hbm %s1881_s9, 128 }
  0x32   : > { %p1645_p13 = scmp.ne.s32.totalorder %s1881_s9, %s1644_s11  ;;  %p1646_p0 = pneg %p1883_p11 }
  0x33   : > { %s1649_s14 = scalar_lea.hbm %s2325_s0, 256  ;;  %p1650_p7 = scmp.lt.u32.totalorder %s1881_s9, %s2325_s0 }
  0x34   : > { %p1647_p3 = pnand %p1646_p0, %p1645_p13  ;;  %p1651_p9 = scmp.lt.u32.totalorder %s1649_s14, %s1644_s11 }
  0x35   : > { %p1653_p1 = scmp.lt.u32.totalorder %s1644_s11, %s1881_s9 }
  0x36   : > { %p1648_p5 = pneg %p1647_p3  ;;  %p1652_p2 = por %p1651_p9, %p1650_p7 }
  0x38   : > { %p1654_p4 = por %p1653_p1, %p1652_p2 }
  0x3a   : > { %p1655_p6 = pnand %p1654_p4, %p1648_p5 }
  0x3c   : > { %1658 = shalt.err (!%p1655_p6)
}
  0x3d   : > { %s1659_s5 = scalar_lea.vmem %s1887_s28, 128  ;;  %s1749_s7 = smov [#allocation2]  }
  0x3e   : > { %p1660_p8 = scmp.ne.s32.totalorder %s1887_s28, %s1659_s5  ;;  %s1664_s26 = sshll.u32 %s1749_s7, 4  ;;  %s1665_s26 = int_to_ptr.vmem [resolvable:$false] %s1664_s26 }
  0x3f   : > { %s1666_s8 = scalar_lea.vmem %s1665_s26, 256  ;;  %p1667_p3 = scmp.lt.s32.totalorder %s1887_s28, %s1665_s26 }
  0x40   : > { %p1662_p10 = pnand %p1660_p8, %p1646_p0  ;;  %p1668_p7 = scmp.lt.s32.totalorder %s1666_s8, %s1659_s5 }
  0x42   : > { %p1663_p13 = pneg %p1662_p10  ;;  %p1669_p9 = por %p1668_p7, %p1667_p3 }
  0x44   : > { %p1670_p2 = pnand %p1669_p9, %p1663_p13 }
  0x46   : > { %1673 = shalt.err (!%p1670_p2)
}
  0x47   : > { %1553 = dma.hbm_to_vmem [thread:$0]  (!%p1883_p11), %s1881_s9, 128, %s1887_s28, %s174_s10  }
  0x48   : > { %p2340_p5 = scmp.ne.s32.totalorder %s2335_s23, 0 }
  0x49   : > { %s1917_s25 = sand.u32 (!%p2340_p5), 1, %s1736_s16   ;;  %p2341_p0 = scmp.ne.s32.totalorder (!%p2340_p5), %s2333_s21, 0 }
  0x4a   : > { %194 = sbr.rel (%p2340_p5) target bundleno = 837 (0x345), region = 36  ;;  %s1398_s11 = sshll.u32 (!%p2340_p5), %s1917_s25, 3 }
  0x4b   : > { %s197_s12 = scalar_lea.sflag (!%p2340_p5), [#allocation3], %s1917_s25  ;;  %s200_s13 = scalar_lea.vmem (!%p2340_p5), [#allocation2], %s1398_s11 }
  0x51   : > { %1719 = dma.done.wait (%p2341_p0), %s197_s12, 128  }
  0x52   : > { %1721 = vsyncadd (%p2341_p0), %s197_s12, 4294967168  ;;  %p2342_p1 = scmp.eq.s32.totalorder %s1802_s19, 0 }
  0x54   : > { %1723 = dma.done.wait (%p2342_p1), [#allocation6], 2048   ;;  %p2343_p11 = pmov %p2342_p1 }
  0x55   : > { %v232_v0 = vlaneseq  ;;  %v1750_v1 = vmov 0.0   ;;  %v231_v8 = vld [vmem:[%s200_s13] sm:$0xff]  ;;  %v1751_v32 = vmov 1.0|1.0   ;;  %v622_v49 = vld [vmem:[%s2326_s1 + $0x10] sm:$0xff]  ;;  %v623_v50 = vld [vmem:[%s2326_s1 + $0x18] sm:$0xff] }
  0x56   : > { %1725 = vsyncadd (%p2343_p11), [#allocation6], 4294965248  ;;  %700 = vmatprep.mubr.f32.mxu0 %v1750_v1  ;;  %989 = vmatprep.mubr.f32.mxu1 %v1750_v1  ;;  %v297_v12 = vadd.s32 32, %v231_v8  ;;  %v378_v13 = vadd.s32 64, %v231_v8  ;;  %v459_v14 = vadd.s32 96, %v231_v8  ;;  %v620_v47 = vld [vmem:[%s2326_s1] sm:$0xff] }
  0x57   : > { %v1932_v2 = vshrl.u32 %v232_v0, 7  ;;  %v621_v48 = vld [vmem:[%s2326_s1 + $0x8] sm:$0xff]  ;;  %v624_v51 = vld [vmem:[%s2326_s1 + $0x20] sm:$0xff]  ;;  %v626_v53 = vld [vmem:[%s2326_s1 + $0x30] sm:$0xff]  ;;  %v1752_v63 = vmov 0   ;;  %s1400_s21 = sshll.u32 %s1917_s25, 1 }
  0x58   : > { %v625_v52 = vld [vmem:[%s2326_s1 + $0x28] sm:$0xff]  ;;  %v627_v54 = vld [vmem:[%s2326_s1 + $0x38] sm:$0xff]  ;;  %v628_v55 = vld [vmem:[%s2326_s1 + $0x40] sm:$0xff]  ;;  %1602 = vset.pattern.permute.xlu0 %v1752_v63  ;;  %1603 = vset.pattern.permute.xlu1 %v1752_v63  ;;  %s1473_s23 = sshll.u32 %s1802_s19, 5  ;;  %s228_s9 = scalar_lea.vmem [#allocation7], %s1400_s21 }
  0x59   : > { %v255_v3 = vsub.s32 4, %v1932_v2  ;;  %v251_v4 = vsub.s32 0, %v1932_v2  ;;  %v304_v5 = vsub.s32 5, %v1932_v2  ;;  %v385_v6 = vsub.s32 6, %v1932_v2  ;;  %v629_v56 = vld [vmem:[%s2326_s1 + $0x48] sm:$0xff]  ;;  %v630_v57 = vld [vmem:[%s2326_s1 + $0x50] sm:$0xff]  ;;  %s2281_s14 = scalar_lea.hbm %s2329_s4, %s1473_s23 }
  0x5a   : > { %v466_v7 = vsub.s32 7, %v1932_v2  ;;  %v300_v9 = vsub.s32 1, %v1932_v2  ;;  %v381_v10 = vsub.s32 2, %v1932_v2  ;;  %v234_v15 = vadd.s32 8, %v1932_v2  ;;  %v631_v58 = vld [vmem:[%s2326_s1 + $0x58] sm:$0xff]  ;;  %v632_v59 = vld [vmem:[%s2326_s1 + $0x60] sm:$0xff] }
  0x5b   : > { %v256_v11 = vrot.slane %v231_v8, %v255_v3  ;;  %v462_v16 = vsub.s32 3, %v1932_v2  ;;  %v305_v18 = vrot.slane %v297_v12, %v304_v5  ;;  %v386_v19 = vrot.slane %v378_v13, %v385_v6  ;;  %v633_v60 = vld [vmem:[%s2326_s1 + $0x68] sm:$0xff]  ;;  %v634_v61 = vld [vmem:[%s2326_s1 + $0x70] sm:$0xff]  ;;  %v635_v62 = vld [vmem:[%s2326_s1 + $0x78] sm:$0xff]  ;;  %s1310_s28 = sshll.u32 %s228_s9, 4  ;;  %s1296_s20 = scalar_lea.sflag [#allocation4], %s1917_s25  ;;  %s2283_s28 = int_to_ptr.vmem [resolvable:$true] %s1310_s28 }
  0x5c   : > { %v467_v20 = vrot.slane %v459_v14, %v466_v7  ;;  %v252_v21 = vrot.slane %v231_v8, %v251_v4  ;;  %v301_v22 = vrot.slane %v297_v12, %v300_v9  ;;  %v382_v26 = vrot.slane %v378_v13, %v381_v10  ;;  %v604_v3 = vld [vmem:[%s2328_s3] sm:$0xff]  ;;  %v605_v5 = vld [vmem:[%s2328_s3 + $0x8] sm:$0xff]  ;;  %v607_v6 = vld [vmem:[%s2328_s3 + $0x18] sm:$0xff]  ;;  %s1674_s6 = scalar_lea.vmem %s2283_s28, 32  ;;  %s1755_s19 = smov [#allocation7]  }
  0x5d   : > { %v1943_v17 = vrot.slane %v256_v11, %v251_v4  ;;  %v1947_v23 = vrot.slane %v305_v18, %v300_v9  ;;  %v1949_v24 = vrot.slane %v386_v19, %v381_v10  ;;  %v463_v29 = vrot.slane %v459_v14, %v462_v16  ;;  %847 = vperm.xlu0 %1602, %v604_v3   ;;  %v608_v8 = vld [vmem:[%s2328_s3 + $0x20] sm:$0xff]  ;;  %v610_v12 = vld [vmem:[%s2328_s3 + $0x30] sm:$0xff]  ;;  %v611_v14 = vld [vmem:[%s2328_s3 + $0x38] sm:$0xff]  ;;  %p1675_p4 = scmp.ne.s32.totalorder %s2283_s28, %s1674_s6  ;;  %s1678_s5 = sshll.u32 %s1755_s19, 4  ;;  %s1679_s5 = int_to_ptr.vmem [resolvable:$false] %s1678_s5 }
  0x5e   : > { %v1952_v25 = vrot.slane %v467_v20, %v462_v16  ;;  %v1960_v27 = vrot.slane %v252_v21, %v251_v4  ;;  %v1962_v28 = vrot.slane %v301_v22, %v300_v9  ;;  %v1967_v30 = vrot.slane %v382_v26, %v381_v10  ;;  %v606_v4 = vld [vmem:[%s2328_s3 + $0x10] sm:$0xff]  ;;  %v609_v9 = vld [vmem:[%s2328_s3 + $0x28] sm:$0xff]  ;;  %s1680_s7 = scalar_lea.vmem %s1679_s5, 64  ;;  %p1681_p10 = scmp.lt.s32.totalorder %s2283_s28, %s1679_s5 }
  0x5f   : > { %vm266_vm0 = vcmp.eq.s32.totalorder %v1932_v2, %v1943_v17  ;;  %vm268_vm1 = vcmp.eq.s32.totalorder %v234_v15, %v1943_v17  ;;  %vm315_vm2 = vcmp.eq.s32.totalorder %v1932_v2, %v1947_v23  ;;  %vm317_vm3 = vcmp.eq.s32.totalorder %v234_v15, %v1947_v23  ;;  %857 = vperm.xlu1 %1603, %v606_v4   ;;  %v613_v26 = vld [vmem:[%s2328_s3 + $0x48] sm:$0xff]  ;;  %p1676_p6 = pnand %p1675_p4, %p1872_p12  ;;  %p1682_p13 = scmp.lt.s32.totalorder %s1680_s7, %s1674_s6 }
  0x60   : > { %vm396_vm4 = vcmp.eq.s32.totalorder %v1932_v2, %v1949_v24  ;;  %vm347_vm5 = vmor %vm266_vm0, %vm315_vm2  ;;  %vm398_vm6 = vcmp.eq.s32.totalorder %v234_v15, %v1949_v24  ;;  %vm477_vm8 = vcmp.eq.s32.totalorder %v1932_v2, %v1952_v25  ;;  %vm479_vm10 = vcmp.eq.s32.totalorder %v234_v15, %v1952_v25 }
  0x61   : > { %vm349_vm7 = vmor %vm268_vm1, %vm317_vm3  ;;  %vm265_vm13 = vcmp.eq.s32.totalorder %v1932_v2, %v1960_v27  ;;  %vm314_vm14 = vcmp.eq.s32.totalorder %v1932_v2, %v1962_v28  ;;  %v1973_v31 = vrot.slane %v463_v29, %v462_v16  ;;  %vm267_vm0 = vcmp.eq.s32.totalorder %v234_v15, %v1960_v27  ;;  %852 = vperm.xlu0 %1602, %v605_v5   ;;  %p1677_p8 = pneg %p1676_p6  ;;  %p1683_p3 = por %p1682_p13, %p1681_p10 }
  0x62   : > { %vm428_vm9 = vmor %vm347_vm5, %vm396_vm4  ;;  %vm316_vm1 = vcmp.eq.s32.totalorder %v234_v15, %v1962_v28  ;;  %vm395_vm3 = vcmp.eq.s32.totalorder %v1932_v2, %v1967_v30  ;;  %vm397_vm5 = vcmp.eq.s32.totalorder %v234_v15, %v1967_v30  ;;  %v235_v33 = vadd.s32 16, %v1932_v2 }
  0x63   : > { %vm430_vm11 = vmor %vm349_vm7, %vm398_vm6  ;;  %vm476_vm7 = vcmp.eq.s32.totalorder %v1932_v2, %v1973_v31  ;;  %v236_v34 = vadd.s32 24, %v1932_v2  ;;  %v237_v35 = vadd.s32 32, %v1932_v2  ;;  %v238_v36 = vadd.s32 40, %v1932_v2  ;;  %862 = vperm.xlu1 %1603, %v607_v6   ;;  %p1684_p7 = pnand %p1683_p3, %p1677_p8 }
  0x64   : > { %vm509_vm12 = vmor %vm428_vm9, %vm477_vm8  ;;  %vm478_vm9 = vcmp.eq.s32.totalorder %v234_v15, %v1973_v31  ;;  %v239_v37 = vadd.s32 48, %v1932_v2  ;;  %v240_v38 = vadd.s32 56, %v1932_v2  ;;  %v241_v39 = vadd.s32 64, %v1932_v2 }
  0x65   : > { %vm511_vm15 = vmor %vm430_vm11, %vm479_vm10  ;;  %v242_v40 = vadd.s32 72, %v1932_v2  ;;  %v243_v41 = vadd.s32 80, %v1932_v2  ;;  %v244_v42 = vadd.s32 88, %v1932_v2  ;;  %v245_v43 = vadd.s32 96, %v1932_v2 }
  0x66   : > { %vm1474_vm2 = vmpackc.low %vm511_vm15, %vm509_vm12  ;;  %vm270_vm12 = vcmp.eq.s32.totalorder %v235_v33, %v1943_v17  ;;  %vm319_vm15 = vcmp.eq.s32.totalorder %v235_v33, %v1947_v23  ;;  %v246_v44 = vadd.s32 104, %v1932_v2  ;;  %v247_v45 = vadd.s32 112, %v1932_v2 }
  0x67   : > { %1475 = vmatprep.subr.msk.bf16.mxu0 %vm1474_vm2, %v1751_v32  ;;  %vm346_vm4 = vmor %vm265_vm13, %vm314_vm14  ;;  %vm272_vm14 = vcmp.eq.s32.totalorder %v236_v34, %v1943_v17  ;;  %vm321_vm2 = vcmp.eq.s32.totalorder %v236_v34, %v1947_v23  ;;  %v248_v46 = vadd.s32 120, %v1932_v2  ;;  %v1753_v7 = vmov 1  }
  0x68   : > { %vm348_vm6 = vmor %vm267_vm0, %vm316_vm1  ;;  %vm400_vm1 = vcmp.eq.s32.totalorder %v235_v33, %v1949_v24  ;;  %1604 = vset.pattern.permute.xlu0 %v1753_v7  ;;  %1605 = vset.pattern.permute.xlu1 %v1753_v7 }
  0x69   : > { %vm427_vm8 = vmor %vm346_vm4, %vm395_vm3  ;;  %vm402_vm4 = vcmp.eq.s32.totalorder %v236_v34, %v1949_v24  ;;  %1119 = vperm.xlu0 %1604, %v604_v3   ;;  %1123 = vperm.xlu1 %1605, %v605_v5  }
  0x6a   : > { %vm429_vm10 = vmor %vm348_vm6, %vm397_vm5  ;;  %vm481_vm6 = vcmp.eq.s32.totalorder %v235_v33, %v1952_v25 }
  0x6b   : > { %vm508_vm11 = vmor %vm427_vm8, %vm476_vm7  ;;  %vm483_vm8 = vcmp.eq.s32.totalorder %v236_v34, %v1952_v25 }
  0x6c   : > { %vm510_vm13 = vmor %vm429_vm10, %vm478_vm9 }
  0x6d   : > { %vm1476_vm0 = vmpackc.low %vm510_vm13, %vm508_vm11  ;;  %vm269_vm11 = vcmp.eq.s32.totalorder %v235_v33, %v1960_v27  ;;  %vm318_vm13 = vcmp.eq.s32.totalorder %v235_v33, %v1962_v28  ;;  %1127 = vperm.xlu0 %1604, %v606_v4   ;;  %1606 = vset.pattern.permute.xlu1 %v1752_v63 }
  0x6e   : > { %1477 = vmatpush1.bf16.msk.msra.mxu0 %vm1476_vm0, %v1751_v32  ;;  %vm351_vm3 = vmor %vm270_vm12, %vm319_vm15  ;;  %vm271_vm12 = vcmp.eq.s32.totalorder %v236_v34, %v1960_v27  ;;  %vm320_vm15 = vcmp.eq.s32.totalorder %v236_v34, %v1962_v28  ;;  %867 = vperm.xlu1 %1606, %v608_v8  }
  0x6f   : > { %vm353_vm5 = vmor %vm272_vm14, %vm321_vm2  ;;  %vm399_vm14 = vcmp.eq.s32.totalorder %v235_v33, %v1967_v30 }
  0x70   : > { %vm432_vm7 = vmor %vm351_vm3, %vm400_vm1  ;;  %vm401_vm3 = vcmp.eq.s32.totalorder %v236_v34, %v1967_v30 }
  0x71   : > { %vm434_vm9 = vmor %vm353_vm5, %vm402_vm4  ;;  %vm480_vm5 = vcmp.eq.s32.totalorder %v235_v33, %v1973_v31  ;;  %1131 = vperm.xlu0 %1604, %v607_v6  }
  0x72   : > { %vm513_vm10 = vmor %vm432_vm7, %vm481_vm6  ;;  %vm482_vm7 = vcmp.eq.s32.totalorder %v236_v34, %v1973_v31  ;;  %872 = vperm.xlu1 %1606, %v609_v9  }
  0x73   : > { %vm515_vm0 = vmor %vm434_vm9, %vm483_vm8 }
  0x74   : > { %vm1478_vm2 = vmpackc.low %vm515_vm0, %vm513_vm10  ;;  %vm274_vm10 = vcmp.eq.s32.totalorder %v237_v35, %v1943_v17  ;;  %vm323_vm0 = vcmp.eq.s32.totalorder %v237_v35, %v1947_v23 }
  0x75   : > { %1479 = vmatprep.subr.msk.bf16.mxu0 %vm1478_vm2, %v1751_v32  ;;  %vm350_vm1 = vmor %vm269_vm11, %vm318_vm13  ;;  %vm276_vm11 = vcmp.eq.s32.totalorder %v238_v36, %v1943_v17  ;;  %vm325_vm13 = vcmp.eq.s32.totalorder %v238_v36, %v1947_v23  ;;  %1135 = vperm.xlu0 %1604, %v608_v8  }
  0x76   : > { %vm352_vm4 = vmor %vm271_vm12, %vm320_vm15  ;;  %vm404_vm15 = vcmp.eq.s32.totalorder %v237_v35, %v1949_v24  ;;  %877 = vperm.xlu1 %1606, %v610_v12  }
  0x77   : > { %vm431_vm6 = vmor %vm350_vm1, %vm399_vm14  ;;  %vm406_vm14 = vcmp.eq.s32.totalorder %v238_v36, %v1949_v24 }
  0x78   : > { %vm433_vm8 = vmor %vm352_vm4, %vm401_vm3  ;;  %vm485_vm4 = vcmp.eq.s32.totalorder %v237_v35, %v1952_v25 }
  0x79   : > { %vm512_vm9 = vmor %vm431_vm6, %vm480_vm5  ;;  %vm487_vm6 = vcmp.eq.s32.totalorder %v238_v36, %v1952_v25  ;;  %1139 = vperm.xlu0 %1604, %v609_v9  }
  0x7a   : > { %vm514_vm2 = vmor %vm433_vm8, %vm482_vm7  ;;  %882 = vperm.xlu1 %1606, %v611_v14  }
  0x7b   : > { %vm1480_vm12 = vmpackc.low %vm514_vm2, %vm512_vm9  ;;  %vm273_vm2 = vcmp.eq.s32.totalorder %v237_v35, %v1960_v27  ;;  %vm322_vm9 = vcmp.eq.s32.totalorder %v237_v35, %v1962_v28 }
  0x7c   : > { %1481 = vmatpush1.bf16.msk.msra.mxu0 %vm1480_vm12, %v1751_v32  ;;  %vm355_vm1 = vmor %vm274_vm10, %vm323_vm0  ;;  %vm275_vm0 = vcmp.eq.s32.totalorder %v238_v36, %v1960_v27  ;;  %vm324_vm10 = vcmp.eq.s32.totalorder %v238_v36, %v1962_v28 }
  0x7d   : > { %vm357_vm3 = vmor %vm276_vm11, %vm325_vm13  ;;  %vm403_vm13 = vcmp.eq.s32.totalorder %v237_v35, %v1967_v30  ;;  %1143 = vperm.xlu0 %1604, %v610_v12  }
  0x7e   : > { %vm436_vm5 = vmor %vm355_vm1, %vm404_vm15  ;;  %vm405_vm15 = vcmp.eq.s32.totalorder %v238_v36, %v1967_v30 }
  0x7f   : > { %vm438_vm7 = vmor %vm357_vm3, %vm406_vm14  ;;  %vm484_vm3 = vcmp.eq.s32.totalorder %v237_v35, %v1973_v31  ;;  %v614_v35 = vld [vmem:[%s2328_s3 + $0x50] sm:$0xff] }
  0x80   : > { %vm517_vm8 = vmor %vm436_vm5, %vm485_vm4  ;;  %vm486_vm5 = vcmp.eq.s32.totalorder %v238_v36, %v1973_v31 }
  0x81   : > { %vm519_vm12 = vmor %vm438_vm7, %vm487_vm6  ;;  %1147 = vperm.xlu0 %1604, %v611_v14  }
  0x82   : > { %vm1482_vm11 = vmpackc.low %vm519_vm12, %vm517_vm8  ;;  %vm278_vm8 = vcmp.eq.s32.totalorder %v239_v37, %v1943_v17  ;;  %vm327_vm12 = vcmp.eq.s32.totalorder %v239_v37, %v1947_v23 }
  0x83   : > { %1483 = vmatprep.subr.msk.bf16.mxu0 %vm1482_vm11, %v1751_v32  ;;  %vm354_vm1 = vmor %vm273_vm2, %vm322_vm9  ;;  %vm280_vm2 = vcmp.eq.s32.totalorder %v240_v38, %v1943_v17  ;;  %vm329_vm9 = vcmp.eq.s32.totalorder %v240_v38, %v1947_v23 }
  0x84   : > { %vm356_vm14 = vmor %vm275_vm0, %vm324_vm10  ;;  %vm408_vm10 = vcmp.eq.s32.totalorder %v239_v37, %v1949_v24 }
  0x85   : > { %vm435_vm4 = vmor %vm354_vm1, %vm403_vm13  ;;  %vm410_vm13 = vcmp.eq.s32.totalorder %v240_v38, %v1949_v24 }
  0x86   : > { %vm437_vm6 = vmor %vm356_vm14, %vm405_vm15  ;;  %vm489_vm15 = vcmp.eq.s32.totalorder %v239_v37, %v1952_v25 }
  0x87   : > { %vm516_vm7 = vmor %vm435_vm4, %vm484_vm3  ;;  %vm491_vm4 = vcmp.eq.s32.totalorder %v240_v38, %v1952_v25 }
  0x88   : > { %vm518_vm11 = vmor %vm437_vm6, %vm486_vm5 }
  0x89   : > { %vm1484_vm0 = vmpackc.low %vm518_vm11, %vm516_vm7  ;;  %vm277_vm7 = vcmp.eq.s32.totalorder %v239_v37, %v1960_v27  ;;  %vm326_vm11 = vcmp.eq.s32.totalorder %v239_v37, %v1962_v28 }
  0x8a   : > { %1485 = vmatpush1.bf16.msk.msra.mxu0 %vm1484_vm0, %v1751_v32  ;;  %vm359_vm1 = vmor %vm278_vm8, %vm327_vm12  ;;  %vm279_vm8 = vcmp.eq.s32.totalorder %v240_v38, %v1960_v27  ;;  %vm328_vm12 = vcmp.eq.s32.totalorder %v240_v38, %v1962_v28 }
  0x8b   : > { %vm361_vm14 = vmor %vm280_vm2, %vm329_vm9  ;;  %vm407_vm9 = vcmp.eq.s32.totalorder %v239_v37, %v1967_v30 }
  0x8c   : > { %vm440_vm3 = vmor %vm359_vm1, %vm408_vm10  ;;  %vm409_vm10 = vcmp.eq.s32.totalorder %v240_v38, %v1967_v30 }
  0x8d   : > { %vm442_vm5 = vmor %vm361_vm14, %vm410_vm13  ;;  %vm488_vm14 = vcmp.eq.s32.totalorder %v239_v37, %v1973_v31 }
  0x8e   : > { %vm521_vm6 = vmor %vm440_vm3, %vm489_vm15  ;;  %vm490_vm3 = vcmp.eq.s32.totalorder %v240_v38, %v1973_v31  ;;  %v615_v38 = vld [vmem:[%s2328_s3 + $0x58] sm:$0xff] }
  0x8f   : > { %vm523_vm0 = vmor %vm442_vm5, %vm491_vm4 }
  0x90   : > { %vm1486_vm2 = vmpackc.low %vm523_vm0, %vm521_vm6  ;;  %vm282_vm6 = vcmp.eq.s32.totalorder %v241_v39, %v1943_v17  ;;  %vm331_vm0 = vcmp.eq.s32.totalorder %v241_v39, %v1947_v23 }
  0x91   : > { %1487 = vmatprep.subr.msk.bf16.mxu0 %vm1486_vm2, %v1751_v32  ;;  %vm358_vm1 = vmor %vm277_vm7, %vm326_vm11  ;;  %vm284_vm7 = vcmp.eq.s32.totalorder %v242_v40, %v1943_v17  ;;  %vm333_vm11 = vcmp.eq.s32.totalorder %v242_v40, %v1947_v23 }
  0x92   : > { %vm360_vm13 = vmor %vm279_vm8, %vm328_vm12  ;;  %vm412_vm12 = vcmp.eq.s32.totalorder %v241_v39, %v1949_v24 }
  0x93   : > { %vm439_vm15 = vmor %vm358_vm1, %vm407_vm9  ;;  %vm414_vm9 = vcmp.eq.s32.totalorder %v242_v40, %v1949_v24 }
  0x94   : > { %vm441_vm4 = vmor %vm360_vm13, %vm409_vm10  ;;  %vm493_vm13 = vcmp.eq.s32.totalorder %v241_v39, %v1952_v25 }
  0x95   : > { %vm520_vm5 = vmor %vm439_vm15, %vm488_vm14  ;;  %vm495_vm15 = vcmp.eq.s32.totalorder %v242_v40, %v1952_v25 }
  0x96   : > { %vm522_vm2 = vmor %vm441_vm4, %vm490_vm3 }
  0x97   : > { %vm1488_vm8 = vmpackc.low %vm522_vm2, %vm520_vm5  ;;  %vm281_vm2 = vcmp.eq.s32.totalorder %v241_v39, %v1960_v27  ;;  %vm330_vm5 = vcmp.eq.s32.totalorder %v241_v39, %v1962_v28 }
  0x98   : > { %1489 = vmatpush1.bf16.msk.msra.mxu0 %vm1488_vm8, %v1751_v32  ;;  %vm363_vm1 = vmor %vm282_vm6, %vm331_vm0  ;;  %vm283_vm0 = vcmp.eq.s32.totalorder %v242_v40, %v1960_v27  ;;  %vm332_vm6 = vcmp.eq.s32.totalorder %v242_v40, %v1962_v28 }
  0x99   : > { %vm365_vm10 = vmor %vm284_vm7, %vm333_vm11  ;;  %vm411_vm11 = vcmp.eq.s32.totalorder %v241_v39, %v1967_v30 }
  0x9a   : > { %vm444_vm14 = vmor %vm363_vm1, %vm412_vm12  ;;  %vm413_vm12 = vcmp.eq.s32.totalorder %v242_v40, %v1967_v30 }
  0x9b   : > { %vm446_vm3 = vmor %vm365_vm10, %vm414_vm9  ;;  %vm492_vm10 = vcmp.eq.s32.totalorder %v241_v39, %v1973_v31 }
  0x9c   : > { %vm525_vm4 = vmor %vm444_vm14, %vm493_vm13  ;;  %vm494_vm14 = vcmp.eq.s32.totalorder %v242_v40, %v1973_v31 }
  0x9d   : > { %vm527_vm8 = vmor %vm446_vm3, %vm495_vm15 }
  0x9e   : > { %vm1490_vm7 = vmpackc.low %vm527_vm8, %vm525_vm4  ;;  %vm286_vm4 = vcmp.eq.s32.totalorder %v243_v41, %v1943_v17  ;;  %vm335_vm8 = vcmp.eq.s32.totalorder %v243_v41, %v1947_v23 }
  0x9f   : > { %1491 = vmatprep.subr.msk.bf16.mxu0 %vm1490_vm7, %v1751_v32  ;;  %vm362_vm1 = vmor %vm281_vm2, %vm330_vm5  ;;  %vm288_vm2 = vcmp.eq.s32.totalorder %v244_v42, %v1943_v17  ;;  %vm337_vm5 = vcmp.eq.s32.totalorder %v244_v42, %v1947_v23 }
  0xa0   : > { %vm364_vm9 = vmor %vm283_vm0, %vm332_vm6  ;;  %vm416_vm6 = vcmp.eq.s32.totalorder %v243_v41, %v1949_v24 }
  0xa1   : > { %vm443_vm13 = vmor %vm362_vm1, %vm411_vm11  ;;  %vm418_vm11 = vcmp.eq.s32.totalorder %v244_v42, %v1949_v24 }
  0xa2   : > { %vm445_vm15 = vmor %vm364_vm9, %vm413_vm12  ;;  %vm497_vm12 = vcmp.eq.s32.totalorder %v243_v41, %v1952_v25 }
  0xa3   : > { %vm524_vm3 = vmor %vm443_vm13, %vm492_vm10  ;;  %vm499_vm13 = vcmp.eq.s32.totalorder %v244_v42, %v1952_v25 }
  0xa4   : > { %vm526_vm7 = vmor %vm445_vm15, %vm494_vm14 }
  0xa5   : > { %vm1492_vm0 = vmpackc.low %vm526_vm7, %vm524_vm3  ;;  %vm285_vm3 = vcmp.eq.s32.totalorder %v243_v41, %v1960_v27  ;;  %vm334_vm7 = vcmp.eq.s32.totalorder %v243_v41, %v1962_v28 }
  0xa6   : > { %1493 = vmatpush1.bf16.msk.msra.mxu0 %vm1492_vm0, %v1751_v32  ;;  %vm367_vm1 = vmor %vm286_vm4, %vm335_vm8  ;;  %vm287_vm4 = vcmp.eq.s32.totalorder %v244_v42, %v1960_v27  ;;  %vm336_vm8 = vcmp.eq.s32.totalorder %v244_v42, %v1962_v28 }
  0xa7   : > { %vm369_vm9 = vmor %vm288_vm2, %vm337_vm5  ;;  %vm415_vm5 = vcmp.eq.s32.totalorder %v243_v41, %v1967_v30 }
  0xa8   : > { %vm448_vm10 = vmor %vm367_vm1, %vm416_vm6  ;;  %vm417_vm6 = vcmp.eq.s32.totalorder %v244_v42, %v1967_v30 }
  0xa9   : > { %vm450_vm14 = vmor %vm369_vm9, %vm418_vm11  ;;  %vm496_vm9 = vcmp.eq.s32.totalorder %v243_v41, %v1973_v31 }
  0xaa   : > { %vm529_vm15 = vmor %vm448_vm10, %vm497_vm12  ;;  %vm498_vm10 = vcmp.eq.s32.totalorder %v244_v42, %v1973_v31 }
  0xab   : > { %vm531_vm0 = vmor %vm450_vm14, %vm499_vm13 }
  0xac   : > { %vm1494_vm2 = vmpackc.low %vm531_vm0, %vm529_vm15  ;;  %vm290_vm15 = vcmp.eq.s32.totalorder %v245_v43, %v1943_v17  ;;  %vm339_vm0 = vcmp.eq.s32.totalorder %v245_v43, %v1947_v23 }
  0xad   : > { %1495 = vmatprep.subr.msk.bf16.mxu0 %vm1494_vm2, %v1751_v32  ;;  %vm366_vm1 = vmor %vm285_vm3, %vm334_vm7  ;;  %vm292_vm3 = vcmp.eq.s32.totalorder %v246_v44, %v1943_v17  ;;  %vm341_vm7 = vcmp.eq.s32.totalorder %v246_v44, %v1947_v23 }
  0xae   : > { %vm368_vm11 = vmor %vm287_vm4, %vm336_vm8  ;;  %vm420_vm8 = vcmp.eq.s32.totalorder %v245_v43, %v1949_v24 }
  0xaf   : > { %vm447_vm12 = vmor %vm366_vm1, %vm415_vm5  ;;  %vm422_vm5 = vcmp.eq.s32.totalorder %v246_v44, %v1949_v24 }
  0xb0   : > { %vm449_vm13 = vmor %vm368_vm11, %vm417_vm6  ;;  %vm501_vm11 = vcmp.eq.s32.totalorder %v245_v43, %v1952_v25 }
  0xb1   : > { %vm528_vm14 = vmor %vm447_vm12, %vm496_vm9  ;;  %vm503_vm12 = vcmp.eq.s32.totalorder %v246_v44, %v1952_v25 }
  0xb2   : > { %vm530_vm2 = vmor %vm449_vm13, %vm498_vm10 }
  0xb3   : > { %vm1496_vm4 = vmpackc.low %vm530_vm2, %vm528_vm14  ;;  %vm289_vm2 = vcmp.eq.s32.totalorder %v245_v43, %v1960_v27  ;;  %vm338_vm14 = vcmp.eq.s32.totalorder %v245_v43, %v1962_v28 }
  0xb4   : > { %1497 = vmatpush1.bf16.msk.msra.mxu0 %vm1496_vm4, %v1751_v32  ;;  %vm371_vm1 = vmor %vm290_vm15, %vm339_vm0  ;;  %vm291_vm0 = vcmp.eq.s32.totalorder %v246_v44, %v1960_v27  ;;  %vm340_vm15 = vcmp.eq.s32.totalorder %v246_v44, %v1962_v28 }
  0xb5   : > { %vm373_vm6 = vmor %vm292_vm3, %vm341_vm7  ;;  %vm419_vm7 = vcmp.eq.s32.totalorder %v245_v43, %v1967_v30 }
  0xb6   : > { %vm452_vm9 = vmor %vm371_vm1, %vm420_vm8  ;;  %vm421_vm8 = vcmp.eq.s32.totalorder %v246_v44, %v1967_v30 }
  0xb7   : > { %vm454_vm10 = vmor %vm373_vm6, %vm422_vm5  ;;  %vm500_vm6 = vcmp.eq.s32.totalorder %v245_v43, %v1973_v31 }
  0xb8   : > { %vm533_vm13 = vmor %vm452_vm9, %vm501_vm11  ;;  %vm502_vm9 = vcmp.eq.s32.totalorder %v246_v44, %v1973_v31 }
  0xb9   : > { %vm535_vm4 = vmor %vm454_vm10, %vm503_vm12 }
  0xba   : > { %vm1498_vm3 = vmpackc.low %vm535_vm4, %vm533_vm13  ;;  %vm294_vm13 = vcmp.eq.s32.totalorder %v247_v45, %v1943_v17  ;;  %vm343_vm4 = vcmp.eq.s32.totalorder %v247_v45, %v1947_v23 }
  0xbb   : > { %1499 = vmatprep.subr.msk.bf16.mxu0 %vm1498_vm3, %v1751_v32  ;;  %vm370_vm1 = vmor %vm289_vm2, %vm338_vm14  ;;  %vm296_vm2 = vcmp.eq.s32.totalorder %v248_v46, %v1943_v17  ;;  %vm345_vm14 = vcmp.eq.s32.totalorder %v248_v46, %v1947_v23  ;;  %v612_v23 = vld [vmem:[%s2328_s3 + $0x40] sm:$0xff] }
  0xbc   : > { %vm372_vm5 = vmor %vm291_vm0, %vm340_vm15  ;;  %vm424_vm15 = vcmp.eq.s32.totalorder %v247_v45, %v1949_v24  ;;  %887 = vperm.xlu1 %1606, %v612_v23   ;;  %1151 = vperm.xlu0 %1604, %v612_v23  }
  0xbd   : > { %vm451_vm11 = vmor %vm370_vm1, %vm419_vm7  ;;  %vm426_vm7 = vcmp.eq.s32.totalorder %v248_v46, %v1949_v24 }
  0xbe   : > { %vm453_vm12 = vmor %vm372_vm5, %vm421_vm8  ;;  %vm505_vm8 = vcmp.eq.s32.totalorder %v247_v45, %v1952_v25 }
  0xbf   : > { %vm532_vm10 = vmor %vm451_vm11, %vm500_vm6  ;;  %vm507_vm11 = vcmp.eq.s32.totalorder %v248_v46, %v1952_v25 }
  0xc0   : > { %vm534_vm3 = vmor %vm453_vm12, %vm502_vm9  ;;  %892 = vperm.xlu1 %1606, %v613_v26   ;;  %1155 = vperm.xlu0 %1604, %v613_v26  }
  0xc1   : > { %vm1500_vm0 = vmpackc.low %vm534_vm3, %vm532_vm10  ;;  %vm293_vm3 = vcmp.eq.s32.totalorder %v247_v45, %v1960_v27  ;;  %vm342_vm10 = vcmp.eq.s32.totalorder %v247_v45, %v1962_v28 }
  0xc2   : > { %1501 = vmatpush1.bf16.msk.msra.mxu0 %vm1500_vm0, %v1751_v32  ;;  %vm375_vm1 = vmor %vm294_vm13, %vm343_vm4  ;;  %vm295_vm4 = vcmp.eq.s32.totalorder %v248_v46, %v1960_v27  ;;  %vm344_vm13 = vcmp.eq.s32.totalorder %v248_v46, %v1962_v28 }
  0xc3   : > { %vm377_vm5 = vmor %vm296_vm2, %vm345_vm14  ;;  %vm423_vm14 = vcmp.eq.s32.totalorder %v247_v45, %v1967_v30 }
  0xc4   : > { %vm456_vm6 = vmor %vm375_vm1, %vm424_vm15  ;;  %vm425_vm15 = vcmp.eq.s32.totalorder %v248_v46, %v1967_v30  ;;  %897 = vperm.xlu1 %1606, %v614_v35   ;;  %1159 = vperm.xlu0 %1604, %v614_v35  }
  0xc5   : > { %vm458_vm9 = vmor %vm377_vm5, %vm426_vm7  ;;  %vm504_vm7 = vcmp.eq.s32.totalorder %v247_v45, %v1973_v31 }
  0xc6   : > { %vm537_vm12 = vmor %vm456_vm6, %vm505_vm8  ;;  %vm506_vm6 = vcmp.eq.s32.totalorder %v248_v46, %v1973_v31 }
  0xc7   : > { %vm539_vm0 = vmor %vm458_vm9, %vm507_vm11 }
  0xc8   : > { %vm1502_vm2 = vmpackc.low %vm539_vm0, %vm537_vm12  ;;  %902 = vperm.xlu1 %1606, %v615_v38   ;;  %1163 = vperm.xlu0 %1604, %v615_v38  }
  0xc9   : > { %1503 = vmatprep.subr.msk.bf16.mxu0 %vm1502_vm2, %v1751_v32  ;;  %vm374_vm1 = vmor %vm293_vm3, %vm342_vm10  ;;  %vm1292_vm3 = vcmp.lt.s32.totalorder %v232_v0, 256 }
  0xca   : > { %vm376_vm5 = vmor %vm295_vm4, %vm344_vm13 }
  0xcb   : > { %vm455_vm8 = vmor %vm374_vm1, %vm423_vm14 }
  0xcc   : > { %vm457_vm9 = vmor %vm376_vm5, %vm425_vm15 }
  0xcd   : > { %vm536_vm11 = vmor %vm455_vm8, %vm504_vm7 }
  0xce   : > { %vm538_vm0 = vmor %vm457_vm9, %vm506_vm6 }
  0xcf   : > { %vm1504_vm12 = vmpackc.low %vm538_vm0, %vm536_vm11 }
  0xd0   : > { %1505 = vmatpush1.bf16.msk.msra.mxu0 %vm1504_vm12, %v1751_v32 }
  0xd3   : > { %701 = vmatmul.mubr.f32.vlgmr.msra.gmra.mrb[0].mxu0 %v620_v47  ;;  %v616_v47 = vld [vmem:[%s2328_s3 + $0x60] sm:$0xff] }
  0xd4   : > { %706 = vmatprep.mubr.f32.mxu0 %v1750_v1  ;;  %907 = vperm.xlu1 %1606, %v616_v47  }
  0xd5   : > { %1167 = vperm.xlu0 %1604, %v616_v47   ;;  %v837_v47 = vld [vmem:[#allocation5 + $0x40] sm:$0xff] }
  0xd7   : > { %707 = vmatmul.mubr.f32.gmra.mrb[2].mxu0 %v621_v48 }
  0xd8   : > { %712 = vmatprep.mubr.f32.mxu0 %v1750_v1 }
  0xdb   : > { %713 = vmatmul.mubr.f32.gmra.mrb[4].mxu0 %v622_v49 }
  0xdc   : > { %718 = vmatprep.mubr.f32.mxu0 %v1750_v1 }
  0xdf   : > { %719 = vmatmul.mubr.f32.gmra.mrb[6].mxu0 %v623_v50  ;;  %v617_v50 = vld [vmem:[%s2328_s3 + $0x68] sm:$0xff] }
  0xe0   : > { %724 = vmatprep.mubr.f32.mxu0 %v1750_v1  ;;  %912 = vperm.xlu1 %1606, %v617_v50  }
  0xe1   : > { %1171 = vperm.xlu0 %1604, %v617_v50   ;;  %v840_v50 = vld [vmem:[#allocation5 + $0x58] sm:$0xff] }
  0xe3   : > { %725 = vmatmul.mubr.f32.gmra.mrb[8].mxu0 %v624_v51 }
  0xe4   : > { %730 = vmatprep.mubr.f32.mxu0 %v1750_v1 }
  0xe7   : > { %731 = vmatmul.mubr.f32.gmra.mrb[10].mxu0 %v625_v52 }
  0xe8   : > { %736 = vmatprep.mubr.f32.mxu0 %v1750_v1 }
  0xeb   : > { %737 = vmatmul.mubr.f32.gmra.mrb[12].mxu0 %v626_v53 }
  0xec   : > { %742 = vmatprep.mubr.f32.mxu0 %v1750_v1 }
  0xef   : > { %743 = vmatmul.mubr.f32.gmra.mrb[14].mxu0 %v627_v54 }
  0xf0   : > { %748 = vmatprep.mubr.f32.mxu0 %v1750_v1 }
  0xf3   : > { %749 = vmatmul.mubr.f32.gmra.mrb[16].mxu0 %v628_v55 }
  0xf4   : > { %754 = vmatprep.mubr.f32.mxu0 %v1750_v1 }
  0xf7   : > { %755 = vmatmul.mubr.f32.gmra.mrb[18].mxu0 %v629_v56 }
  0xf8   : > { %760 = vmatprep.mubr.f32.mxu0 %v1750_v1 }
  0xfb   : > { %761 = vmatmul.mubr.f32.gmra.mrb[20].mxu0 %v630_v57 }
  0xfc   : > { %766 = vmatprep.mubr.f32.mxu0 %v1750_v1 }
  0xff   : > { %767 = vmatmul.mubr.f32.gmra.mrb[22].mxu0 %v631_v58 }
 0x100   : > { %772 = vmatprep.mubr.f32.mxu0 %v1750_v1 }
 0x103   : > { %773 = vmatmul.mubr.f32.gmra.mrb[24].mxu0 %v632_v59  ;;  %v618_v59 = vld [vmem:[%s2328_s3 + $0x70] sm:$0xff] }
 0x104   : > { %778 = vmatprep.mubr.f32.mxu0 %v1750_v1  ;;  %917 = vperm.xlu1 %1606, %v618_v59  }
 0x107   : > { %779 = vmatmul.mubr.f32.gmra.mrb[26].mxu0 %v633_v60 }
 0x108   : > { %784 = vmatprep.mubr.f32.mxu0 %v1750_v1 }
 0x10b   : > { %785 = vmatmul.mubr.f32.gmra.mrb[28].mxu0 %v634_v61  ;;  %v619_v61 = vld [vmem:[%s2328_s3 + $0x78] sm:$0xff] }
 0x10c   : > { %790 = vmatprep.mubr.f32.mxu0 %v1750_v1  ;;  %1179 = vperm.xlu0 %1604, %v619_v61  }
 0x10d   : > { %922 = vperm.xlu1 %1606, %v619_v61  }
 0x10f   : > { %791 = vmatmul.mubr.f32.gmra.mrb[30].mxu0 %v635_v62 }
 0x111   : > { %1607 = vset.pattern.permute.xlu1 %v1753_v7 }
 0x112   : > { %1175 = vperm.xlu1 %1607, %v618_v59  }
 0x1a6   : > { %v702_v10 = vpop.f32.mrb[0].mxu0 }
 0x1a7   : > { %v704_v11 = vpop.f32.mrb[1].mxu0  ;;  %v797_v15 = vmax.f32 %v702_v10, 0.0 }
 0x1a8   : > { %v798_v18 = vmax.f32 %v704_v11, 0.0 }
 0x1aa   : > { %v708_v13 = vpop.f32.mrb[2].mxu0 }
 0x1ab   : > { %v799_v16 = vmax.f32 %v708_v13, 0.0  ;;  %v710_v17 = vpop.f32.mrb[3].mxu0 }
 0x1ac   : > { %v800_v19 = vmax.f32 %v710_v17, 0.0 }
 0x1ad   : > { %v1508_v20 = vpack.c.bf16 %v799_v16, %v797_v15 }
 0x1ae   : > { %v714_v21 = vpop.f32.mrb[4].mxu0  ;;  %v1506_v22 = vpack.c.bf16 %v800_v19, %v798_v18 }
 0x1af   : > { %v716_v24 = vpop.f32.mrb[5].mxu0  ;;  %v801_v27 = vmax.f32 %v714_v21, 0.0 }
 0x1b0   : > { %1507 = vmatprep.subr.bf16.mxu1 %v1506_v22  ;;  %v802_v30 = vmax.f32 %v716_v24, 0.0 }
 0x1b1   : > { %1509 = vmatpush1.bf16.msra.mxu1 %v1508_v20 }
 0x1b2   : > { %v720_v25 = vpop.f32.mrb[6].mxu0 }
 0x1b3   : > { %v803_v28 = vmax.f32 %v720_v25, 0.0  ;;  %v722_v29 = vpop.f32.mrb[7].mxu0 }
 0x1b4   : > { %v804_v31 = vmax.f32 %v722_v29, 0.0 }
 0x1b5   : > { %v1512_v32 = vpack.c.bf16 %v803_v28, %v801_v27 }
 0x1b6   : > { %v1510_v33 = vpack.c.bf16 %v804_v31, %v802_v30  ;;  %v726_v34 = vpop.f32.mrb[8].mxu0 }
 0x1b7   : > { %v728_v36 = vpop.f32.mrb[9].mxu0  ;;  %v805_v39 = vmax.f32 %v726_v34, 0.0 }
 0x1b8   : > { %1511 = vmatprep.subr.bf16.mxu1 %v1510_v33  ;;  %v806_v42 = vmax.f32 %v728_v36, 0.0 }
 0x1b9   : > { %1513 = vmatpush1.bf16.msra.mxu1 %v1512_v32 }
 0x1ba   : > { %v732_v37 = vpop.f32.mrb[10].mxu0 }
 0x1bb   : > { %v807_v40 = vmax.f32 %v732_v37, 0.0  ;;  %v734_v41 = vpop.f32.mrb[11].mxu0 }
 0x1bc   : > { %v808_v43 = vmax.f32 %v734_v41, 0.0  ;;  %v831_v41 = vld [vmem:[#allocation5 + $0x10] sm:$0xff] }
 0x1bd   : > { %v1516_v44 = vpack.c.bf16 %v807_v40, %v805_v39  ;;  %v829_v39 = vld [vmem:[#allocation5] sm:$0xff]  ;;  %v830_v40 = vld [vmem:[#allocation5 + $0x8] sm:$0xff] }
 0x1be   : > { %v1514_v45 = vpack.c.bf16 %v808_v43, %v806_v42  ;;  %v738_v46 = vpop.f32.mrb[12].mxu0  ;;  %v832_v42 = vld [vmem:[#allocation5 + $0x18] sm:$0xff]  ;;  %v833_v43 = vld [vmem:[#allocation5 + $0x20] sm:$0xff] }
 0x1bf   : > { %v740_v48 = vpop.f32.mrb[13].mxu0  ;;  %v809_v51 = vmax.f32 %v738_v46, 0.0  ;;  %v836_v46 = vld [vmem:[#allocation5 + $0x38] sm:$0xff] }
 0x1c0   : > { %1515 = vmatprep.subr.bf16.mxu1 %v1514_v45  ;;  %v810_v54 = vmax.f32 %v740_v48, 0.0  ;;  %v835_v45 = vld [vmem:[#allocation5 + $0x30] sm:$0xff]  ;;  %v838_v48 = vld [vmem:[#allocation5 + $0x48] sm:$0xff] }
 0x1c1   : > { %1517 = vmatpush1.bf16.msra.mxu1 %v1516_v44  ;;  %v834_v44 = vld [vmem:[#allocation5 + $0x28] sm:$0xff] }
 0x1c2   : > { %v744_v49 = vpop.f32.mrb[14].mxu0 }
 0x1c3   : > { %v811_v52 = vmax.f32 %v744_v49, 0.0  ;;  %v746_v53 = vpop.f32.mrb[15].mxu0  ;;  %v839_v49 = vld [vmem:[#allocation5 + $0x50] sm:$0xff] }
 0x1c4   : > { %v812_v55 = vmax.f32 %v746_v53, 0.0  ;;  %v843_v53 = vld [vmem:[#allocation5 + $0x70] sm:$0xff] }
 0x1c5   : > { %v1520_v56 = vpack.c.bf16 %v811_v52, %v809_v51  ;;  %v841_v51 = vld [vmem:[#allocation5 + $0x60] sm:$0xff]  ;;  %v842_v52 = vld [vmem:[#allocation5 + $0x68] sm:$0xff] }
 0x1c6   : > { %v1518_v57 = vpack.c.bf16 %v812_v55, %v810_v54  ;;  %v750_v58 = vpop.f32.mrb[16].mxu0  ;;  %v844_v54 = vld [vmem:[#allocation5 + $0x78] sm:$0xff]  ;;  %v858_v55 = vpop.permute.xlu1 %857 }
 0x1c7   : > { %v752_v60 = vpop.f32.mrb[17].mxu0  ;;  %v813_v63 = vmax.f32 %v750_v58, 0.0 }
 0x1c8   : > { %1519 = vmatprep.subr.bf16.mxu1 %v1518_v57  ;;  %v814_v5 = vmax.f32 %v752_v60, 0.0 }
 0x1c9   : > { %1521 = vmatpush1.bf16.msra.mxu1 %v1520_v56  ;;  %v848_v56 = vpop.permute.xlu0 %847 }
 0x1ca   : > { %v756_v62 = vpop.f32.mrb[18].mxu0  ;;  %v863_v57 = vpop.permute.xlu1 %862 }
 0x1cb   : > { %v815_v3 = vmax.f32 %v756_v62, 0.0  ;;  %v758_v4 = vpop.f32.mrb[19].mxu0 }
 0x1cc   : > { %v816_v6 = vmax.f32 %v758_v4, 0.0 }
 0x1cd   : > { %v1524_v8 = vpack.c.bf16 %v815_v3, %v813_v63  ;;  %v853_v58 = vpop.permute.xlu0 %852 }
 0x1ce   : > { %v1522_v9 = vpack.c.bf16 %v816_v6, %v814_v5  ;;  %v762_v10 = vpop.f32.mrb[20].mxu0  ;;  %v1124_v59 = vpop.permute.xlu1 %1123 }
 0x1cf   : > { %v764_v11 = vpop.f32.mrb[21].mxu0  ;;  %v817_v13 = vmax.f32 %v762_v10, 0.0 }
 0x1d0   : > { %1523 = vmatprep.subr.bf16.mxu1 %v1522_v9  ;;  %v818_v16 = vmax.f32 %v764_v11, 0.0 }
 0x1d1   : > { %1525 = vmatpush1.bf16.msra.mxu1 %v1524_v8  ;;  %v1120_v60 = vpop.permute.xlu0 %1119 }
 0x1d2   : > { %v768_v12 = vpop.f32.mrb[22].mxu0  ;;  %v868_v61 = vpop.permute.xlu1 %867 }
 0x1d3   : > { %v819_v14 = vmax.f32 %v768_v12, 0.0  ;;  %v770_v15 = vpop.f32.mrb[23].mxu0 }
 0x1d4   : > { %v820_v17 = vmax.f32 %v770_v15, 0.0 }
 0x1d5   : > { %v1528_v18 = vpack.c.bf16 %v819_v14, %v817_v13  ;;  %v1128_v62 = vpop.permute.xlu0 %1127 }
 0x1d6   : > { %v1526_v19 = vpack.c.bf16 %v820_v17, %v818_v16  ;;  %v774_v20 = vpop.f32.mrb[24].mxu0  ;;  %v873_v63 = vpop.permute.xlu1 %872 }
 0x1d7   : > { %v776_v21 = vpop.f32.mrb[25].mxu0  ;;  %v821_v23 = vmax.f32 %v774_v20, 0.0 }
 0x1d8   : > { %1527 = vmatprep.subr.bf16.mxu1 %v1526_v19  ;;  %v822_v26 = vmax.f32 %v776_v21, 0.0 }
 0x1d9   : > { %1529 = vmatpush1.bf16.msra.mxu1 %v1528_v18  ;;  %v1132_v3 = vpop.permute.xlu0 %1131 }
 0x1da   : > { %v780_v22 = vpop.f32.mrb[26].mxu0  ;;  %v2260_v4 = vpop.permute.xlu1 %877 }
 0x1db   : > { %v823_v24 = vmax.f32 %v780_v22, 0.0  ;;  %v782_v25 = vpop.f32.mrb[27].mxu0 }
 0x1dc   : > { %v824_v27 = vmax.f32 %v782_v25, 0.0 }
 0x1dd   : > { %v1532_v7 = vpack.c.bf16 %v823_v24, %v821_v23  ;;  %v1136_v9 = vpop.permute.xlu0 %1135 }
 0x1de   : > { %v1530_v28 = vpack.c.bf16 %v824_v27, %v822_v26  ;;  %v786_v29 = vpop.f32.mrb[28].mxu0  ;;  %v2262_v14 = vpop.permute.xlu1 %882 }
 0x1df   : > { %v788_v30 = vpop.f32.mrb[29].mxu0  ;;  %v825_v32 = vmax.f32 %v786_v29, 0.0 }
 0x1e0   : > { %1531 = vmatprep.subr.bf16.mxu1 %v1530_v28  ;;  %v826_v35 = vmax.f32 %v788_v30, 0.0 }
 0x1e1   : > { %1533 = vmatpush1.bf16.msra.mxu1 %v1532_v7  ;;  %v1140_v18 = vpop.permute.xlu0 %1139 }
 0x1e2   : > { %v2239_v31 = vpop.f32.mrb[30].mxu0  ;;  %v2264_v29 = vpop.permute.xlu1 %887 }
 0x1e3   : > { %v827_v33 = vmax.f32 %v2239_v31, 0.0  ;;  %v2242_v34 = vpop.f32.mrb[31].mxu0 }
 0x1e4   : > { %v828_v36 = vmax.f32 %v2242_v34, 0.0 }
 0x1e5   : > { %v1536_v37 = vpack.c.bf16 %v827_v33, %v825_v32 }
 0x1e6   : > { %v1534_v38 = vpack.c.bf16 %v828_v36, %v826_v35 }
 0x1e8   : > { %1535 = vmatprep.subr.bf16.mxu1 %v1534_v38  ;;  %v1144_v38 = vpop.permute.xlu0 %1143 }
 0x1e9   : > { %1537 = vmatpush1.bf16.msra.mxu1 %v1536_v37 }
 0x1ec   : > { %990 = vmatmul.mubr.f32.vlgmr.msra.gmra.mrb[0].mxu1 %v829_v39 }
 0x1ed   : > { %995 = vmatprep.mubr.f32.mxu1 %v1750_v1 }
 0x1f0   : > { %996 = vmatmul.mubr.f32.gmra.mrb[2].mxu1 %v830_v40 }
 0x1f1   : > { %1001 = vmatprep.mubr.f32.mxu1 %v1750_v1 }
 0x1f4   : > { %1002 = vmatmul.mubr.f32.gmra.mrb[4].mxu1 %v831_v41 }
 0x1f5   : > { %1007 = vmatprep.mubr.f32.mxu1 %v1750_v1 }
 0x1f8   : > { %1008 = vmatmul.mubr.f32.gmra.mrb[6].mxu1 %v832_v42 }
 0x1f9   : > { %1013 = vmatprep.mubr.f32.mxu1 %v1750_v1 }
 0x1fc   : > { %1014 = vmatmul.mubr.f32.gmra.mrb[8].mxu1 %v833_v43 }
 0x1fd   : > { %1019 = vmatprep.mubr.f32.mxu1 %v1750_v1 }
 0x200   : > { %1020 = vmatmul.mubr.f32.gmra.mrb[10].mxu1 %v834_v44 }
 0x201   : > { %1025 = vmatprep.mubr.f32.mxu1 %v1750_v1 }
 0x204   : > { %1026 = vmatmul.mubr.f32.gmra.mrb[12].mxu1 %v835_v45 }
 0x205   : > { %1031 = vmatprep.mubr.f32.mxu1 %v1750_v1 }
 0x208   : > { %1032 = vmatmul.mubr.f32.gmra.mrb[14].mxu1 %v836_v46 }
 0x209   : > { %1037 = vmatprep.mubr.f32.mxu1 %v1750_v1 }
 0x20c   : > { %1038 = vmatmul.mubr.f32.gmra.mrb[16].mxu1 %v837_v47 }
 0x20d   : > { %1043 = vmatprep.mubr.f32.mxu1 %v1750_v1 }
 0x210   : > { %1044 = vmatmul.mubr.f32.gmra.mrb[18].mxu1 %v838_v48 }
 0x211   : > { %1049 = vmatprep.mubr.f32.mxu1 %v1750_v1 }
 0x214   : > { %1050 = vmatmul.mubr.f32.gmra.mrb[20].mxu1 %v839_v49  ;;  %v893_v49 = vpop.permute.xlu1 %892 }
 0x215   : > { %1055 = vmatprep.mubr.f32.mxu1 %v1750_v1 }
 0x218   : > { %1056 = vmatmul.mubr.f32.gmra.mrb[22].mxu1 %v840_v50 }
 0x219   : > { %1061 = vmatprep.mubr.f32.mxu1 %v1750_v1 }
 0x21c   : > { %1062 = vmatmul.mubr.f32.gmra.mrb[24].mxu1 %v841_v51 }
 0x21d   : > { %1067 = vmatprep.mubr.f32.mxu1 %v1750_v1 }
 0x220   : > { %1068 = vmatmul.mubr.f32.gmra.mrb[26].mxu1 %v842_v52 }
 0x221   : > { %1073 = vmatprep.mubr.f32.mxu1 %v1750_v1 }
 0x224   : > { %1074 = vmatmul.mubr.f32.gmra.mrb[28].mxu1 %v843_v53 }
 0x225   : > { %1079 = vmatprep.mubr.f32.mxu1 %v1750_v1 }
 0x228   : > { %1080 = vmatmul.mubr.f32.gmra.mrb[30].mxu1 %v844_v54  ;;  %v1148_v54 = vpop.permute.xlu0 %1147 }
 0x2bf   : > { %v991_v5 = vpop.f32.mrb[0].mxu1 }
 0x2c0   : > { %v992_v6 = vadd.f32 %v991_v5, %v848_v56  ;;  %v993_v8 = vpop.f32.mrb[1].mxu1 }
 0x2c1   : > { %v994_v10 = vadd.f32 %v993_v8, %v848_v56 }
 0x2c2   : > { %v1086_v11 = vmax.f32 %v992_v6, 0.0 }
 0x2c3   : > { %v997_v1 = vpop.f32.mrb[2].mxu1  ;;  %v1087_v15 = vmax.f32 %v994_v10, 0.0  ;;  %v898_v10 = vpop.permute.xlu1 %897 }
 0x2c4   : > { %v998_v12 = vadd.f32 %v997_v1, %v853_v58  ;;  %v999_v13 = vpop.f32.mrb[3].mxu1  ;;  %v1182_v21 = vmul.f32 %v1120_v60, %v1086_v11 }
 0x2c5   : > { %v1000_v16 = vadd.f32 %v999_v13, %v853_v58  ;;  %v1183_v25 = vmul.f32 %v1120_v60, %v1087_v15  ;;  %v1152_v15 = vpop.permute.xlu0 %1151 }
 0x2c6   : > { %v1088_v17 = vmax.f32 %v998_v12, 0.0 }
 0x2c7   : > { %v1089_v19 = vmax.f32 %v1000_v16, 0.0  ;;  %v1003_v20 = vpop.f32.mrb[4].mxu1 }
 0x2c8   : > { %v1184_v22 = vmul.f32 %v1124_v59, %v1088_v17  ;;  %v1004_v23 = vadd.f32 %v1003_v20, %v858_v55  ;;  %v1005_v24 = vpop.f32.mrb[5].mxu1 }
 0x2c9   : > { %v1185_v26 = vmul.f32 %v1124_v59, %v1089_v19  ;;  %v1006_v27 = vadd.f32 %v1005_v24, %v858_v55 }
 0x2ca   : > { %v1214_v7 = vadd.f32 %v1184_v22, %v1182_v21  ;;  %v1090_v28 = vmax.f32 %v1004_v23, 0.0 }
 0x2cb   : > { %v1235_v30 = vadd.f32 %v1185_v26, %v1183_v25  ;;  %v1091_v32 = vmax.f32 %v1006_v27, 0.0  ;;  %v1009_v33 = vpop.f32.mrb[6].mxu1  ;;  %v903_v25 = vpop.permute.xlu1 %902 }
 0x2cc   : > { %v1186_v35 = vmul.f32 %v1128_v62, %v1090_v28  ;;  %v1010_v36 = vadd.f32 %v1009_v33, %v863_v57  ;;  %v1011_v37 = vpop.f32.mrb[7].mxu1 }
 0x2cd   : > { %v1187_v39 = vmul.f32 %v1128_v62, %v1091_v32  ;;  %v1012_v40 = vadd.f32 %v1011_v37, %v863_v57 }
 0x2ce   : > { %v1215_v41 = vadd.f32 %v1214_v7, %v1186_v35  ;;  %v1092_v42 = vmax.f32 %v1010_v36, 0.0 }
 0x2cf   : > { %v1236_v43 = vadd.f32 %v1235_v30, %v1187_v39  ;;  %v1093_v44 = vmax.f32 %v1012_v40, 0.0  ;;  %v1015_v45 = vpop.f32.mrb[8].mxu1  ;;  %v1156_v30 = vpop.permute.xlu0 %1155 }
 0x2d0   : > { %v1188_v46 = vmul.f32 %v1132_v3, %v1092_v42  ;;  %v1016_v47 = vadd.f32 %v1015_v45, %v868_v61  ;;  %v1017_v48 = vpop.f32.mrb[9].mxu1  ;;  %v908_v42 = vpop.permute.xlu1 %907 }
 0x2d1   : > { %v1189_v50 = vmul.f32 %v1132_v3, %v1093_v44  ;;  %v1018_v51 = vadd.f32 %v1017_v48, %v868_v61 }
 0x2d2   : > { %v1216_v52 = vadd.f32 %v1215_v41, %v1188_v46  ;;  %v1094_v53 = vmax.f32 %v1016_v47, 0.0 }
 0x2d3   : > { %v1237_v55 = vadd.f32 %v1236_v43, %v1189_v50  ;;  %v1095_v56 = vmax.f32 %v1018_v51, 0.0  ;;  %v1021_v58 = vpop.f32.mrb[10].mxu1  ;;  %v1160_v47 = vpop.permute.xlu0 %1159 }
 0x2d4   : > { %v1190_v59 = vmul.f32 %v1136_v9, %v1094_v53  ;;  %v1022_v60 = vadd.f32 %v1021_v58, %v873_v63  ;;  %v1023_v57 = vpop.f32.mrb[11].mxu1 }
 0x2d5   : > { %v1191_v62 = vmul.f32 %v1136_v9, %v1095_v56  ;;  %v1024_v5 = vadd.f32 %v1023_v57, %v873_v63 }
 0x2d6   : > { %v1217_v6 = vadd.f32 %v1216_v52, %v1190_v59  ;;  %v1096_v8 = vmax.f32 %v1022_v60, 0.0  ;;  %v913_v59 = vpop.permute.xlu1 %912 }
 0x2d7   : > { %v1238_v1 = vadd.f32 %v1237_v55, %v1191_v62  ;;  %v1097_v11 = vmax.f32 %v1024_v5, 0.0  ;;  %v1027_v12 = vpop.f32.mrb[12].mxu1 }
 0x2d8   : > { %v1192_v13 = vmul.f32 %v1140_v18, %v1096_v8  ;;  %v1028_v61 = vadd.f32 %v1027_v12, %v2260_v4  ;;  %v1029_v3 = vpop.f32.mrb[13].mxu1 }
 0x2d9   : > { %v1193_v16 = vmul.f32 %v1140_v18, %v1097_v11  ;;  %v1030_v17 = vadd.f32 %v1029_v3, %v2260_v4 }
 0x2da   : > { %v1218_v19 = vadd.f32 %v1217_v6, %v1192_v13  ;;  %v1098_v20 = vmax.f32 %v1028_v61, 0.0  ;;  %v1164_v6 = vpop.permute.xlu0 %1163 }
 0x2db   : > { %v1239_v21 = vadd.f32 %v1238_v1, %v1193_v16  ;;  %v1099_v22 = vmax.f32 %v1030_v17, 0.0  ;;  %v1033_v9 = vpop.f32.mrb[14].mxu1  ;;  %v918_v17 = vpop.permute.xlu1 %917 }
 0x2dc   : > { %v1194_v63 = vmul.f32 %v1144_v38, %v1098_v20  ;;  %v1034_v23 = vadd.f32 %v1033_v9, %v2262_v14  ;;  %v1035_v24 = vpop.f32.mrb[15].mxu1 }
 0x2dd   : > { %v1195_v26 = vmul.f32 %v1144_v38, %v1099_v22  ;;  %v1036_v27 = vadd.f32 %v1035_v24, %v2262_v14 }
 0x2de   : > { %v1219_v7 = vadd.f32 %v1218_v19, %v1194_v63  ;;  %v1100_v28 = vmax.f32 %v1034_v23, 0.0  ;;  %v1168_v63 = vpop.permute.xlu0 %1167 }
 0x2df   : > { %v1240_v32 = vadd.f32 %v1239_v21, %v1195_v26  ;;  %v1101_v18 = vmax.f32 %v1036_v27, 0.0  ;;  %v1039_v33 = vpop.f32.mrb[16].mxu1 }
 0x2e0   : > { %v1196_v4 = vmul.f32 %v1148_v54, %v1100_v28  ;;  %v1040_v35 = vadd.f32 %v1039_v33, %v2264_v29  ;;  %v1041_v36 = vpop.f32.mrb[17].mxu1  ;;  %v923_v33 = vpop.permute.xlu1 %922 }
 0x2e1   : > { %v1197_v37 = vmul.f32 %v1148_v54, %v1101_v18  ;;  %v1042_v39 = vadd.f32 %v1041_v36, %v2264_v29 }
 0x2e2   : > { %v1220_v40 = vadd.f32 %v1219_v7, %v1196_v4  ;;  %v1102_v41 = vmax.f32 %v1040_v35, 0.0 }
 0x2e3   : > { %v1241_v43 = vadd.f32 %v1240_v32, %v1197_v37  ;;  %v1103_v38 = vmax.f32 %v1042_v39, 0.0  ;;  %v1045_v44 = vpop.f32.mrb[18].mxu1  ;;  %v1172_v39 = vpop.permute.xlu0 %1171 }
 0x2e4   : > { %v1198_v14 = vmul.f32 %v1152_v15, %v1102_v41  ;;  %v1046_v45 = vadd.f32 %v1045_v44, %v893_v49  ;;  %v1047_v46 = vpop.f32.mrb[19].mxu1 }
 0x2e5   : > { %v1199_v48 = vmul.f32 %v1152_v15, %v1103_v38  ;;  %v1048_v50 = vadd.f32 %v1047_v46, %v893_v49  ;;  %v1176_v46 = vpop.permute.xlu1 %1175 }
 0x2e6   : > { %v1221_v51 = vadd.f32 %v1220_v40, %v1198_v14  ;;  %v1104_v52 = vmax.f32 %v1046_v45, 0.0 }
 0x2e7   : > { %v1242_v53 = vadd.f32 %v1241_v43, %v1199_v48  ;;  %v1105_v55 = vmax.f32 %v1048_v50, 0.0  ;;  %v1051_v56 = vpop.f32.mrb[20].mxu1 }
 0x2e8   : > { %v1200_v54 = vmul.f32 %v1156_v30, %v1104_v52  ;;  %v1052_v58 = vadd.f32 %v1051_v56, %v898_v10  ;;  %v1053_v29 = vpop.f32.mrb[21].mxu1 }
 0x2e9   : > { %v1201_v60 = vmul.f32 %v1156_v30, %v1105_v55  ;;  %v1054_v57 = vadd.f32 %v1053_v29, %v898_v10 }
 0x2ea   : > { %v1222_v62 = vadd.f32 %v1221_v51, %v1200_v54  ;;  %v1106_v5 = vmax.f32 %v1052_v58, 0.0 }
 0x2eb   : > { %v1243_v8 = vadd.f32 %v1242_v53, %v1201_v60  ;;  %v1107_v1 = vmax.f32 %v1054_v57, 0.0  ;;  %v1057_v11 = vpop.f32.mrb[22].mxu1  ;;  %v1180_v60 = vpop.permute.xlu0 %1179 }
 0x2ec   : > { %v1202_v12 = vmul.f32 %v1160_v47, %v1106_v5  ;;  %v1058_v13 = vadd.f32 %v1057_v11, %v903_v25  ;;  %v1059_v49 = vpop.f32.mrb[23].mxu1 }
 0x2ed   : > { %v1203_v61 = vmul.f32 %v1160_v47, %v1107_v1  ;;  %v1060_v3 = vadd.f32 %v1059_v49, %v903_v25 }
 0x2ee   : > { %v1223_v15 = vadd.f32 %v1222_v62, %v1202_v12  ;;  %v1108_v16 = vmax.f32 %v1058_v13, 0.0 }
 0x2ef   : > { %v1244_v19 = vadd.f32 %v1243_v8, %v1203_v61  ;;  %v1109_v20 = vmax.f32 %v1060_v3, 0.0  ;;  %v1063_v21 = vpop.f32.mrb[24].mxu1 }
 0x2f0   : > { %v1204_v22 = vmul.f32 %v1164_v6, %v1108_v16  ;;  %v1064_v9 = vadd.f32 %v1063_v21, %v908_v42  ;;  %v1065_v10 = vpop.f32.mrb[25].mxu1 }
 0x2f1   : > { %v1205_v23 = vmul.f32 %v1164_v6, %v1109_v20  ;;  %v1066_v24 = vadd.f32 %v1065_v10, %v908_v42 }
 0x2f2   : > { %v1224_v26 = vadd.f32 %v1223_v15, %v1204_v22  ;;  %v1110_v27 = vmax.f32 %v1064_v9, 0.0 }
 0x2f3   : > { %v1245_v7 = vadd.f32 %v1244_v19, %v1205_v23  ;;  %v1111_v28 = vmax.f32 %v1066_v24, 0.0  ;;  %v1069_v30 = vpop.f32.mrb[26].mxu1 }
 0x2f4   : > { %v1206_v32 = vmul.f32 %v1168_v63, %v1110_v27  ;;  %v1070_v18 = vadd.f32 %v1069_v30, %v913_v59  ;;  %v1071_v25 = vpop.f32.mrb[27].mxu1 }
 0x2f5   : > { %v1207_v4 = vmul.f32 %v1168_v63, %v1111_v28  ;;  %v1072_v35 = vadd.f32 %v1071_v25, %v913_v59 }
 0x2f6   : > { %v1225_v36 = vadd.f32 %v1224_v26, %v1206_v32  ;;  %v1112_v37 = vmax.f32 %v1070_v18, 0.0 }
 0x2f7   : > { %v1246_v40 = vadd.f32 %v1245_v7, %v1207_v4  ;;  %v1113_v41 = vmax.f32 %v1072_v35, 0.0  ;;  %v1075_v43 = vpop.f32.mrb[28].mxu1  ;;  %v1754_v7 = vmov 1966171168  }
 0x2f8   : > { %v1208_v38 = vmul.f32 %v1172_v39, %v1112_v37  ;;  %v1076_v44 = vadd.f32 %v1075_v43, %v918_v17  ;;  %v1077_v42 = vpop.f32.mrb[29].mxu1  ;;  %v1274_v28 = vunpack.c.l.s4 %v1754_v7 }
 0x2f9   : > { %v1209_v14 = vmul.f32 %v1172_v39, %v1113_v41  ;;  %v1078_v45 = vadd.f32 %v1077_v42, %v918_v17 }
 0x2fa   : > { %v1114_v47 = vmax.f32 %v1076_v44, 0.0  ;;  %v1226_v48 = vadd.f32 %v1225_v36, %v1208_v38  ;;  %v1275_v30 = vunpack.c.0.s8 %v1274_v28 }
 0x2fb   : > { %v1115_v50 = vmax.f32 %v1078_v45, 0.0  ;;  %v1247_v51 = vadd.f32 %v1246_v40, %v1209_v14  ;;  %v1081_v52 = vpop.f32.mrb[30].mxu1 }
 0x2fc   : > { %v1210_v53 = vmul.f32 %v1176_v46, %v1114_v47  ;;  %v1082_v55 = vadd.f32 %v1081_v52, %v923_v33  ;;  %v1083_v56 = vpop.f32.mrb[31].mxu1 }
 0x2fd   : > { %v1211_v54 = vmul.f32 %v1176_v46, %v1115_v50  ;;  %v1084_v58 = vadd.f32 %v1083_v56, %v923_v33 }
 0x2fe   : > { %v1227_v29 = vadd.f32 %v1226_v48, %v1210_v53  ;;  %v1116_v59 = vmax.f32 %v1082_v55, 0.0 }
 0x2ff   : > { %v1248_v57 = vadd.f32 %v1247_v51, %v1211_v54  ;;  %v1117_v62 = vmax.f32 %v1084_v58, 0.0 }
 0x300   : > { %v1212_v5 = vmul.f32 %v1180_v60, %v1116_v59 }
 0x301   : > { %v1213_v6 = vmul.f32 %v1180_v60, %v1117_v62 }
 0x302   : > { %v1228_v8 = vadd.f32 %v1227_v29, %v1212_v5 }
 0x303   : > { %v1249_v1 = vadd.f32 %v1248_v57, %v1213_v6 }
 0x304   : > { %v1229_v11 = vrot.slane %v1228_v8, 4 }
 0x305   : > { %v1250_v12 = vrot.slane %v1249_v1, 4 }
 0x306   : > { %v1230_v13 = vadd.f32 %v1229_v11, %v1228_v8 }
 0x307   : > { %v1251_v49 = vadd.f32 %v1250_v12, %v1249_v1 }
 0x308   : > { %v1231_v61 = vrot.slane %v1230_v13, 2 }
 0x309   : > { %v1252_v3 = vrot.slane %v1251_v49, 2 }
 0x30a   : > { %v1232_v15 = vadd.f32 %v1231_v61, %v1230_v13 }
 0x30b   : > { %v1253_v16 = vadd.f32 %v1252_v3, %v1251_v49 }
 0x30c   : > { %v1233_v17 = vrot.slane %v1232_v15, 1 }
 0x30d   : > { %v1254_v19 = vrot.slane %v1253_v16, 1 }
 0x30e   : > { %v1234_v20 = vadd.f32 %v1233_v17, %v1232_v15 }
 0x30f   : > { %v1255_v21 = vadd.f32 %v1254_v19, %v1253_v16 }
 0x310   : > { %v1256_v22 = vadd.f32 %v1234_v20, %v2239_v31  ;;  %v1278_v31 = vsub.s32 %v1275_v30, %v1932_v2 }
 0x311   : > { %v1257_v9 = vadd.f32 %v1255_v21, %v2242_v34 }
 0x312   : > { %v1465_v10 = vmul.f32 -1.442695, %v1256_v22 }
 0x313   : > { %v1466_v63 = vmul.f32 -1.442695, %v1257_v9 }
 0x314   : > { %1608 = vpow2.f32 %v1465_v10 }
 0x315   : > { %1610 = vpow2.f32 %v1466_v63 }
 0x31e   : > { %v1609_v23 = vpop.eup %1608 }
 0x31f   : > { %v1611_v24 = vpop.eup %1610  ;;  %v1264_v26 = vadd.f32 1.0, %v1609_v23 }
 0x320   : > { %v1265_v27 = vadd.f32 1.0, %v1611_v24 }
 0x321   : > { %1612 = vrcp.f32 %v1264_v26 }
 0x322   : > { %1614 = vrcp.f32 %v1265_v27 }
 0x32b   : > { %v1613_v32 = vpop.eup %1612 }
 0x32c   : > { %v1615_v34 = vpop.eup %1614 }
 0x32d   : > { %v1272_v18 = vcombine.high %v1613_v32, %v1615_v34 }
 0x32f   : > { %v1279_v25 = vrot.slane %v1272_v18, %v1278_v31 }
 0x331   : > { %v1280_v33 = vcombine.high %v1279_v25, %v1279_v25 }
 0x333   : > { %v1287_v4 = vrot.slane %v1280_v33, %v1278_v31 }
 0x335   : > { %v1288_v35 = vcombine.high %v1287_v4, %v1287_v4 }
 0x337   : > { %1294 = vst.msk [vmem:[%s228_s9] sm:$0x3] %vm1292_vm3, %v1288_v35 }
 0x338   : > { %1687 = shalt.err (!%p1684_p7)
}
 0x339   : > { %s1688_s25 = scalar_lea.hbm %s2281_s14, 32  ;;  %s1692_s11 = scalar_lea.hbm %s2329_s4, 64 }
 0x33a   : > { %p1689_p9 = scmp.ne.s32.totalorder %s2281_s14, %s1688_s25  ;;  %p1693_p0 = scmp.lt.u32.totalorder %s2281_s14, %s2329_s4 }
 0x33b   : > { %p1694_p1 = scmp.lt.u32.totalorder %s1692_s11, %s1688_s25  ;;  %p1696_p4 = scmp.lt.u32.totalorder %s1688_s25, %s2281_s14 }
 0x33c   : > { %p1690_p2 = pnand %p1689_p9, %p1872_p12 }
 0x33d   : > { %p1695_p11 = por %p1694_p1, %p1693_p0 }
 0x33e   : > { %p1691_p5 = pneg %p1690_p2 }
 0x33f   : > { %p1697_p6 = por %p1696_p4, %p1695_p11 }
 0x341   : > { %p1698_p8 = pnand %p1697_p6, %p1691_p5 }
 0x343   : > { %1701 = shalt.err (!%p1698_p8)
}
 0x344   : > { %1544 = dma.vmem_to_hbm [thread:$0]  (%p1872_p12), %s2283_s28, 32, %s2281_s14, %s1296_s20  }
 0x345 PF: > { %s1322_s21 = sand.u32 1, %s1732_s15   ;;  %p2344_p10 = scmp.ne.s32.totalorder %s2334_s22, 0 }
 0x346   : > { %p2345_p13 = scmp.ge.s32.totalorder %s1744_s18, 2  ;;  %s1323_s23 = scalar_lea.sflag [#allocation4], %s1322_s21 }
 0x348   : > { %p1555_p3 = pnand %p2345_p13, %p2344_p10 }
 0x34a   : > { %1727 = dma.done.wait (!%p1555_p3), %s1323_s23, 32  }
 0x34b   : > { %1729 = vsyncadd (!%p1555_p3), %s1323_s23, 4294967264  ;;  %p18_p7 = scmp.ge.s32.totalorder %s1837_s27, 4   ;;  %s2346_s15 = smov %s1736_s16 }
 0x34c   : > { %s2347_s16 = smov %s1740_s17  ;;  %s2348_s17 = smov %s1868_s24 }
 0x34d   : > { %s2349_s18 = smov %s1837_s27  ;;  %20 = sbr.rel (!%p18_p7) target bundleno = 6 (0x6), region = 85 }
 0x354   :  { %1328 = vsyncpa [#allocation3], 1 }
 0x355   :  { %1330 = vsyncpa [#allocation3 + $0x1], 1 }
 0x356   :  { %1331 = vsyncpa [#allocation6], 1 }
 0x357   :  { %1332 = vsyncpa [#allocation4], 1 }
 0x358   :  { %1334 = vsyncpa [#allocation4 + $0x1], 1 }

</bundles_post_ra>
